<compile_context>
chip_gen: v6e
topology: v6e:2x2x1
jax: 0.10.0
libtpu: 0.0.40
codegen_flags: <defaults>
</compile_context>

<pallas_src>
import jax
import jax.numpy as jnp
from jax import lax
from jax.experimental import pallas as pl
from jax.experimental.pallas import tpu as pltpu


# ----------------------------------------------------------------------------
# Fused Pallas kernel
# ----------------------------------------------------------------------------
def _sskip_kernel(trig_ref, x_ref,
                  wih0_ref, whh0_ref, b0_ref,
                  wih1_ref, whh1_ref, b1_ref,
                  liw_ref, lib_ref,
                  wih2_ref, whh2_ref, b2_ref,
                  w1_ref, bb1_ref, w2_ref, bb2_ref,
                  out_ref,
                  gx0_ref, act0_ref, gx1_ref, act1_ref, gx2_ref, act2_ref):
    """Whole SSkipModel forward, fully resident in VMEM.

    x_ref:    [B, T, bert]      (batch_first, as in the PyTorch module)
    gx*_ref:  hoisted per-timestep gate inputs (x @ Wih + bias), both directions
    act*_ref: [T*B, 2H] layer outputs, time-major rows (t, b)
    out_ref:  [B, out_size]
    """
    B, T, _ = x_ref.shape
    H0 = whh0_ref.shape[0] // 2
    H1 = whh1_ref.shape[0] // 2
    H2 = whh2_ref.shape[0] // 2
    f32 = jnp.float32

    def bilstm(load_gx, whh_ref, out_act_ref, H):
        """One bidirectional LSTM layer; both directions share one recurrence.

        load_gx(t) -> [B, 8H]: gate inputs (x_t @ Wih + bias) at time t, lanes
        ordered (i_f, i_b, f_f, f_b, g_f, g_b, o_f, o_b).  whh_ref is the
        block-diagonal packed recurrent matrix [2H, 8H] acting on the stacked
        state h = [h_f | h_b].
        """
        G = 8 * H
        whh = whh_ref[...]
        lane = lax.broadcasted_iota(jnp.int32, (B, G), 1)
        fwd_lane = (lane % (2 * H)) < H              # forward-direction lanes
        g_lane = (lane >= 4 * H) & (lane < 6 * H)    # cell (g) gate lanes -> tanh

        h = jnp.zeros((B, 2 * H), f32)               # [h_f | h_b]
        c = jnp.zeros((B, 2 * H), f32)
        # T is small and static -> fully unrolled so the scheduler sees across
        # timesteps and only the h @ Whh chain is serial.
        # TODO(synk): for long sequences switch to lax.fori_loop + time-chunked
        # pipelining instead of whole-array VMEM residency (esp. v7x, 64 MiB VMEM).
        for s in range(T):
            # fwd consumes input at time s, bwd at time T-1-s.
            gin = jnp.where(fwd_lane, load_gx(s), load_gx(T - 1 - s))
            gates = jnp.dot(h, whh, preferred_element_type=f32) + gin   # [B, 8H]
            acts = jnp.where(g_lane, jnp.tanh(gates), jax.nn.sigmoid(gates))
            ig = acts[:, 0:2 * H]
            fg = acts[:, 2 * H:4 * H]
            gg = acts[:, 4 * H:6 * H]
            og = acts[:, 6 * H:8 * H]
            c = fg * c + ig * gg
            h = og * jnp.tanh(c)
            # Layer output, time-major rows: fwd half at time s, bwd half at T-1-s.
            out_act_ref[s * B:(s + 1) * B, 0:H] = h[:, 0:H]
            out_act_ref[(T - 1 - s) * B:(T - s) * B, H:2 * H] = h[:, H:2 * H]

    # ---- layer 0: self.lstm (bert_size -> 2*H0) -------------------------------
    # Hoisted input projection for both directions (bias folded in).  gx0 rows
    # are batch-major (b, t) because x is batch_first; the loop gathers per-time
    # rows with static slices.
    wih0 = wih0_ref[...]
    b0 = b0_ref[...]
    for b in range(B):
        gx0_ref[b * T:(b + 1) * T, :] = (
            jnp.dot(x_ref[b], wih0, preferred_element_type=f32) + b0)

    def load_gx0(t):
        return jnp.concatenate(
            [gx0_ref[b * T + t:b * T + t + 1, :] for b in range(B)], axis=0)

    bilstm(load_gx0, whh0_ref, act0_ref, H0)

    # ---- layer 1: self.S_LSTM ---------------------------------------------------
    gx1_ref[...] = (jnp.dot(act0_ref[...], wih1_ref[...],
                            preferred_element_type=f32) + b1_ref[...])
    bilstm(lambda t: gx1_ref[t * B:(t + 1) * B, :], whh1_ref, act1_ref, H1)

    # ---- self.li + relu ---------------------------------------------------------
    li = jnp.maximum(
        jnp.dot(act1_ref[...], liw_ref[...], preferred_element_type=f32)
        + lib_ref[...], 0.0)                                      # [T*B, in_size]

    # ---- layer 2: self.S_LSTM2 --------------------------------------------------
    gx2_ref[...] = (jnp.dot(li, wih2_ref[...], preferred_element_type=f32)
                    + b2_ref[...])
    bilstm(lambda t: gx2_ref[t * B:(t + 1) * B, :], whh2_ref, act2_ref, H2)

    # ---- relu(dropout) -> trigger row gather -> 2-layer head --------------------
    # dropout == identity (inference).  relu is elementwise, so relu-then-gather
    # equals the reference's gather-of-relu.  Gather = one-hot masked reduction.
    a2 = jnp.maximum(act2_ref[...], 0.0)                           # [T*B, 2*H2]
    row_id = lax.broadcasted_iota(jnp.int32, a2.shape, 0)
    rows = []
    for b in range(B):
        tgt = trig_ref[b] * B + b                                  # time-major flat row
        rows.append(jnp.sum(jnp.where(row_id == tgt, a2, 0.0),
                            axis=0, keepdims=True))                # [1, 2*H2]
    trig_x = jnp.concatenate(rows, axis=0)                         # [B, 2*H2]

    h1 = jnp.maximum(
        jnp.dot(trig_x, w1_ref[...], preferred_element_type=f32) + bb1_ref[...], 0.0)
    out_ref[...] = (jnp.dot(h1, w2_ref[...], preferred_element_type=f32)
                    + bb2_ref[...])


# ----------------------------------------------------------------------------
# Pallas wrapper (single fused call)
# ----------------------------------------------------------------------------
_VMEM = pl.BlockSpec(memory_space=pltpu.MemorySpace.VMEM)
_SMEM = pl.BlockSpec(memory_space=pltpu.MemorySpace.SMEM)


def _fused_forward(kp, x, trigger):
    B, T, _ = x.shape
    H0 = kp["lstm"]["whh"].shape[0] // 2
    H1 = kp["slstm1"]["whh"].shape[0] // 2
    H2 = kp["slstm2"]["whh"].shape[0] // 2
    out_size = kp["out2_w"].shape[1]
    return pl.pallas_call(
        _sskip_kernel,
        out_shape=jax.ShapeDtypeStruct((B, out_size), jnp.float32),
        in_specs=[_SMEM] + [_VMEM] * 16,
        out_specs=_VMEM,
        scratch_shapes=[
            pltpu.VMEM((B * T, 8 * H0), jnp.float32),   # gx0 (batch-major rows)
            pltpu.VMEM((T * B, 2 * H0), jnp.float32),   # act0 (time-major rows)
            pltpu.VMEM((T * B, 8 * H1), jnp.float32),   # gx1
            pltpu.VMEM((T * B, 2 * H1), jnp.float32),   # act1
            pltpu.VMEM((T * B, 8 * H2), jnp.float32),   # gx2
            pltpu.VMEM((T * B, 2 * H2), jnp.float32),   # act2
        ],
    )(trigger.astype(jnp.int32), x,
      kp["lstm"]["wih"], kp["lstm"]["whh"], kp["lstm"]["b"],
      kp["slstm1"]["wih"], kp["slstm1"]["whh"], kp["slstm1"]["b"],
      kp["li_w"], kp["li_b"],
      kp["slstm2"]["wih"], kp["slstm2"]["whh"], kp["slstm2"]["b"],
      kp["out1_w"], kp["out1_b"], kp["out2_w"], kp["out2_b"])


@jax.jit
def sskip_forward(kparams, x, adj, trigger, mask):
    # adj and mask are accepted but unused, exactly like the PyTorch forward.
    del adj, mask
    out = _fused_forward(kparams, x, trigger)     # [B, out_size]
    return jnp.squeeze(out)                       # [B]  (== torch squeeze)


# ----------------------------------------------------------------------------
# Parameter init (reference layout) + one-time packing into the kernel layout
# ----------------------------------------------------------------------------
def _init_bilstm(key, d_in, h, scale=0.1):
    ks = jax.random.split(key, 6)
    mk = lambda k, shp: jax.random.normal(k, shp, jnp.float32) * scale
    return dict(
        wih_f=mk(ks[0], (d_in, 4 * h)),   # = weight_ih_l0.T (gate order i,f,g,o)
        whh_f=mk(ks[1], (h, 4 * h)),      # = weight_hh_l0.T
        b_f=mk(ks[2], (1, 4 * h)),        # = bias_ih_l0 + bias_hh_l0
        wih_b=mk(ks[3], (d_in, 4 * h)),   # reverse direction
        whh_b=mk(ks[4], (h, 4 * h)),
        b_b=mk(ks[5], (1, 4 * h)),
    )


def init_params(key, bert_size, in_size, linear_h_size, out_size=1, scale=0.1):
    ks = jax.random.split(key, 8)
    mk = lambda k, shp: jax.random.normal(k, shp, jnp.float32) * scale
    return dict(
        lstm=_init_bilstm(ks[0], bert_size, in_size // 2, scale),
        slstm1=_init_bilstm(ks[1], in_size, in_size, scale),
        slstm2=_init_bilstm(ks[2], in_size, in_size, scale),
        li_w=mk(ks[3], (2 * in_size, in_size)),
        li_b=mk(ks[4], (1, in_size)),
        out1_w=mk(ks[5], (2 * in_size, linear_h_size)),
        out1_b=jnp.zeros((1, linear_h_size), jnp.float32),
        out2_w=mk(ks[6], (linear_h_size, out_size)),
        out2_b=jnp.zeros((1, out_size), jnp.float32),
    )


def _pack_bilstm(p):
    """Pack per-direction LSTM weights into the fused-kernel layout.

    Column order of the packed 8H axis: (i_f, i_b, f_f, f_b, g_f, g_b, o_f, o_b).
    whh is block-diagonal so the stacked state [h_f | h_b] drives both
    directions with a single MXU matmul per timestep.
    """
    H = p["whh_f"].shape[0]

    def interleave(wf, wb):
        lead = wf.shape[0]
        return jnp.concatenate(
            [wf.reshape(lead, 4, H), wb.reshape(lead, 4, H)], axis=-1
        ).reshape(lead, 8 * H)

    z = jnp.zeros_like(p["whh_f"])
    return dict(
        wih=interleave(p["wih_f"], p["wih_b"]),                     # [D, 8H]
        whh=jnp.concatenate([interleave(p["whh_f"], z),
                             interleave(z, p["whh_b"])], axis=0),   # [2H, 8H]
        b=interleave(p["b_f"], p["b_b"]),                           # [1, 8H]
    )


def pack_params(params):
    """One-time repack (outside the hot path) of reference params for the kernel."""
    kp = {name: _pack_bilstm(params[name]) for name in ("lstm", "slstm1", "slstm2")}
    for k in ("li_w", "li_b", "out1_w", "out1_b", "out2_w", "out2_b"):
        kp[k] = params[k]
    return kp


# ----------------------------------------------------------------------------
# Pure-JAX reference (for numerical sanity check)
# ----------------------------------------------------------------------------
def _ref_bilstm(x_tm, p):
    H = p["whh_f"].shape[0]
    B = x_tm.shape[1]

    def cell(carry, x_t, wih, whh, b):
        h, c = carry
        gates = x_t @ wih + h @ whh + b
        i = jax.nn.sigmoid(gates[:, :H])
        f = jax.nn.sigmoid(gates[:, H:2 * H])
        g = jnp.tanh(gates[:, 2 * H:3 * H])
        o = jax.nn.sigmoid(gates[:, 3 * H:])
        c = f * c + i * g
        h = o * jnp.tanh(c)
        return (h, c), h

    init = (jnp.zeros((B, H), jnp.float32), jnp.zeros((B, H), jnp.float32))
    _, hf = lax.scan(lambda ca, xt: cell(ca, xt, p["wih_f"], p["whh_f"], p["b_f"]),
                     init, x_tm)
    _, hb = lax.scan(lambda ca, xt: cell(ca, xt, p["wih_b"], p["whh_b"], p["b_b"]),
                     init, x_tm, reverse=True)
    return jnp.concatenate([hf, hb], axis=-1)


def ref_forward(params, x, trigger):
    B = x.shape[0]
    x_tm = jnp.transpose(x, (1, 0, 2))
    x_tm = _ref_bilstm(x_tm, params["lstm"])
    x_tm = _ref_bilstm(x_tm, params["slstm1"])
    x_tm = jnp.maximum(x_tm @ params["li_w"] + params["li_b"], 0.0)
    x_tm = _ref_bilstm(x_tm, params["slstm2"])
    x_bt = jnp.maximum(jnp.transpose(x_tm, (1, 0, 2)), 0.0)
    trig = x_bt[jnp.arange(B), trigger]
    h = jnp.maximum(trig @ params["out1_w"] + params["out1_b"], 0.0)
    return jnp.squeeze(h @ params["out2_w"] + params["out2_b"])


# ----------------------------------------------------------------------------
# Main
# ----------------------------------------------------------------------------
if __name__ == "__main__":
    # Small shapes consistent with the module's forward semantics.
    B, T = 2, 8
    bert_size, in_size, linear_h_size = 32, 16, 32

    key = jax.random.PRNGKey(0)
    k_par, k_x = jax.random.split(key)

    params = init_params(k_par, bert_size, in_size, linear_h_size)
    kparams = pack_params(params)                       # kernel-layout weights

    x = jax.random.normal(k_x, (B, T, bert_size), jnp.float32)
    adj = jnp.zeros((B, T, T), jnp.float32)             # unused by forward
    mask = jnp.ones((B, T), jnp.float32)                # unused by forward
    trigger = jnp.array([3, 5], dtype=jnp.int32)        # trigger token index per batch

    out = jax.block_until_ready(sskip_forward(kparams, x, adj, trigger, mask))
    ref = jax.block_until_ready(ref_forward(params, x, trigger))

    assert out.shape == (B,), out.shape
    max_diff = float(jnp.max(jnp.abs(out - ref)))
    assert max_diff < 5e-2, f"max diff vs reference too large: {max_diff}"

    print("KERNEL_OK")
</pallas_src>

<mosaic_0001>
module attributes {stable_mosaic.version = 11 : i64} {
  func.func @_sskip_kernel(%arg0: memref<2xi32, #tpu.memory_space<smem>>, %arg1: memref<2x8x32xf32, #tpu.memory_space<vmem>>, %arg2: memref<32x64xf32, #tpu.memory_space<vmem>>, %arg3: memref<16x64xf32, #tpu.memory_space<vmem>>, %arg4: memref<1x64xf32, #tpu.memory_space<vmem>>, %arg5: memref<16x128xf32, #tpu.memory_space<vmem>>, %arg6: memref<32x128xf32, #tpu.memory_space<vmem>>, %arg7: memref<1x128xf32, #tpu.memory_space<vmem>>, %arg8: memref<32x16xf32, #tpu.memory_space<vmem>>, %arg9: memref<1x16xf32, #tpu.memory_space<vmem>>, %arg10: memref<16x128xf32, #tpu.memory_space<vmem>>, %arg11: memref<32x128xf32, #tpu.memory_space<vmem>>, %arg12: memref<1x128xf32, #tpu.memory_space<vmem>>, %arg13: memref<32x32xf32, #tpu.memory_space<vmem>>, %arg14: memref<1x32xf32, #tpu.memory_space<vmem>>, %arg15: memref<32x1xf32, #tpu.memory_space<vmem>>, %arg16: memref<1x1xf32, #tpu.memory_space<vmem>>, %arg17: memref<2x1xf32, #tpu.memory_space<vmem>>, %arg18: memref<16x64xf32, #tpu.memory_space<vmem>>, %arg19: memref<16x16xf32, #tpu.memory_space<vmem>>, %arg20: memref<16x128xf32, #tpu.memory_space<vmem>>, %arg21: memref<16x32xf32, #tpu.memory_space<vmem>>, %arg22: memref<16x128xf32, #tpu.memory_space<vmem>>, %arg23: memref<16x32xf32, #tpu.memory_space<vmem>>) attributes {dimension_semantics = [], scalar_prefetch = 0 : i64, scratch_operands = 6 : i64, tpu.core_type = #tpu.core_type<tc>} {
    %c0 = arith.constant 0 : index
    %c0_0 = arith.constant 0 : index
    %0 = vector.load %arg2[%c0, %c0_0] : memref<32x64xf32, #tpu.memory_space<vmem>>, vector<32x64xf32>
    %c0_1 = arith.constant 0 : index
    %c0_2 = arith.constant 0 : index
    %1 = vector.load %arg4[%c0_1, %c0_2] : memref<1x64xf32, #tpu.memory_space<vmem>>, vector<1x64xf32>
    %c0_3 = arith.constant 0 : index
    %c0_4 = arith.constant 0 : index
    %c0_5 = arith.constant 0 : index
    %2 = vector.load %arg1[%c0_3, %c0_4, %c0_5] : memref<2x8x32xf32, #tpu.memory_space<vmem>>, vector<1x8x32xf32>
    %3 = vector.shape_cast %2 : vector<1x8x32xf32> to vector<8x32xf32>
    %cst = arith.constant dense<0.000000e+00> : vector<8x64xf32>
    %4 = tpu.matmul %3, %0, %cst {dimension_numbers = #tpu.dot_dimension_numbers<[1], [0], [0], [1], [0, 0, 1, 1], [], []>} : vector<8x32xf32>, vector<32x64xf32>, vector<8x64xf32> -> vector<8x64xf32>
    %5 = vector.broadcast %1 : vector<1x64xf32> to vector<8x64xf32>
    %6 = arith.addf %4, %5 : vector<8x64xf32>
    %c0_6 = arith.constant 0 : index
    %c0_7 = arith.constant 0 : index
    %7 = vector.load %arg18[%c0_6, %c0_7] : memref<16x64xf32, #tpu.memory_space<vmem>>, vector<8x64xf32>
    tpu.vector_store %arg18[%c0_6, %c0_7], %6 {strides = array<i32>} : memref<16x64xf32, #tpu.memory_space<vmem>>, vector<8x64xf32>,
    %c1 = arith.constant 1 : index
    %c0_8 = arith.constant 0 : index
    %c0_9 = arith.constant 0 : index
    %8 = vector.load %arg1[%c1, %c0_8, %c0_9] : memref<2x8x32xf32, #tpu.memory_space<vmem>>, vector<1x8x32xf32>
    %9 = vector.shape_cast %8 : vector<1x8x32xf32> to vector<8x32xf32>
    %cst_10 = arith.constant dense<0.000000e+00> : vector<8x64xf32>
    %10 = tpu.matmul %9, %0, %cst_10 {dimension_numbers = #tpu.dot_dimension_numbers<[1], [0], [0], [1], [0, 0, 1, 1], [], []>} : vector<8x32xf32>, vector<32x64xf32>, vector<8x64xf32> -> vector<8x64xf32>
    %11 = vector.broadcast %1 : vector<1x64xf32> to vector<8x64xf32>
    %12 = arith.addf %10, %11 : vector<8x64xf32>
    %c8 = arith.constant 8 : index
    %c0_11 = arith.constant 0 : index
    %13 = vector.load %arg18[%c8, %c0_11] : memref<16x64xf32, #tpu.memory_space<vmem>>, vector<8x64xf32>
    tpu.vector_store %arg18[%c8, %c0_11], %12 {strides = array<i32>} : memref<16x64xf32, #tpu.memory_space<vmem>>, vector<8x64xf32>,
    %c0_12 = arith.constant 0 : index
    %c0_13 = arith.constant 0 : index
    %14 = vector.load %arg3[%c0_12, %c0_13] : memref<16x64xf32, #tpu.memory_space<vmem>>, vector<16x64xf32>
    %15 = tpu.iota {dimensions = array<i32: 1>} : vector<2x64xi32>
    %c16_i32 = arith.constant 16 : i32
    %c0_i32 = arith.constant 0 : i32
    %16 = arith.cmpi eq, %c16_i32, %c0_i32 : i32
    %c1_i32 = arith.constant 1 : i32
    %17 = arith.select %16, %c1_i32, %c16_i32 : i32
    %18 = vector.broadcast %17 : i32 to vector<2x64xi32>
    %19 = arith.remsi %15, %18 : vector<2x64xi32>
    %c0_i32_14 = arith.constant 0 : i32
    %20 = vector.broadcast %c0_i32_14 : i32 to vector<2x64xi32>
    %21 = arith.cmpi ne, %19, %20 : vector<2x64xi32>
    %c0_i32_15 = arith.constant 0 : i32
    %22 = vector.broadcast %c0_i32_15 : i32 to vector<2x64xi32>
    %23 = arith.cmpi slt, %19, %22 : vector<2x64xi32>
    %c0_i32_16 = arith.constant 0 : i32
    %24 = arith.cmpi slt, %17, %c0_i32_16 : i32
    %25 = vector.broadcast %24 : i1 to vector<2x64xi1>
    %26 = vector.broadcast %25 : vector<2x64xi1> to vector<2x64xi1>
    %27 = arith.xori %23, %26 : vector<2x64xi1>
    %28 = arith.andi %27, %21 : vector<2x64xi1>
    %29 = vector.broadcast %17 : i32 to vector<2x64xi32>
    %30 = arith.addi %19, %29 : vector<2x64xi32>
    %31 = arith.select %28, %30, %19 : vector<2x64xi1>, vector<2x64xi32>
    %c8_i32 = arith.constant 8 : i32
    %32 = vector.broadcast %c8_i32 : i32 to vector<2x64xi32>
    %33 = arith.cmpi slt, %31, %32 : vector<2x64xi32>
    %c32_i32 = arith.constant 32 : i32
    %34 = vector.broadcast %c32_i32 : i32 to vector<2x64xi32>
    %35 = arith.cmpi sge, %15, %34 : vector<2x64xi32>
    %c48_i32 = arith.constant 48 : i32
    %36 = vector.broadcast %c48_i32 : i32 to vector<2x64xi32>
    %37 = arith.cmpi slt, %15, %36 : vector<2x64xi32>
    %38 = arith.andi %35, %37 : vector<2x64xi1>
    %cst_17 = arith.constant 0.000000e+00 : f32
    %39 = vector.broadcast %cst_17 : f32 to vector<2x16xf32>
    %cst_18 = arith.constant 0.000000e+00 : f32
    %40 = vector.broadcast %cst_18 : f32 to vector<2x16xf32>
    %c0_19 = arith.constant 0 : index
    %c0_20 = arith.constant 0 : index
    %41 = vector.load %arg18[%c0_19, %c0_20] : memref<16x64xf32, #tpu.memory_space<vmem>>, vector<1x64xf32>
    %c8_21 = arith.constant 8 : index
    %c0_22 = arith.constant 0 : index
    %42 = vector.load %arg18[%c8_21, %c0_22] : memref<16x64xf32, #tpu.memory_space<vmem>>, vector<1x64xf32>
    %43 = tpu.concatenate %41, %42 in 0 : vector<1x64xf32>, vector<1x64xf32> -> vector<2x64xf32>
    %c7 = arith.constant 7 : index
    %c0_23 = arith.constant 0 : index
    %44 = vector.load %arg18[%c7, %c0_23] : memref<16x64xf32, #tpu.memory_space<vmem>>, vector<1x64xf32>
    %c15 = arith.constant 15 : index
    %c0_24 = arith.constant 0 : index
    %45 = vector.load %arg18[%c15, %c0_24] : memref<16x64xf32, #tpu.memory_space<vmem>>, vector<1x64xf32>
    %46 = tpu.concatenate %44, %45 in 0 : vector<1x64xf32>, vector<1x64xf32> -> vector<2x64xf32>
    %47 = arith.select %33, %43, %46 : vector<2x64xi1>, vector<2x64xf32>
    %cst_25 = arith.constant dense<0.000000e+00> : vector<2x64xf32>
    %48 = tpu.matmul %39, %14, %cst_25 {dimension_numbers = #tpu.dot_dimension_numbers<[1], [0], [0], [1], [0, 0, 1, 1], [], []>} : vector<2x16xf32>, vector<16x64xf32>, vector<2x64xf32> -> vector<2x64xf32>
    %49 = arith.addf %48, %47 : vector<2x64xf32>
    %50 = math.tanh %49 : vector<2x64xf32>
    %51 = arith.negf %49 : vector<2x64xf32>
    %52 = math.exp %51 : vector<2x64xf32>
    %cst_26 = arith.constant 1.000000e+00 : f32
    %53 = vector.broadcast %cst_26 : f32 to vector<2x64xf32>
    %54 = arith.addf %53, %52 : vector<2x64xf32>
    %55 = arith.divf %53, %54 : vector<2x64xf32>
    %56 = arith.select %38, %50, %55 : vector<2x64xi1>, vector<2x64xf32>
    %57 = vector.extract_strided_slice %56 {offsets = [0, 0], sizes = [2, 16], strides = [1, 1]} : vector<2x64xf32> to vector<2x16xf32>
    %58 = vector.extract_strided_slice %56 {offsets = [0, 16], sizes = [2, 16], strides = [1, 1]} : vector<2x64xf32> to vector<2x16xf32>
    %59 = vector.extract_strided_slice %56 {offsets = [0, 32], sizes = [2, 16], strides = [1, 1]} : vector<2x64xf32> to vector<2x16xf32>
    %60 = vector.extract_strided_slice %56 {offsets = [0, 48], sizes = [2, 16], strides = [1, 1]} : vector<2x64xf32> to vector<2x16xf32>
    %61 = arith.mulf %58, %40 : vector<2x16xf32>
    %62 = arith.mulf %57, %59 : vector<2x16xf32>
    %63 = arith.addf %61, %62 : vector<2x16xf32>
    %64 = math.tanh %63 : vector<2x16xf32>
    %65 = arith.mulf %60, %64 : vector<2x16xf32>
    %66 = vector.extract_strided_slice %65 {offsets = [0, 0], sizes = [2, 8], strides = [1, 1]} : vector<2x16xf32> to vector<2x8xf32>
    %c0_27 = arith.constant 0 : index
    %c0_28 = arith.constant 0 : index
    %67 = vector.load %arg19[%c0_27, %c0_28] : memref<16x16xf32, #tpu.memory_space<vmem>>, vector<2x8xf32>
    tpu.vector_store %arg19[%c0_27, %c0_28], %66 {strides = array<i32>} : memref<16x16xf32, #tpu.memory_space<vmem>>, vector<2x8xf32>,
    %68 = vector.extract_strided_slice %65 {offsets = [0, 8], sizes = [2, 8], strides = [1, 1]} : vector<2x16xf32> to vector<2x8xf32>
    %c14 = arith.constant 14 : index
    %c8_29 = arith.constant 8 : index
    %69 = vector.load %arg19[%c14, %c8_29] : memref<16x16xf32, #tpu.memory_space<vmem>>, vector<2x8xf32>
    tpu.vector_store %arg19[%c14, %c8_29], %68 {strides = array<i32>} : memref<16x16xf32, #tpu.memory_space<vmem>>, vector<2x8xf32>,
    %c1_30 = arith.constant 1 : index
    %c0_31 = arith.constant 0 : index
    %70 = vector.load %arg18[%c1_30, %c0_31] : memref<16x64xf32, #tpu.memory_space<vmem>>, vector<1x64xf32>
    %c9 = arith.constant 9 : index
    %c0_32 = arith.constant 0 : index
    %71 = vector.load %arg18[%c9, %c0_32] : memref<16x64xf32, #tpu.memory_space<vmem>>, vector<1x64xf32>
    %72 = tpu.concatenate %70, %71 in 0 : vector<1x64xf32>, vector<1x64xf32> -> vector<2x64xf32>
    %c6 = arith.constant 6 : index
    %c0_33 = arith.constant 0 : index
    %73 = vector.load %arg18[%c6, %c0_33] : memref<16x64xf32, #tpu.memory_space<vmem>>, vector<1x64xf32>
    %c14_34 = arith.constant 14 : index
    %c0_35 = arith.constant 0 : index
    %74 = vector.load %arg18[%c14_34, %c0_35] : memref<16x64xf32, #tpu.memory_space<vmem>>, vector<1x64xf32>
    %75 = tpu.concatenate %73, %74 in 0 : vector<1x64xf32>, vector<1x64xf32> -> vector<2x64xf32>
    %76 = arith.select %33, %72, %75 : vector<2x64xi1>, vector<2x64xf32>
    %cst_36 = arith.constant dense<0.000000e+00> : vector<2x64xf32>
    %77 = tpu.matmul %65, %14, %cst_36 {dimension_numbers = #tpu.dot_dimension_numbers<[1], [0], [0], [1], [0, 0, 1, 1], [], []>} : vector<2x16xf32>, vector<16x64xf32>, vector<2x64xf32> -> vector<2x64xf32>
    %78 = arith.addf %77, %76 : vector<2x64xf32>
    %79 = math.tanh %78 : vector<2x64xf32>
    %80 = arith.negf %78 : vector<2x64xf32>
    %81 = math.exp %80 : vector<2x64xf32>
    %cst_37 = arith.constant 1.000000e+00 : f32
    %82 = vector.broadcast %cst_37 : f32 to vector<2x64xf32>
    %83 = arith.addf %82, %81 : vector<2x64xf32>
    %84 = arith.divf %82, %83 : vector<2x64xf32>
    %85 = arith.select %38, %79, %84 : vector<2x64xi1>, vector<2x64xf32>
    %86 = vector.extract_strided_slice %85 {offsets = [0, 0], sizes = [2, 16], strides = [1, 1]} : vector<2x64xf32> to vector<2x16xf32>
    %87 = vector.extract_strided_slice %85 {offsets = [0, 16], sizes = [2, 16], strides = [1, 1]} : vector<2x64xf32> to vector<2x16xf32>
    %88 = vector.extract_strided_slice %85 {offsets = [0, 32], sizes = [2, 16], strides = [1, 1]} : vector<2x64xf32> to vector<2x16xf32>
    %89 = vector.extract_strided_slice %85 {offsets = [0, 48], sizes = [2, 16], strides = [1, 1]} : vector<2x64xf32> to vector<2x16xf32>
    %90 = arith.mulf %87, %63 : vector<2x16xf32>
    %91 = arith.mulf %86, %88 : vector<2x16xf32>
    %92 = arith.addf %90, %91 : vector<2x16xf32>
    %93 = math.tanh %92 : vector<2x16xf32>
    %94 = arith.mulf %89, %93 : vector<2x16xf32>
    %95 = vector.extract_strided_slice %94 {offsets = [0, 0], sizes = [2, 8], strides = [1, 1]} : vector<2x16xf32> to vector<2x8xf32>
    %c2 = arith.constant 2 : index
    %c0_38 = arith.constant 0 : index
    %96 = vector.load %arg19[%c2, %c0_38] : memref<16x16xf32, #tpu.memory_space<vmem>>, vector<2x8xf32>
    tpu.vector_store %arg19[%c2, %c0_38], %95 {strides = array<i32>} : memref<16x16xf32, #tpu.memory_space<vmem>>, vector<2x8xf32>,
    %97 = vector.extract_strided_slice %94 {offsets = [0, 8], sizes = [2, 8], strides = [1, 1]} : vector<2x16xf32> to vector<2x8xf32>
    %c12 = arith.constant 12 : index
    %c8_39 = arith.constant 8 : index
    %98 = vector.load %arg19[%c12, %c8_39] : memref<16x16xf32, #tpu.memory_space<vmem>>, vector<2x8xf32>
    tpu.vector_store %arg19[%c12, %c8_39], %97 {strides = array<i32>} : memref<16x16xf32, #tpu.memory_space<vmem>>, vector<2x8xf32>,
    %c2_40 = arith.constant 2 : index
    %c0_41 = arith.constant 0 : index
    %99 = vector.load %arg18[%c2_40, %c0_41] : memref<16x64xf32, #tpu.memory_space<vmem>>, vector<1x64xf32>
    %c10 = arith.constant 10 : index
    %c0_42 = arith.constant 0 : index
    %100 = vector.load %arg18[%c10, %c0_42] : memref<16x64xf32, #tpu.memory_space<vmem>>, vector<1x64xf32>
    %101 = tpu.concatenate %99, %100 in 0 : vector<1x64xf32>, vector<1x64xf32> -> vector<2x64xf32>
    %c5 = arith.constant 5 : index
    %c0_43 = arith.constant 0 : index
    %102 = vector.load %arg18[%c5, %c0_43] : memref<16x64xf32, #tpu.memory_space<vmem>>, vector<1x64xf32>
    %c13 = arith.constant 13 : index
    %c0_44 = arith.constant 0 : index
    %103 = vector.load %arg18[%c13, %c0_44] : memref<16x64xf32, #tpu.memory_space<vmem>>, vector<1x64xf32>
    %104 = tpu.concatenate %102, %103 in 0 : vector<1x64xf32>, vector<1x64xf32> -> vector<2x64xf32>
    %105 = arith.select %33, %101, %104 : vector<2x64xi1>, vector<2x64xf32>
    %cst_45 = arith.constant dense<0.000000e+00> : vector<2x64xf32>
    %106 = tpu.matmul %94, %14, %cst_45 {dimension_numbers = #tpu.dot_dimension_numbers<[1], [0], [0], [1], [0, 0, 1, 1], [], []>} : vector<2x16xf32>, vector<16x64xf32>, vector<2x64xf32> -> vector<2x64xf32>
    %107 = arith.addf %106, %105 : vector<2x64xf32>
    %108 = math.tanh %107 : vector<2x64xf32>
    %109 = arith.negf %107 : vector<2x64xf32>
    %110 = math.exp %109 : vector<2x64xf32>
    %cst_46 = arith.constant 1.000000e+00 : f32
    %111 = vector.broadcast %cst_46 : f32 to vector<2x64xf32>
    %112 = arith.addf %111, %110 : vector<2x64xf32>
    %113 = arith.divf %111, %112 : vector<2x64xf32>
    %114 = arith.select %38, %108, %113 : vector<2x64xi1>, vector<2x64xf32>
    %115 = vector.extract_strided_slice %114 {offsets = [0, 0], sizes = [2, 16], strides = [1, 1]} : vector<2x64xf32> to vector<2x16xf32>
    %116 = vector.extract_strided_slice %114 {offsets = [0, 16], sizes = [2, 16], strides = [1, 1]} : vector<2x64xf32> to vector<2x16xf32>
    %117 = vector.extract_strided_slice %114 {offsets = [0, 32], sizes = [2, 16], strides = [1, 1]} : vector<2x64xf32> to vector<2x16xf32>
    %118 = vector.extract_strided_slice %114 {offsets = [0, 48], sizes = [2, 16], strides = [1, 1]} : vector<2x64xf32> to vector<2x16xf32>
    %119 = arith.mulf %116, %92 : vector<2x16xf32>
    %120 = arith.mulf %115, %117 : vector<2x16xf32>
    %121 = arith.addf %119, %120 : vector<2x16xf32>
    %122 = math.tanh %121 : vector<2x16xf32>
    %123 = arith.mulf %118, %122 : vector<2x16xf32>
    %124 = vector.extract_strided_slice %123 {offsets = [0, 0], sizes = [2, 8], strides = [1, 1]} : vector<2x16xf32> to vector<2x8xf32>
    %c4 = arith.constant 4 : index
    %c0_47 = arith.constant 0 : index
    %125 = vector.load %arg19[%c4, %c0_47] : memref<16x16xf32, #tpu.memory_space<vmem>>, vector<2x8xf32>
    tpu.vector_store %arg19[%c4, %c0_47], %124 {strides = array<i32>} : memref<16x16xf32, #tpu.memory_space<vmem>>, vector<2x8xf32>,
    %126 = vector.extract_strided_slice %123 {offsets = [0, 8], sizes = [2, 8], strides = [1, 1]} : vector<2x16xf32> to vector<2x8xf32>
    %c10_48 = arith.constant 10 : index
    %c8_49 = arith.constant 8 : index
    %127 = vector.load %arg19[%c10_48, %c8_49] : memref<16x16xf32, #tpu.memory_space<vmem>>, vector<2x8xf32>
    tpu.vector_store %arg19[%c10_48, %c8_49], %126 {strides = array<i32>} : memref<16x16xf32, #tpu.memory_space<vmem>>, vector<2x8xf32>,
    %c3 = arith.constant 3 : index
    %c0_50 = arith.constant 0 : index
    %128 = vector.load %arg18[%c3, %c0_50] : memref<16x64xf32, #tpu.memory_space<vmem>>, vector<1x64xf32>
    %c11 = arith.constant 11 : index
    %c0_51 = arith.constant 0 : index
    %129 = vector.load %arg18[%c11, %c0_51] : memref<16x64xf32, #tpu.memory_space<vmem>>, vector<1x64xf32>
    %130 = tpu.concatenate %128, %129 in 0 : vector<1x64xf32>, vector<1x64xf32> -> vector<2x64xf32>
    %c4_52 = arith.constant 4 : index
    %c0_53 = arith.constant 0 : index
    %131 = vector.load %arg18[%c4_52, %c0_53] : memref<16x64xf32, #tpu.memory_space<vmem>>, vector<1x64xf32>
    %c12_54 = arith.constant 12 : index
    %c0_55 = arith.constant 0 : index
    %132 = vector.load %arg18[%c12_54, %c0_55] : memref<16x64xf32, #tpu.memory_space<vmem>>, vector<1x64xf32>
    %133 = tpu.concatenate %131, %132 in 0 : vector<1x64xf32>, vector<1x64xf32> -> vector<2x64xf32>
    %134 = arith.select %33, %130, %133 : vector<2x64xi1>, vector<2x64xf32>
    %cst_56 = arith.constant dense<0.000000e+00> : vector<2x64xf32>
    %135 = tpu.matmul %123, %14, %cst_56 {dimension_numbers = #tpu.dot_dimension_numbers<[1], [0], [0], [1], [0, 0, 1, 1], [], []>} : vector<2x16xf32>, vector<16x64xf32>, vector<2x64xf32> -> vector<2x64xf32>
    %136 = arith.addf %135, %134 : vector<2x64xf32>
    %137 = math.tanh %136 : vector<2x64xf32>
    %138 = arith.negf %136 : vector<2x64xf32>
    %139 = math.exp %138 : vector<2x64xf32>
    %cst_57 = arith.constant 1.000000e+00 : f32
    %140 = vector.broadcast %cst_57 : f32 to vector<2x64xf32>
    %141 = arith.addf %140, %139 : vector<2x64xf32>
    %142 = arith.divf %140, %141 : vector<2x64xf32>
    %143 = arith.select %38, %137, %142 : vector<2x64xi1>, vector<2x64xf32>
    %144 = vector.extract_strided_slice %143 {offsets = [0, 0], sizes = [2, 16], strides = [1, 1]} : vector<2x64xf32> to vector<2x16xf32>
    %145 = vector.extract_strided_slice %143 {offsets = [0, 16], sizes = [2, 16], strides = [1, 1]} : vector<2x64xf32> to vector<2x16xf32>
    %146 = vector.extract_strided_slice %143 {offsets = [0, 32], sizes = [2, 16], strides = [1, 1]} : vector<2x64xf32> to vector<2x16xf32>
    %147 = vector.extract_strided_slice %143 {offsets = [0, 48], sizes = [2, 16], strides = [1, 1]} : vector<2x64xf32> to vector<2x16xf32>
    %148 = arith.mulf %145, %121 : vector<2x16xf32>
    %149 = arith.mulf %144, %146 : vector<2x16xf32>
    %150 = arith.addf %148, %149 : vector<2x16xf32>
    %151 = math.tanh %150 : vector<2x16xf32>
    %152 = arith.mulf %147, %151 : vector<2x16xf32>
    %153 = vector.extract_strided_slice %152 {offsets = [0, 0], sizes = [2, 8], strides = [1, 1]} : vector<2x16xf32> to vector<2x8xf32>
    %c6_58 = arith.constant 6 : index
    %c0_59 = arith.constant 0 : index
    %154 = vector.load %arg19[%c6_58, %c0_59] : memref<16x16xf32, #tpu.memory_space<vmem>>, vector<2x8xf32>
    tpu.vector_store %arg19[%c6_58, %c0_59], %153 {strides = array<i32>} : memref<16x16xf32, #tpu.memory_space<vmem>>, vector<2x8xf32>,
    %155 = vector.extract_strided_slice %152 {offsets = [0, 8], sizes = [2, 8], strides = [1, 1]} : vector<2x16xf32> to vector<2x8xf32>
    %c8_60 = arith.constant 8 : index
    %c8_61 = arith.constant 8 : index
    %156 = vector.load %arg19[%c8_60, %c8_61] : memref<16x16xf32, #tpu.memory_space<vmem>>, vector<2x8xf32>
    tpu.vector_store %arg19[%c8_60, %c8_61], %155 {strides = array<i32>} : memref<16x16xf32, #tpu.memory_space<vmem>>, vector<2x8xf32>,
    %c4_62 = arith.constant 4 : index
    %c0_63 = arith.constant 0 : index
    %157 = vector.load %arg18[%c4_62, %c0_63] : memref<16x64xf32, #tpu.memory_space<vmem>>, vector<1x64xf32>
    %c12_64 = arith.constant 12 : index
    %c0_65 = arith.constant 0 : index
    %158 = vector.load %arg18[%c12_64, %c0_65] : memref<16x64xf32, #tpu.memory_space<vmem>>, vector<1x64xf32>
    %159 = tpu.concatenate %157, %158 in 0 : vector<1x64xf32>, vector<1x64xf32> -> vector<2x64xf32>
    %c3_66 = arith.constant 3 : index
    %c0_67 = arith.constant 0 : index
    %160 = vector.load %arg18[%c3_66, %c0_67] : memref<16x64xf32, #tpu.memory_space<vmem>>, vector<1x64xf32>
    %c11_68 = arith.constant 11 : index
    %c0_69 = arith.constant 0 : index
    %161 = vector.load %arg18[%c11_68, %c0_69] : memref<16x64xf32, #tpu.memory_space<vmem>>, vector<1x64xf32>
    %162 = tpu.concatenate %160, %161 in 0 : vector<1x64xf32>, vector<1x64xf32> -> vector<2x64xf32>
    %163 = arith.select %33, %159, %162 : vector<2x64xi1>, vector<2x64xf32>
    %cst_70 = arith.constant dense<0.000000e+00> : vector<2x64xf32>
    %164 = tpu.matmul %152, %14, %cst_70 {dimension_numbers = #tpu.dot_dimension_numbers<[1], [0], [0], [1], [0, 0, 1, 1], [], []>} : vector<2x16xf32>, vector<16x64xf32>, vector<2x64xf32> -> vector<2x64xf32>
    %165 = arith.addf %164, %163 : vector<2x64xf32>
    %166 = math.tanh %165 : vector<2x64xf32>
    %167 = arith.negf %165 : vector<2x64xf32>
    %168 = math.exp %167 : vector<2x64xf32>
    %cst_71 = arith.constant 1.000000e+00 : f32
    %169 = vector.broadcast %cst_71 : f32 to vector<2x64xf32>
    %170 = arith.addf %169, %168 : vector<2x64xf32>
    %171 = arith.divf %169, %170 : vector<2x64xf32>
    %172 = arith.select %38, %166, %171 : vector<2x64xi1>, vector<2x64xf32>
    %173 = vector.extract_strided_slice %172 {offsets = [0, 0], sizes = [2, 16], strides = [1, 1]} : vector<2x64xf32> to vector<2x16xf32>
    %174 = vector.extract_strided_slice %172 {offsets = [0, 16], sizes = [2, 16], strides = [1, 1]} : vector<2x64xf32> to vector<2x16xf32>
    %175 = vector.extract_strided_slice %172 {offsets = [0, 32], sizes = [2, 16], strides = [1, 1]} : vector<2x64xf32> to vector<2x16xf32>
    %176 = vector.extract_strided_slice %172 {offsets = [0, 48], sizes = [2, 16], strides = [1, 1]} : vector<2x64xf32> to vector<2x16xf32>
    %177 = arith.mulf %174, %150 : vector<2x16xf32>
    %178 = arith.mulf %173, %175 : vector<2x16xf32>
    %179 = arith.addf %177, %178 : vector<2x16xf32>
    %180 = math.tanh %179 : vector<2x16xf32>
    %181 = arith.mulf %176, %180 : vector<2x16xf32>
    %182 = vector.extract_strided_slice %181 {offsets = [0, 0], sizes = [2, 8], strides = [1, 1]} : vector<2x16xf32> to vector<2x8xf32>
    %c8_72 = arith.constant 8 : index
    %c0_73 = arith.constant 0 : index
    %183 = vector.load %arg19[%c8_72, %c0_73] : memref<16x16xf32, #tpu.memory_space<vmem>>, vector<2x8xf32>
    tpu.vector_store %arg19[%c8_72, %c0_73], %182 {strides = array<i32>} : memref<16x16xf32, #tpu.memory_space<vmem>>, vector<2x8xf32>,
    %184 = vector.extract_strided_slice %181 {offsets = [0, 8], sizes = [2, 8], strides = [1, 1]} : vector<2x16xf32> to vector<2x8xf32>
    %c6_74 = arith.constant 6 : index
    %c8_75 = arith.constant 8 : index
    %185 = vector.load %arg19[%c6_74, %c8_75] : memref<16x16xf32, #tpu.memory_space<vmem>>, vector<2x8xf32>
    tpu.vector_store %arg19[%c6_74, %c8_75], %184 {strides = array<i32>} : memref<16x16xf32, #tpu.memory_space<vmem>>, vector<2x8xf32>,
    %c5_76 = arith.constant 5 : index
    %c0_77 = arith.constant 0 : index
    %186 = vector.load %arg18[%c5_76, %c0_77] : memref<16x64xf32, #tpu.memory_space<vmem>>, vector<1x64xf32>
    %c13_78 = arith.constant 13 : index
    %c0_79 = arith.constant 0 : index
    %187 = vector.load %arg18[%c13_78, %c0_79] : memref<16x64xf32, #tpu.memory_space<vmem>>, vector<1x64xf32>
    %188 = tpu.concatenate %186, %187 in 0 : vector<1x64xf32>, vector<1x64xf32> -> vector<2x64xf32>
    %c2_80 = arith.constant 2 : index
    %c0_81 = arith.constant 0 : index
    %189 = vector.load %arg18[%c2_80, %c0_81] : memref<16x64xf32, #tpu.memory_space<vmem>>, vector<1x64xf32>
    %c10_82 = arith.constant 10 : index
    %c0_83 = arith.constant 0 : index
    %190 = vector.load %arg18[%c10_82, %c0_83] : memref<16x64xf32, #tpu.memory_space<vmem>>, vector<1x64xf32>
    %191 = tpu.concatenate %189, %190 in 0 : vector<1x64xf32>, vector<1x64xf32> -> vector<2x64xf32>
    %192 = arith.select %33, %188, %191 : vector<2x64xi1>, vector<2x64xf32>
    %cst_84 = arith.constant dense<0.000000e+00> : vector<2x64xf32>
    %193 = tpu.matmul %181, %14, %cst_84 {dimension_numbers = #tpu.dot_dimension_numbers<[1], [0], [0], [1], [0, 0, 1, 1], [], []>} : vector<2x16xf32>, vector<16x64xf32>, vector<2x64xf32> -> vector<2x64xf32>
    %194 = arith.addf %193, %192 : vector<2x64xf32>
    %195 = math.tanh %194 : vector<2x64xf32>
    %196 = arith.negf %194 : vector<2x64xf32>
    %197 = math.exp %196 : vector<2x64xf32>
    %cst_85 = arith.constant 1.000000e+00 : f32
    %198 = vector.broadcast %cst_85 : f32 to vector<2x64xf32>
    %199 = arith.addf %198, %197 : vector<2x64xf32>
    %200 = arith.divf %198, %199 : vector<2x64xf32>
    %201 = arith.select %38, %195, %200 : vector<2x64xi1>, vector<2x64xf32>
    %202 = vector.extract_strided_slice %201 {offsets = [0, 0], sizes = [2, 16], strides = [1, 1]} : vector<2x64xf32> to vector<2x16xf32>
    %203 = vector.extract_strided_slice %201 {offsets = [0, 16], sizes = [2, 16], strides = [1, 1]} : vector<2x64xf32> to vector<2x16xf32>
    %204 = vector.extract_strided_slice %201 {offsets = [0, 32], sizes = [2, 16], strides = [1, 1]} : vector<2x64xf32> to vector<2x16xf32>
    %205 = vector.extract_strided_slice %201 {offsets = [0, 48], sizes = [2, 16], strides = [1, 1]} : vector<2x64xf32> to vector<2x16xf32>
    %206 = arith.mulf %203, %179 : vector<2x16xf32>
    %207 = arith.mulf %202, %204 : vector<2x16xf32>
    %208 = arith.addf %206, %207 : vector<2x16xf32>
    %209 = math.tanh %208 : vector<2x16xf32>
    %210 = arith.mulf %205, %209 : vector<2x16xf32>
    %211 = vector.extract_strided_slice %210 {offsets = [0, 0], sizes = [2, 8], strides = [1, 1]} : vector<2x16xf32> to vector<2x8xf32>
    %c10_86 = arith.constant 10 : index
    %c0_87 = arith.constant 0 : index
    %212 = vector.load %arg19[%c10_86, %c0_87] : memref<16x16xf32, #tpu.memory_space<vmem>>, vector<2x8xf32>
    tpu.vector_store %arg19[%c10_86, %c0_87], %211 {strides = array<i32>} : memref<16x16xf32, #tpu.memory_space<vmem>>, vector<2x8xf32>,
    %213 = vector.extract_strided_slice %210 {offsets = [0, 8], sizes = [2, 8], strides = [1, 1]} : vector<2x16xf32> to vector<2x8xf32>
    %c4_88 = arith.constant 4 : index
    %c8_89 = arith.constant 8 : index
    %214 = vector.load %arg19[%c4_88, %c8_89] : memref<16x16xf32, #tpu.memory_space<vmem>>, vector<2x8xf32>
    tpu.vector_store %arg19[%c4_88, %c8_89], %213 {strides = array<i32>} : memref<16x16xf32, #tpu.memory_space<vmem>>, vector<2x8xf32>,
    %c6_90 = arith.constant 6 : index
    %c0_91 = arith.constant 0 : index
    %215 = vector.load %arg18[%c6_90, %c0_91] : memref<16x64xf32, #tpu.memory_space<vmem>>, vector<1x64xf32>
    %c14_92 = arith.constant 14 : index
    %c0_93 = arith.constant 0 : index
    %216 = vector.load %arg18[%c14_92, %c0_93] : memref<16x64xf32, #tpu.memory_space<vmem>>, vector<1x64xf32>
    %217 = tpu.concatenate %215, %216 in 0 : vector<1x64xf32>, vector<1x64xf32> -> vector<2x64xf32>
    %c1_94 = arith.constant 1 : index
    %c0_95 = arith.constant 0 : index
    %218 = vector.load %arg18[%c1_94, %c0_95] : memref<16x64xf32, #tpu.memory_space<vmem>>, vector<1x64xf32>
    %c9_96 = arith.constant 9 : index
    %c0_97 = arith.constant 0 : index
    %219 = vector.load %arg18[%c9_96, %c0_97] : memref<16x64xf32, #tpu.memory_space<vmem>>, vector<1x64xf32>
    %220 = tpu.concatenate %218, %219 in 0 : vector<1x64xf32>, vector<1x64xf32> -> vector<2x64xf32>
    %221 = arith.select %33, %217, %220 : vector<2x64xi1>, vector<2x64xf32>
    %cst_98 = arith.constant dense<0.000000e+00> : vector<2x64xf32>
    %222 = tpu.matmul %210, %14, %cst_98 {dimension_numbers = #tpu.dot_dimension_numbers<[1], [0], [0], [1], [0, 0, 1, 1], [], []>} : vector<2x16xf32>, vector<16x64xf32>, vector<2x64xf32> -> vector<2x64xf32>
    %223 = arith.addf %222, %221 : vector<2x64xf32>
    %224 = math.tanh %223 : vector<2x64xf32>
    %225 = arith.negf %223 : vector<2x64xf32>
    %226 = math.exp %225 : vector<2x64xf32>
    %cst_99 = arith.constant 1.000000e+00 : f32
    %227 = vector.broadcast %cst_99 : f32 to vector<2x64xf32>
    %228 = arith.addf %227, %226 : vector<2x64xf32>
    %229 = arith.divf %227, %228 : vector<2x64xf32>
    %230 = arith.select %38, %224, %229 : vector<2x64xi1>, vector<2x64xf32>
    %231 = vector.extract_strided_slice %230 {offsets = [0, 0], sizes = [2, 16], strides = [1, 1]} : vector<2x64xf32> to vector<2x16xf32>
    %232 = vector.extract_strided_slice %230 {offsets = [0, 16], sizes = [2, 16], strides = [1, 1]} : vector<2x64xf32> to vector<2x16xf32>
    %233 = vector.extract_strided_slice %230 {offsets = [0, 32], sizes = [2, 16], strides = [1, 1]} : vector<2x64xf32> to vector<2x16xf32>
    %234 = vector.extract_strided_slice %230 {offsets = [0, 48], sizes = [2, 16], strides = [1, 1]} : vector<2x64xf32> to vector<2x16xf32>
    %235 = arith.mulf %232, %208 : vector<2x16xf32>
    %236 = arith.mulf %231, %233 : vector<2x16xf32>
    %237 = arith.addf %235, %236 : vector<2x16xf32>
    %238 = math.tanh %237 : vector<2x16xf32>
    %239 = arith.mulf %234, %238 : vector<2x16xf32>
    %240 = vector.extract_strided_slice %239 {offsets = [0, 0], sizes = [2, 8], strides = [1, 1]} : vector<2x16xf32> to vector<2x8xf32>
    %c12_100 = arith.constant 12 : index
    %c0_101 = arith.constant 0 : index
    %241 = vector.load %arg19[%c12_100, %c0_101] : memref<16x16xf32, #tpu.memory_space<vmem>>, vector<2x8xf32>
    tpu.vector_store %arg19[%c12_100, %c0_101], %240 {strides = array<i32>} : memref<16x16xf32, #tpu.memory_space<vmem>>, vector<2x8xf32>,
    %242 = vector.extract_strided_slice %239 {offsets = [0, 8], sizes = [2, 8], strides = [1, 1]} : vector<2x16xf32> to vector<2x8xf32>
    %c2_102 = arith.constant 2 : index
    %c8_103 = arith.constant 8 : index
    %243 = vector.load %arg19[%c2_102, %c8_103] : memref<16x16xf32, #tpu.memory_space<vmem>>, vector<2x8xf32>
    tpu.vector_store %arg19[%c2_102, %c8_103], %242 {strides = array<i32>} : memref<16x16xf32, #tpu.memory_space<vmem>>, vector<2x8xf32>,
    %c7_104 = arith.constant 7 : index
    %c0_105 = arith.constant 0 : index
    %244 = vector.load %arg18[%c7_104, %c0_105] : memref<16x64xf32, #tpu.memory_space<vmem>>, vector<1x64xf32>
    %c15_106 = arith.constant 15 : index
    %c0_107 = arith.constant 0 : index
    %245 = vector.load %arg18[%c15_106, %c0_107] : memref<16x64xf32, #tpu.memory_space<vmem>>, vector<1x64xf32>
    %246 = tpu.concatenate %244, %245 in 0 : vector<1x64xf32>, vector<1x64xf32> -> vector<2x64xf32>
    %c0_108 = arith.constant 0 : index
    %c0_109 = arith.constant 0 : index
    %247 = vector.load %arg18[%c0_108, %c0_109] : memref<16x64xf32, #tpu.memory_space<vmem>>, vector<1x64xf32>
    %c8_110 = arith.constant 8 : index
    %c0_111 = arith.constant 0 : index
    %248 = vector.load %arg18[%c8_110, %c0_111] : memref<16x64xf32, #tpu.memory_space<vmem>>, vector<1x64xf32>
    %249 = tpu.concatenate %247, %248 in 0 : vector<1x64xf32>, vector<1x64xf32> -> vector<2x64xf32>
    %250 = arith.select %33, %246, %249 : vector<2x64xi1>, vector<2x64xf32>
    %cst_112 = arith.constant dense<0.000000e+00> : vector<2x64xf32>
    %251 = tpu.matmul %239, %14, %cst_112 {dimension_numbers = #tpu.dot_dimension_numbers<[1], [0], [0], [1], [0, 0, 1, 1], [], []>} : vector<2x16xf32>, vector<16x64xf32>, vector<2x64xf32> -> vector<2x64xf32>
    %252 = arith.addf %251, %250 : vector<2x64xf32>
    %253 = math.tanh %252 : vector<2x64xf32>
    %254 = arith.negf %252 : vector<2x64xf32>
    %255 = math.exp %254 : vector<2x64xf32>
    %cst_113 = arith.constant 1.000000e+00 : f32
    %256 = vector.broadcast %cst_113 : f32 to vector<2x64xf32>
    %257 = arith.addf %256, %255 : vector<2x64xf32>
    %258 = arith.divf %256, %257 : vector<2x64xf32>
    %259 = arith.select %38, %253, %258 : vector<2x64xi1>, vector<2x64xf32>
    %260 = vector.extract_strided_slice %259 {offsets = [0, 0], sizes = [2, 16], strides = [1, 1]} : vector<2x64xf32> to vector<2x16xf32>
    %261 = vector.extract_strided_slice %259 {offsets = [0, 16], sizes = [2, 16], strides = [1, 1]} : vector<2x64xf32> to vector<2x16xf32>
    %262 = vector.extract_strided_slice %259 {offsets = [0, 32], sizes = [2, 16], strides = [1, 1]} : vector<2x64xf32> to vector<2x16xf32>
    %263 = vector.extract_strided_slice %259 {offsets = [0, 48], sizes = [2, 16], strides = [1, 1]} : vector<2x64xf32> to vector<2x16xf32>
    %264 = arith.mulf %261, %237 : vector<2x16xf32>
    %265 = arith.mulf %260, %262 : vector<2x16xf32>
    %266 = arith.addf %264, %265 : vector<2x16xf32>
    %267 = math.tanh %266 : vector<2x16xf32>
    %268 = arith.mulf %263, %267 : vector<2x16xf32>
    %269 = vector.extract_strided_slice %268 {offsets = [0, 0], sizes = [2, 8], strides = [1, 1]} : vector<2x16xf32> to vector<2x8xf32>
    %c14_114 = arith.constant 14 : index
    %c0_115 = arith.constant 0 : index
    %270 = vector.load %arg19[%c14_114, %c0_115] : memref<16x16xf32, #tpu.memory_space<vmem>>, vector<2x8xf32>
    tpu.vector_store %arg19[%c14_114, %c0_115], %269 {strides = array<i32>} : memref<16x16xf32, #tpu.memory_space<vmem>>, vector<2x8xf32>,
    %271 = vector.extract_strided_slice %268 {offsets = [0, 8], sizes = [2, 8], strides = [1, 1]} : vector<2x16xf32> to vector<2x8xf32>
    %c0_116 = arith.constant 0 : index
    %c8_117 = arith.constant 8 : index
    %272 = vector.load %arg19[%c0_116, %c8_117] : memref<16x16xf32, #tpu.memory_space<vmem>>, vector<2x8xf32>
    tpu.vector_store %arg19[%c0_116, %c8_117], %271 {strides = array<i32>} : memref<16x16xf32, #tpu.memory_space<vmem>>, vector<2x8xf32>,
    %c0_118 = arith.constant 0 : index
    %c0_119 = arith.constant 0 : index
    %273 = vector.load %arg19[%c0_118, %c0_119] : memref<16x16xf32, #tpu.memory_space<vmem>>, vector<16x16xf32>
    %c0_120 = arith.constant 0 : index
    %c0_121 = arith.constant 0 : index
    %274 = vector.load %arg5[%c0_120, %c0_121] : memref<16x128xf32, #tpu.memory_space<vmem>>, vector<16x128xf32>
    %cst_122 = arith.constant dense<0.000000e+00> : vector<16x128xf32>
    %275 = tpu.matmul %273, %274, %cst_122 {dimension_numbers = #tpu.dot_dimension_numbers<[1], [0], [0], [1], [0, 0, 1, 1], [], []>} : vector<16x16xf32>, vector<16x128xf32>, vector<16x128xf32> -> vector<16x128xf32>
    %c0_123 = arith.constant 0 : index
    %c0_124 = arith.constant 0 : index
    %276 = vector.load %arg7[%c0_123, %c0_124] : memref<1x128xf32, #tpu.memory_space<vmem>>, vector<1x128xf32>
    %277 = vector.broadcast %276 : vector<1x128xf32> to vector<16x128xf32>
    %278 = arith.addf %275, %277 : vector<16x128xf32>
    %c0_125 = arith.constant 0 : index
    %c0_126 = arith.constant 0 : index
    %279 = vector.load %arg20[%c0_125, %c0_126] : memref<16x128xf32, #tpu.memory_space<vmem>>, vector<16x128xf32>
    tpu.vector_store %arg20[%c0_125, %c0_126], %278 {strides = array<i32>} : memref<16x128xf32, #tpu.memory_space<vmem>>, vector<16x128xf32>,
    %c0_127 = arith.constant 0 : index
    %c0_128 = arith.constant 0 : index
    %280 = vector.load %arg6[%c0_127, %c0_128] : memref<32x128xf32, #tpu.memory_space<vmem>>, vector<32x128xf32>
    %281 = tpu.iota {dimensions = array<i32: 1>} : vector<2x128xi32>
    %c32_i32_129 = arith.constant 32 : i32
    %c0_i32_130 = arith.constant 0 : i32
    %282 = arith.cmpi eq, %c32_i32_129, %c0_i32_130 : i32
    %c1_i32_131 = arith.constant 1 : i32
    %283 = arith.select %282, %c1_i32_131, %c32_i32_129 : i32
    %284 = vector.broadcast %283 : i32 to vector<2x128xi32>
    %285 = arith.remsi %281, %284 : vector<2x128xi32>
    %c0_i32_132 = arith.constant 0 : i32
    %286 = vector.broadcast %c0_i32_132 : i32 to vector<2x128xi32>
    %287 = arith.cmpi ne, %285, %286 : vector<2x128xi32>
    %c0_i32_133 = arith.constant 0 : i32
    %288 = vector.broadcast %c0_i32_133 : i32 to vector<2x128xi32>
    %289 = arith.cmpi slt, %285, %288 : vector<2x128xi32>
    %c0_i32_134 = arith.constant 0 : i32
    %290 = arith.cmpi slt, %283, %c0_i32_134 : i32
    %291 = vector.broadcast %290 : i1 to vector<2x128xi1>
    %292 = vector.broadcast %291 : vector<2x128xi1> to vector<2x128xi1>
    %293 = arith.xori %289, %292 : vector<2x128xi1>
    %294 = arith.andi %293, %287 : vector<2x128xi1>
    %295 = vector.broadcast %283 : i32 to vector<2x128xi32>
    %296 = arith.addi %285, %295 : vector<2x128xi32>
    %297 = arith.select %294, %296, %285 : vector<2x128xi1>, vector<2x128xi32>
    %c16_i32_135 = arith.constant 16 : i32
    %298 = vector.broadcast %c16_i32_135 : i32 to vector<2x128xi32>
    %299 = arith.cmpi slt, %297, %298 : vector<2x128xi32>
    %c64_i32 = arith.constant 64 : i32
    %300 = vector.broadcast %c64_i32 : i32 to vector<2x128xi32>
    %301 = arith.cmpi sge, %281, %300 : vector<2x128xi32>
    %c96_i32 = arith.constant 96 : i32
    %302 = vector.broadcast %c96_i32 : i32 to vector<2x128xi32>
    %303 = arith.cmpi slt, %281, %302 : vector<2x128xi32>
    %304 = arith.andi %301, %303 : vector<2x128xi1>
    %cst_136 = arith.constant 0.000000e+00 : f32
    %305 = vector.broadcast %cst_136 : f32 to vector<2x32xf32>
    %cst_137 = arith.constant 0.000000e+00 : f32
    %306 = vector.broadcast %cst_137 : f32 to vector<2x32xf32>
    %c0_138 = arith.constant 0 : index
    %c0_139 = arith.constant 0 : index
    %307 = vector.load %arg20[%c0_138, %c0_139] : memref<16x128xf32, #tpu.memory_space<vmem>>, vector<2x128xf32>
    %c14_140 = arith.constant 14 : index
    %c0_141 = arith.constant 0 : index
    %308 = vector.load %arg20[%c14_140, %c0_141] : memref<16x128xf32, #tpu.memory_space<vmem>>, vector<2x128xf32>
    %309 = arith.select %299, %307, %308 : vector<2x128xi1>, vector<2x128xf32>
    %cst_142 = arith.constant dense<0.000000e+00> : vector<2x128xf32>
    %310 = tpu.matmul %305, %280, %cst_142 {dimension_numbers = #tpu.dot_dimension_numbers<[1], [0], [0], [1], [0, 0, 1, 1], [], []>} : vector<2x32xf32>, vector<32x128xf32>, vector<2x128xf32> -> vector<2x128xf32>
    %311 = arith.addf %310, %309 : vector<2x128xf32>
    %312 = math.tanh %311 : vector<2x128xf32>
    %313 = arith.negf %311 : vector<2x128xf32>
    %314 = math.exp %313 : vector<2x128xf32>
    %cst_143 = arith.constant 1.000000e+00 : f32
    %315 = vector.broadcast %cst_143 : f32 to vector<2x128xf32>
    %316 = arith.addf %315, %314 : vector<2x128xf32>
    %317 = arith.divf %315, %316 : vector<2x128xf32>
    %318 = arith.select %304, %312, %317 : vector<2x128xi1>, vector<2x128xf32>
    %319 = vector.extract_strided_slice %318 {offsets = [0, 0], sizes = [2, 32], strides = [1, 1]} : vector<2x128xf32> to vector<2x32xf32>
    %320 = vector.extract_strided_slice %318 {offsets = [0, 32], sizes = [2, 32], strides = [1, 1]} : vector<2x128xf32> to vector<2x32xf32>
    %321 = vector.extract_strided_slice %318 {offsets = [0, 64], sizes = [2, 32], strides = [1, 1]} : vector<2x128xf32> to vector<2x32xf32>
    %322 = vector.extract_strided_slice %318 {offsets = [0, 96], sizes = [2, 32], strides = [1, 1]} : vector<2x128xf32> to vector<2x32xf32>
    %323 = arith.mulf %320, %306 : vector<2x32xf32>
    %324 = arith.mulf %319, %321 : vector<2x32xf32>
    %325 = arith.addf %323, %324 : vector<2x32xf32>
    %326 = math.tanh %325 : vector<2x32xf32>
    %327 = arith.mulf %322, %326 : vector<2x32xf32>
    %328 = vector.extract_strided_slice %327 {offsets = [0, 0], sizes = [2, 16], strides = [1, 1]} : vector<2x32xf32> to vector<2x16xf32>
    %c0_144 = arith.constant 0 : index
    %c0_145 = arith.constant 0 : index
    %329 = vector.load %arg21[%c0_144, %c0_145] : memref<16x32xf32, #tpu.memory_space<vmem>>, vector<2x16xf32>
    tpu.vector_store %arg21[%c0_144, %c0_145], %328 {strides = array<i32>} : memref<16x32xf32, #tpu.memory_space<vmem>>, vector<2x16xf32>,
    %330 = vector.extract_strided_slice %327 {offsets = [0, 16], sizes = [2, 16], strides = [1, 1]} : vector<2x32xf32> to vector<2x16xf32>
    %c14_146 = arith.constant 14 : index
    %c16 = arith.constant 16 : index
    %331 = vector.load %arg21[%c14_146, %c16] : memref<16x32xf32, #tpu.memory_space<vmem>>, vector<2x16xf32>
    tpu.vector_store %arg21[%c14_146, %c16], %330 {strides = array<i32>} : memref<16x32xf32, #tpu.memory_space<vmem>>, vector<2x16xf32>,
    %c2_147 = arith.constant 2 : index
    %c0_148 = arith.constant 0 : index
    %332 = vector.load %arg20[%c2_147, %c0_148] : memref<16x128xf32, #tpu.memory_space<vmem>>, vector<2x128xf32>
    %c12_149 = arith.constant 12 : index
    %c0_150 = arith.constant 0 : index
    %333 = vector.load %arg20[%c12_149, %c0_150] : memref<16x128xf32, #tpu.memory_space<vmem>>, vector<2x128xf32>
    %334 = arith.select %299, %332, %333 : vector<2x128xi1>, vector<2x128xf32>
    %cst_151 = arith.constant dense<0.000000e+00> : vector<2x128xf32>
    %335 = tpu.matmul %327, %280, %cst_151 {dimension_numbers = #tpu.dot_dimension_numbers<[1], [0], [0], [1], [0, 0, 1, 1], [], []>} : vector<2x32xf32>, vector<32x128xf32>, vector<2x128xf32> -> vector<2x128xf32>
    %336 = arith.addf %335, %334 : vector<2x128xf32>
    %337 = math.tanh %336 : vector<2x128xf32>
    %338 = arith.negf %336 : vector<2x128xf32>
    %339 = math.exp %338 : vector<2x128xf32>
    %cst_152 = arith.constant 1.000000e+00 : f32
    %340 = vector.broadcast %cst_152 : f32 to vector<2x128xf32>
    %341 = arith.addf %340, %339 : vector<2x128xf32>
    %342 = arith.divf %340, %341 : vector<2x128xf32>
    %343 = arith.select %304, %337, %342 : vector<2x128xi1>, vector<2x128xf32>
    %344 = vector.extract_strided_slice %343 {offsets = [0, 0], sizes = [2, 32], strides = [1, 1]} : vector<2x128xf32> to vector<2x32xf32>
    %345 = vector.extract_strided_slice %343 {offsets = [0, 32], sizes = [2, 32], strides = [1, 1]} : vector<2x128xf32> to vector<2x32xf32>
    %346 = vector.extract_strided_slice %343 {offsets = [0, 64], sizes = [2, 32], strides = [1, 1]} : vector<2x128xf32> to vector<2x32xf32>
    %347 = vector.extract_strided_slice %343 {offsets = [0, 96], sizes = [2, 32], strides = [1, 1]} : vector<2x128xf32> to vector<2x32xf32>
    %348 = arith.mulf %345, %325 : vector<2x32xf32>
    %349 = arith.mulf %344, %346 : vector<2x32xf32>
    %350 = arith.addf %348, %349 : vector<2x32xf32>
    %351 = math.tanh %350 : vector<2x32xf32>
    %352 = arith.mulf %347, %351 : vector<2x32xf32>
    %353 = vector.extract_strided_slice %352 {offsets = [0, 0], sizes = [2, 16], strides = [1, 1]} : vector<2x32xf32> to vector<2x16xf32>
    %c2_153 = arith.constant 2 : index
    %c0_154 = arith.constant 0 : index
    %354 = vector.load %arg21[%c2_153, %c0_154] : memref<16x32xf32, #tpu.memory_space<vmem>>, vector<2x16xf32>
    tpu.vector_store %arg21[%c2_153, %c0_154], %353 {strides = array<i32>} : memref<16x32xf32, #tpu.memory_space<vmem>>, vector<2x16xf32>,
    %355 = vector.extract_strided_slice %352 {offsets = [0, 16], sizes = [2, 16], strides = [1, 1]} : vector<2x32xf32> to vector<2x16xf32>
    %c12_155 = arith.constant 12 : index
    %c16_156 = arith.constant 16 : index
    %356 = vector.load %arg21[%c12_155, %c16_156] : memref<16x32xf32, #tpu.memory_space<vmem>>, vector<2x16xf32>
    tpu.vector_store %arg21[%c12_155, %c16_156], %355 {strides = array<i32>} : memref<16x32xf32, #tpu.memory_space<vmem>>, vector<2x16xf32>,
    %c4_157 = arith.constant 4 : index
    %c0_158 = arith.constant 0 : index
    %357 = vector.load %arg20[%c4_157, %c0_158] : memref<16x128xf32, #tpu.memory_space<vmem>>, vector<2x128xf32>
    %c10_159 = arith.constant 10 : index
    %c0_160 = arith.constant 0 : index
    %358 = vector.load %arg20[%c10_159, %c0_160] : memref<16x128xf32, #tpu.memory_space<vmem>>, vector<2x128xf32>
    %359 = arith.select %299, %357, %358 : vector<2x128xi1>, vector<2x128xf32>
    %cst_161 = arith.constant dense<0.000000e+00> : vector<2x128xf32>
    %360 = tpu.matmul %352, %280, %cst_161 {dimension_numbers = #tpu.dot_dimension_numbers<[1], [0], [0], [1], [0, 0, 1, 1], [], []>} : vector<2x32xf32>, vector<32x128xf32>, vector<2x128xf32> -> vector<2x128xf32>
    %361 = arith.addf %360, %359 : vector<2x128xf32>
    %362 = math.tanh %361 : vector<2x128xf32>
    %363 = arith.negf %361 : vector<2x128xf32>
    %364 = math.exp %363 : vector<2x128xf32>
    %cst_162 = arith.constant 1.000000e+00 : f32
    %365 = vector.broadcast %cst_162 : f32 to vector<2x128xf32>
    %366 = arith.addf %365, %364 : vector<2x128xf32>
    %367 = arith.divf %365, %366 : vector<2x128xf32>
    %368 = arith.select %304, %362, %367 : vector<2x128xi1>, vector<2x128xf32>
    %369 = vector.extract_strided_slice %368 {offsets = [0, 0], sizes = [2, 32], strides = [1, 1]} : vector<2x128xf32> to vector<2x32xf32>
    %370 = vector.extract_strided_slice %368 {offsets = [0, 32], sizes = [2, 32], strides = [1, 1]} : vector<2x128xf32> to vector<2x32xf32>
    %371 = vector.extract_strided_slice %368 {offsets = [0, 64], sizes = [2, 32], strides = [1, 1]} : vector<2x128xf32> to vector<2x32xf32>
    %372 = vector.extract_strided_slice %368 {offsets = [0, 96], sizes = [2, 32], strides = [1, 1]} : vector<2x128xf32> to vector<2x32xf32>
    %373 = arith.mulf %370, %350 : vector<2x32xf32>
    %374 = arith.mulf %369, %371 : vector<2x32xf32>
    %375 = arith.addf %373, %374 : vector<2x32xf32>
    %376 = math.tanh %375 : vector<2x32xf32>
    %377 = arith.mulf %372, %376 : vector<2x32xf32>
    %378 = vector.extract_strided_slice %377 {offsets = [0, 0], sizes = [2, 16], strides = [1, 1]} : vector<2x32xf32> to vector<2x16xf32>
    %c4_163 = arith.constant 4 : index
    %c0_164 = arith.constant 0 : index
    %379 = vector.load %arg21[%c4_163, %c0_164] : memref<16x32xf32, #tpu.memory_space<vmem>>, vector<2x16xf32>
    tpu.vector_store %arg21[%c4_163, %c0_164], %378 {strides = array<i32>} : memref<16x32xf32, #tpu.memory_space<vmem>>, vector<2x16xf32>,
    %380 = vector.extract_strided_slice %377 {offsets = [0, 16], sizes = [2, 16], strides = [1, 1]} : vector<2x32xf32> to vector<2x16xf32>
    %c10_165 = arith.constant 10 : index
    %c16_166 = arith.constant 16 : index
    %381 = vector.load %arg21[%c10_165, %c16_166] : memref<16x32xf32, #tpu.memory_space<vmem>>, vector<2x16xf32>
    tpu.vector_store %arg21[%c10_165, %c16_166], %380 {strides = array<i32>} : memref<16x32xf32, #tpu.memory_space<vmem>>, vector<2x16xf32>,
    %c6_167 = arith.constant 6 : index
    %c0_168 = arith.constant 0 : index
    %382 = vector.load %arg20[%c6_167, %c0_168] : memref<16x128xf32, #tpu.memory_space<vmem>>, vector<2x128xf32>
    %c8_169 = arith.constant 8 : index
    %c0_170 = arith.constant 0 : index
    %383 = vector.load %arg20[%c8_169, %c0_170] : memref<16x128xf32, #tpu.memory_space<vmem>>, vector<2x128xf32>
    %384 = arith.select %299, %382, %383 : vector<2x128xi1>, vector<2x128xf32>
    %cst_171 = arith.constant dense<0.000000e+00> : vector<2x128xf32>
    %385 = tpu.matmul %377, %280, %cst_171 {dimension_numbers = #tpu.dot_dimension_numbers<[1], [0], [0], [1], [0, 0, 1, 1], [], []>} : vector<2x32xf32>, vector<32x128xf32>, vector<2x128xf32> -> vector<2x128xf32>
    %386 = arith.addf %385, %384 : vector<2x128xf32>
    %387 = math.tanh %386 : vector<2x128xf32>
    %388 = arith.negf %386 : vector<2x128xf32>
    %389 = math.exp %388 : vector<2x128xf32>
    %cst_172 = arith.constant 1.000000e+00 : f32
    %390 = vector.broadcast %cst_172 : f32 to vector<2x128xf32>
    %391 = arith.addf %390, %389 : vector<2x128xf32>
    %392 = arith.divf %390, %391 : vector<2x128xf32>
    %393 = arith.select %304, %387, %392 : vector<2x128xi1>, vector<2x128xf32>
    %394 = vector.extract_strided_slice %393 {offsets = [0, 0], sizes = [2, 32], strides = [1, 1]} : vector<2x128xf32> to vector<2x32xf32>
    %395 = vector.extract_strided_slice %393 {offsets = [0, 32], sizes = [2, 32], strides = [1, 1]} : vector<2x128xf32> to vector<2x32xf32>
    %396 = vector.extract_strided_slice %393 {offsets = [0, 64], sizes = [2, 32], strides = [1, 1]} : vector<2x128xf32> to vector<2x32xf32>
    %397 = vector.extract_strided_slice %393 {offsets = [0, 96], sizes = [2, 32], strides = [1, 1]} : vector<2x128xf32> to vector<2x32xf32>
    %398 = arith.mulf %395, %375 : vector<2x32xf32>
    %399 = arith.mulf %394, %396 : vector<2x32xf32>
    %400 = arith.addf %398, %399 : vector<2x32xf32>
    %401 = math.tanh %400 : vector<2x32xf32>
    %402 = arith.mulf %397, %401 : vector<2x32xf32>
    %403 = vector.extract_strided_slice %402 {offsets = [0, 0], sizes = [2, 16], strides = [1, 1]} : vector<2x32xf32> to vector<2x16xf32>
    %c6_173 = arith.constant 6 : index
    %c0_174 = arith.constant 0 : index
    %404 = vector.load %arg21[%c6_173, %c0_174] : memref<16x32xf32, #tpu.memory_space<vmem>>, vector<2x16xf32>
    tpu.vector_store %arg21[%c6_173, %c0_174], %403 {strides = array<i32>} : memref<16x32xf32, #tpu.memory_space<vmem>>, vector<2x16xf32>,
    %405 = vector.extract_strided_slice %402 {offsets = [0, 16], sizes = [2, 16], strides = [1, 1]} : vector<2x32xf32> to vector<2x16xf32>
    %c8_175 = arith.constant 8 : index
    %c16_176 = arith.constant 16 : index
    %406 = vector.load %arg21[%c8_175, %c16_176] : memref<16x32xf32, #tpu.memory_space<vmem>>, vector<2x16xf32>
    tpu.vector_store %arg21[%c8_175, %c16_176], %405 {strides = array<i32>} : memref<16x32xf32, #tpu.memory_space<vmem>>, vector<2x16xf32>,
    %c8_177 = arith.constant 8 : index
    %c0_178 = arith.constant 0 : index
    %407 = vector.load %arg20[%c8_177, %c0_178] : memref<16x128xf32, #tpu.memory_space<vmem>>, vector<2x128xf32>
    %c6_179 = arith.constant 6 : index
    %c0_180 = arith.constant 0 : index
    %408 = vector.load %arg20[%c6_179, %c0_180] : memref<16x128xf32, #tpu.memory_space<vmem>>, vector<2x128xf32>
    %409 = arith.select %299, %407, %408 : vector<2x128xi1>, vector<2x128xf32>
    %cst_181 = arith.constant dense<0.000000e+00> : vector<2x128xf32>
    %410 = tpu.matmul %402, %280, %cst_181 {dimension_numbers = #tpu.dot_dimension_numbers<[1], [0], [0], [1], [0, 0, 1, 1], [], []>} : vector<2x32xf32>, vector<32x128xf32>, vector<2x128xf32> -> vector<2x128xf32>
    %411 = arith.addf %410, %409 : vector<2x128xf32>
    %412 = math.tanh %411 : vector<2x128xf32>
    %413 = arith.negf %411 : vector<2x128xf32>
    %414 = math.exp %413 : vector<2x128xf32>
    %cst_182 = arith.constant 1.000000e+00 : f32
    %415 = vector.broadcast %cst_182 : f32 to vector<2x128xf32>
    %416 = arith.addf %415, %414 : vector<2x128xf32>
    %417 = arith.divf %415, %416 : vector<2x128xf32>
    %418 = arith.select %304, %412, %417 : vector<2x128xi1>, vector<2x128xf32>
    %419 = vector.extract_strided_slice %418 {offsets = [0, 0], sizes = [2, 32], strides = [1, 1]} : vector<2x128xf32> to vector<2x32xf32>
    %420 = vector.extract_strided_slice %418 {offsets = [0, 32], sizes = [2, 32], strides = [1, 1]} : vector<2x128xf32> to vector<2x32xf32>
    %421 = vector.extract_strided_slice %418 {offsets = [0, 64], sizes = [2, 32], strides = [1, 1]} : vector<2x128xf32> to vector<2x32xf32>
    %422 = vector.extract_strided_slice %418 {offsets = [0, 96], sizes = [2, 32], strides = [1, 1]} : vector<2x128xf32> to vector<2x32xf32>
    %423 = arith.mulf %420, %400 : vector<2x32xf32>
    %424 = arith.mulf %419, %421 : vector<2x32xf32>
    %425 = arith.addf %423, %424 : vector<2x32xf32>
    %426 = math.tanh %425 : vector<2x32xf32>
    %427 = arith.mulf %422, %426 : vector<2x32xf32>
    %428 = vector.extract_strided_slice %427 {offsets = [0, 0], sizes = [2, 16], strides = [1, 1]} : vector<2x32xf32> to vector<2x16xf32>
    %c8_183 = arith.constant 8 : index
    %c0_184 = arith.constant 0 : index
    %429 = vector.load %arg21[%c8_183, %c0_184] : memref<16x32xf32, #tpu.memory_space<vmem>>, vector<2x16xf32>
    tpu.vector_store %arg21[%c8_183, %c0_184], %428 {strides = array<i32>} : memref<16x32xf32, #tpu.memory_space<vmem>>, vector<2x16xf32>,
    %430 = vector.extract_strided_slice %427 {offsets = [0, 16], sizes = [2, 16], strides = [1, 1]} : vector<2x32xf32> to vector<2x16xf32>
    %c6_185 = arith.constant 6 : index
    %c16_186 = arith.constant 16 : index
    %431 = vector.load %arg21[%c6_185, %c16_186] : memref<16x32xf32, #tpu.memory_space<vmem>>, vector<2x16xf32>
    tpu.vector_store %arg21[%c6_185, %c16_186], %430 {strides = array<i32>} : memref<16x32xf32, #tpu.memory_space<vmem>>, vector<2x16xf32>,
    %c10_187 = arith.constant 10 : index
    %c0_188 = arith.constant 0 : index
    %432 = vector.load %arg20[%c10_187, %c0_188] : memref<16x128xf32, #tpu.memory_space<vmem>>, vector<2x128xf32>
    %c4_189 = arith.constant 4 : index
    %c0_190 = arith.constant 0 : index
    %433 = vector.load %arg20[%c4_189, %c0_190] : memref<16x128xf32, #tpu.memory_space<vmem>>, vector<2x128xf32>
    %434 = arith.select %299, %432, %433 : vector<2x128xi1>, vector<2x128xf32>
    %cst_191 = arith.constant dense<0.000000e+00> : vector<2x128xf32>
    %435 = tpu.matmul %427, %280, %cst_191 {dimension_numbers = #tpu.dot_dimension_numbers<[1], [0], [0], [1], [0, 0, 1, 1], [], []>} : vector<2x32xf32>, vector<32x128xf32>, vector<2x128xf32> -> vector<2x128xf32>
    %436 = arith.addf %435, %434 : vector<2x128xf32>
    %437 = math.tanh %436 : vector<2x128xf32>
    %438 = arith.negf %436 : vector<2x128xf32>
    %439 = math.exp %438 : vector<2x128xf32>
    %cst_192 = arith.constant 1.000000e+00 : f32
    %440 = vector.broadcast %cst_192 : f32 to vector<2x128xf32>
    %441 = arith.addf %440, %439 : vector<2x128xf32>
    %442 = arith.divf %440, %441 : vector<2x128xf32>
    %443 = arith.select %304, %437, %442 : vector<2x128xi1>, vector<2x128xf32>
    %444 = vector.extract_strided_slice %443 {offsets = [0, 0], sizes = [2, 32], strides = [1, 1]} : vector<2x128xf32> to vector<2x32xf32>
    %445 = vector.extract_strided_slice %443 {offsets = [0, 32], sizes = [2, 32], strides = [1, 1]} : vector<2x128xf32> to vector<2x32xf32>
    %446 = vector.extract_strided_slice %443 {offsets = [0, 64], sizes = [2, 32], strides = [1, 1]} : vector<2x128xf32> to vector<2x32xf32>
    %447 = vector.extract_strided_slice %443 {offsets = [0, 96], sizes = [2, 32], strides = [1, 1]} : vector<2x128xf32> to vector<2x32xf32>
    %448 = arith.mulf %445, %425 : vector<2x32xf32>
    %449 = arith.mulf %444, %446 : vector<2x32xf32>
    %450 = arith.addf %448, %449 : vector<2x32xf32>
    %451 = math.tanh %450 : vector<2x32xf32>
    %452 = arith.mulf %447, %451 : vector<2x32xf32>
    %453 = vector.extract_strided_slice %452 {offsets = [0, 0], sizes = [2, 16], strides = [1, 1]} : vector<2x32xf32> to vector<2x16xf32>
    %c10_193 = arith.constant 10 : index
    %c0_194 = arith.constant 0 : index
    %454 = vector.load %arg21[%c10_193, %c0_194] : memref<16x32xf32, #tpu.memory_space<vmem>>, vector<2x16xf32>
    tpu.vector_store %arg21[%c10_193, %c0_194], %453 {strides = array<i32>} : memref<16x32xf32, #tpu.memory_space<vmem>>, vector<2x16xf32>,
    %455 = vector.extract_strided_slice %452 {offsets = [0, 16], sizes = [2, 16], strides = [1, 1]} : vector<2x32xf32> to vector<2x16xf32>
    %c4_195 = arith.constant 4 : index
    %c16_196 = arith.constant 16 : index
    %456 = vector.load %arg21[%c4_195, %c16_196] : memref<16x32xf32, #tpu.memory_space<vmem>>, vector<2x16xf32>
    tpu.vector_store %arg21[%c4_195, %c16_196], %455 {strides = array<i32>} : memref<16x32xf32, #tpu.memory_space<vmem>>, vector<2x16xf32>,
    %c12_197 = arith.constant 12 : index
    %c0_198 = arith.constant 0 : index
    %457 = vector.load %arg20[%c12_197, %c0_198] : memref<16x128xf32, #tpu.memory_space<vmem>>, vector<2x128xf32>
    %c2_199 = arith.constant 2 : index
    %c0_200 = arith.constant 0 : index
    %458 = vector.load %arg20[%c2_199, %c0_200] : memref<16x128xf32, #tpu.memory_space<vmem>>, vector<2x128xf32>
    %459 = arith.select %299, %457, %458 : vector<2x128xi1>, vector<2x128xf32>
    %cst_201 = arith.constant dense<0.000000e+00> : vector<2x128xf32>
    %460 = tpu.matmul %452, %280, %cst_201 {dimension_numbers = #tpu.dot_dimension_numbers<[1], [0], [0], [1], [0, 0, 1, 1], [], []>} : vector<2x32xf32>, vector<32x128xf32>, vector<2x128xf32> -> vector<2x128xf32>
    %461 = arith.addf %460, %459 : vector<2x128xf32>
    %462 = math.tanh %461 : vector<2x128xf32>
    %463 = arith.negf %461 : vector<2x128xf32>
    %464 = math.exp %463 : vector<2x128xf32>
    %cst_202 = arith.constant 1.000000e+00 : f32
    %465 = vector.broadcast %cst_202 : f32 to vector<2x128xf32>
    %466 = arith.addf %465, %464 : vector<2x128xf32>
    %467 = arith.divf %465, %466 : vector<2x128xf32>
    %468 = arith.select %304, %462, %467 : vector<2x128xi1>, vector<2x128xf32>
    %469 = vector.extract_strided_slice %468 {offsets = [0, 0], sizes = [2, 32], strides = [1, 1]} : vector<2x128xf32> to vector<2x32xf32>
    %470 = vector.extract_strided_slice %468 {offsets = [0, 32], sizes = [2, 32], strides = [1, 1]} : vector<2x128xf32> to vector<2x32xf32>
    %471 = vector.extract_strided_slice %468 {offsets = [0, 64], sizes = [2, 32], strides = [1, 1]} : vector<2x128xf32> to vector<2x32xf32>
    %472 = vector.extract_strided_slice %468 {offsets = [0, 96], sizes = [2, 32], strides = [1, 1]} : vector<2x128xf32> to vector<2x32xf32>
    %473 = arith.mulf %470, %450 : vector<2x32xf32>
    %474 = arith.mulf %469, %471 : vector<2x32xf32>
    %475 = arith.addf %473, %474 : vector<2x32xf32>
    %476 = math.tanh %475 : vector<2x32xf32>
    %477 = arith.mulf %472, %476 : vector<2x32xf32>
    %478 = vector.extract_strided_slice %477 {offsets = [0, 0], sizes = [2, 16], strides = [1, 1]} : vector<2x32xf32> to vector<2x16xf32>
    %c12_203 = arith.constant 12 : index
    %c0_204 = arith.constant 0 : index
    %479 = vector.load %arg21[%c12_203, %c0_204] : memref<16x32xf32, #tpu.memory_space<vmem>>, vector<2x16xf32>
    tpu.vector_store %arg21[%c12_203, %c0_204], %478 {strides = array<i32>} : memref<16x32xf32, #tpu.memory_space<vmem>>, vector<2x16xf32>,
    %480 = vector.extract_strided_slice %477 {offsets = [0, 16], sizes = [2, 16], strides = [1, 1]} : vector<2x32xf32> to vector<2x16xf32>
    %c2_205 = arith.constant 2 : index
    %c16_206 = arith.constant 16 : index
    %481 = vector.load %arg21[%c2_205, %c16_206] : memref<16x32xf32, #tpu.memory_space<vmem>>, vector<2x16xf32>
    tpu.vector_store %arg21[%c2_205, %c16_206], %480 {strides = array<i32>} : memref<16x32xf32, #tpu.memory_space<vmem>>, vector<2x16xf32>,
    %c14_207 = arith.constant 14 : index
    %c0_208 = arith.constant 0 : index
    %482 = vector.load %arg20[%c14_207, %c0_208] : memref<16x128xf32, #tpu.memory_space<vmem>>, vector<2x128xf32>
    %c0_209 = arith.constant 0 : index
    %c0_210 = arith.constant 0 : index
    %483 = vector.load %arg20[%c0_209, %c0_210] : memref<16x128xf32, #tpu.memory_space<vmem>>, vector<2x128xf32>
    %484 = arith.select %299, %482, %483 : vector<2x128xi1>, vector<2x128xf32>
    %cst_211 = arith.constant dense<0.000000e+00> : vector<2x128xf32>
    %485 = tpu.matmul %477, %280, %cst_211 {dimension_numbers = #tpu.dot_dimension_numbers<[1], [0], [0], [1], [0, 0, 1, 1], [], []>} : vector<2x32xf32>, vector<32x128xf32>, vector<2x128xf32> -> vector<2x128xf32>
    %486 = arith.addf %485, %484 : vector<2x128xf32>
    %487 = math.tanh %486 : vector<2x128xf32>
    %488 = arith.negf %486 : vector<2x128xf32>
    %489 = math.exp %488 : vector<2x128xf32>
    %cst_212 = arith.constant 1.000000e+00 : f32
    %490 = vector.broadcast %cst_212 : f32 to vector<2x128xf32>
    %491 = arith.addf %490, %489 : vector<2x128xf32>
    %492 = arith.divf %490, %491 : vector<2x128xf32>
    %493 = arith.select %304, %487, %492 : vector<2x128xi1>, vector<2x128xf32>
    %494 = vector.extract_strided_slice %493 {offsets = [0, 0], sizes = [2, 32], strides = [1, 1]} : vector<2x128xf32> to vector<2x32xf32>
    %495 = vector.extract_strided_slice %493 {offsets = [0, 32], sizes = [2, 32], strides = [1, 1]} : vector<2x128xf32> to vector<2x32xf32>
    %496 = vector.extract_strided_slice %493 {offsets = [0, 64], sizes = [2, 32], strides = [1, 1]} : vector<2x128xf32> to vector<2x32xf32>
    %497 = vector.extract_strided_slice %493 {offsets = [0, 96], sizes = [2, 32], strides = [1, 1]} : vector<2x128xf32> to vector<2x32xf32>
    %498 = arith.mulf %495, %475 : vector<2x32xf32>
    %499 = arith.mulf %494, %496 : vector<2x32xf32>
    %500 = arith.addf %498, %499 : vector<2x32xf32>
    %501 = math.tanh %500 : vector<2x32xf32>
    %502 = arith.mulf %497, %501 : vector<2x32xf32>
    %503 = vector.extract_strided_slice %502 {offsets = [0, 0], sizes = [2, 16], strides = [1, 1]} : vector<2x32xf32> to vector<2x16xf32>
    %c14_213 = arith.constant 14 : index
    %c0_214 = arith.constant 0 : index
    %504 = vector.load %arg21[%c14_213, %c0_214] : memref<16x32xf32, #tpu.memory_space<vmem>>, vector<2x16xf32>
    tpu.vector_store %arg21[%c14_213, %c0_214], %503 {strides = array<i32>} : memref<16x32xf32, #tpu.memory_space<vmem>>, vector<2x16xf32>,
    %505 = vector.extract_strided_slice %502 {offsets = [0, 16], sizes = [2, 16], strides = [1, 1]} : vector<2x32xf32> to vector<2x16xf32>
    %c0_215 = arith.constant 0 : index
    %c16_216 = arith.constant 16 : index
    %506 = vector.load %arg21[%c0_215, %c16_216] : memref<16x32xf32, #tpu.memory_space<vmem>>, vector<2x16xf32>
    tpu.vector_store %arg21[%c0_215, %c16_216], %505 {strides = array<i32>} : memref<16x32xf32, #tpu.memory_space<vmem>>, vector<2x16xf32>,
    %c0_217 = arith.constant 0 : index
    %c0_218 = arith.constant 0 : index
    %507 = vector.load %arg21[%c0_217, %c0_218] : memref<16x32xf32, #tpu.memory_space<vmem>>, vector<16x32xf32>
    %c0_219 = arith.constant 0 : index
    %c0_220 = arith.constant 0 : index
    %508 = vector.load %arg8[%c0_219, %c0_220] : memref<32x16xf32, #tpu.memory_space<vmem>>, vector<32x16xf32>
    %cst_221 = arith.constant dense<0.000000e+00> : vector<16x16xf32>
    %509 = tpu.matmul %507, %508, %cst_221 {dimension_numbers = #tpu.dot_dimension_numbers<[1], [0], [0], [1], [0, 0, 1, 1], [], []>} : vector<16x32xf32>, vector<32x16xf32>, vector<16x16xf32> -> vector<16x16xf32>
    %c0_222 = arith.constant 0 : index
    %c0_223 = arith.constant 0 : index
    %510 = vector.load %arg9[%c0_222, %c0_223] : memref<1x16xf32, #tpu.memory_space<vmem>>, vector<1x16xf32>
    %511 = vector.broadcast %510 : vector<1x16xf32> to vector<16x16xf32>
    %512 = arith.addf %509, %511 : vector<16x16xf32>
    %cst_224 = arith.constant 0.000000e+00 : f32
    %513 = vector.broadcast %cst_224 : f32 to vector<16x16xf32>
    %514 = arith.maximumf %512, %513 : vector<16x16xf32>
    %c0_225 = arith.constant 0 : index
    %c0_226 = arith.constant 0 : index
    %515 = vector.load %arg10[%c0_225, %c0_226] : memref<16x128xf32, #tpu.memory_space<vmem>>, vector<16x128xf32>
    %cst_227 = arith.constant dense<0.000000e+00> : vector<16x128xf32>
    %516 = tpu.matmul %514, %515, %cst_227 {dimension_numbers = #tpu.dot_dimension_numbers<[1], [0], [0], [1], [0, 0, 1, 1], [], []>} : vector<16x16xf32>, vector<16x128xf32>, vector<16x128xf32> -> vector<16x128xf32>
    %c0_228 = arith.constant 0 : index
    %c0_229 = arith.constant 0 : index
    %517 = vector.load %arg12[%c0_228, %c0_229] : memref<1x128xf32, #tpu.memory_space<vmem>>, vector<1x128xf32>
    %518 = vector.broadcast %517 : vector<1x128xf32> to vector<16x128xf32>
    %519 = arith.addf %516, %518 : vector<16x128xf32>
    %c0_230 = arith.constant 0 : index
    %c0_231 = arith.constant 0 : index
    %520 = vector.load %arg22[%c0_230, %c0_231] : memref<16x128xf32, #tpu.memory_space<vmem>>, vector<16x128xf32>
    tpu.vector_store %arg22[%c0_230, %c0_231], %519 {strides = array<i32>} : memref<16x128xf32, #tpu.memory_space<vmem>>, vector<16x128xf32>,
    %c0_232 = arith.constant 0 : index
    %c0_233 = arith.constant 0 : index
    %521 = vector.load %arg11[%c0_232, %c0_233] : memref<32x128xf32, #tpu.memory_space<vmem>>, vector<32x128xf32>
    %522 = tpu.iota {dimensions = array<i32: 1>} : vector<2x128xi32>
    %c32_i32_234 = arith.constant 32 : i32
    %c0_i32_235 = arith.constant 0 : i32
    %523 = arith.cmpi eq, %c32_i32_234, %c0_i32_235 : i32
    %c1_i32_236 = arith.constant 1 : i32
    %524 = arith.select %523, %c1_i32_236, %c32_i32_234 : i32
    %525 = vector.broadcast %524 : i32 to vector<2x128xi32>
    %526 = arith.remsi %522, %525 : vector<2x128xi32>
    %c0_i32_237 = arith.constant 0 : i32
    %527 = vector.broadcast %c0_i32_237 : i32 to vector<2x128xi32>
    %528 = arith.cmpi ne, %526, %527 : vector<2x128xi32>
    %c0_i32_238 = arith.constant 0 : i32
    %529 = vector.broadcast %c0_i32_238 : i32 to vector<2x128xi32>
    %530 = arith.cmpi slt, %526, %529 : vector<2x128xi32>
    %c0_i32_239 = arith.constant 0 : i32
    %531 = arith.cmpi slt, %524, %c0_i32_239 : i32
    %532 = vector.broadcast %531 : i1 to vector<2x128xi1>
    %533 = vector.broadcast %532 : vector<2x128xi1> to vector<2x128xi1>
    %534 = arith.xori %530, %533 : vector<2x128xi1>
    %535 = arith.andi %534, %528 : vector<2x128xi1>
    %536 = vector.broadcast %524 : i32 to vector<2x128xi32>
    %537 = arith.addi %526, %536 : vector<2x128xi32>
    %538 = arith.select %535, %537, %526 : vector<2x128xi1>, vector<2x128xi32>
    %c16_i32_240 = arith.constant 16 : i32
    %539 = vector.broadcast %c16_i32_240 : i32 to vector<2x128xi32>
    %540 = arith.cmpi slt, %538, %539 : vector<2x128xi32>
    %c64_i32_241 = arith.constant 64 : i32
    %541 = vector.broadcast %c64_i32_241 : i32 to vector<2x128xi32>
    %542 = arith.cmpi sge, %522, %541 : vector<2x128xi32>
    %c96_i32_242 = arith.constant 96 : i32
    %543 = vector.broadcast %c96_i32_242 : i32 to vector<2x128xi32>
    %544 = arith.cmpi slt, %522, %543 : vector<2x128xi32>
    %545 = arith.andi %542, %544 : vector<2x128xi1>
    %cst_243 = arith.constant 0.000000e+00 : f32
    %546 = vector.broadcast %cst_243 : f32 to vector<2x32xf32>
    %cst_244 = arith.constant 0.000000e+00 : f32
    %547 = vector.broadcast %cst_244 : f32 to vector<2x32xf32>
    %c0_245 = arith.constant 0 : index
    %c0_246 = arith.constant 0 : index
    %548 = vector.load %arg22[%c0_245, %c0_246] : memref<16x128xf32, #tpu.memory_space<vmem>>, vector<2x128xf32>
    %c14_247 = arith.constant 14 : index
    %c0_248 = arith.constant 0 : index
    %549 = vector.load %arg22[%c14_247, %c0_248] : memref<16x128xf32, #tpu.memory_space<vmem>>, vector<2x128xf32>
    %550 = arith.select %540, %548, %549 : vector<2x128xi1>, vector<2x128xf32>
    %cst_249 = arith.constant dense<0.000000e+00> : vector<2x128xf32>
    %551 = tpu.matmul %546, %521, %cst_249 {dimension_numbers = #tpu.dot_dimension_numbers<[1], [0], [0], [1], [0, 0, 1, 1], [], []>} : vector<2x32xf32>, vector<32x128xf32>, vector<2x128xf32> -> vector<2x128xf32>
    %552 = arith.addf %551, %550 : vector<2x128xf32>
    %553 = math.tanh %552 : vector<2x128xf32>
    %554 = arith.negf %552 : vector<2x128xf32>
    %555 = math.exp %554 : vector<2x128xf32>
    %cst_250 = arith.constant 1.000000e+00 : f32
    %556 = vector.broadcast %cst_250 : f32 to vector<2x128xf32>
    %557 = arith.addf %556, %555 : vector<2x128xf32>
    %558 = arith.divf %556, %557 : vector<2x128xf32>
    %559 = arith.select %545, %553, %558 : vector<2x128xi1>, vector<2x128xf32>
    %560 = vector.extract_strided_slice %559 {offsets = [0, 0], sizes = [2, 32], strides = [1, 1]} : vector<2x128xf32> to vector<2x32xf32>
    %561 = vector.extract_strided_slice %559 {offsets = [0, 32], sizes = [2, 32], strides = [1, 1]} : vector<2x128xf32> to vector<2x32xf32>
    %562 = vector.extract_strided_slice %559 {offsets = [0, 64], sizes = [2, 32], strides = [1, 1]} : vector<2x128xf32> to vector<2x32xf32>
    %563 = vector.extract_strided_slice %559 {offsets = [0, 96], sizes = [2, 32], strides = [1, 1]} : vector<2x128xf32> to vector<2x32xf32>
    %564 = arith.mulf %561, %547 : vector<2x32xf32>
    %565 = arith.mulf %560, %562 : vector<2x32xf32>
    %566 = arith.addf %564, %565 : vector<2x32xf32>
    %567 = math.tanh %566 : vector<2x32xf32>
    %568 = arith.mulf %563, %567 : vector<2x32xf32>
    %569 = vector.extract_strided_slice %568 {offsets = [0, 0], sizes = [2, 16], strides = [1, 1]} : vector<2x32xf32> to vector<2x16xf32>
    %c0_251 = arith.constant 0 : index
    %c0_252 = arith.constant 0 : index
    %570 = vector.load %arg23[%c0_251, %c0_252] : memref<16x32xf32, #tpu.memory_space<vmem>>, vector<2x16xf32>
    tpu.vector_store %arg23[%c0_251, %c0_252], %569 {strides = array<i32>} : memref<16x32xf32, #tpu.memory_space<vmem>>, vector<2x16xf32>,
    %571 = vector.extract_strided_slice %568 {offsets = [0, 16], sizes = [2, 16], strides = [1, 1]} : vector<2x32xf32> to vector<2x16xf32>
    %c14_253 = arith.constant 14 : index
    %c16_254 = arith.constant 16 : index
    %572 = vector.load %arg23[%c14_253, %c16_254] : memref<16x32xf32, #tpu.memory_space<vmem>>, vector<2x16xf32>
    tpu.vector_store %arg23[%c14_253, %c16_254], %571 {strides = array<i32>} : memref<16x32xf32, #tpu.memory_space<vmem>>, vector<2x16xf32>,
    %c2_255 = arith.constant 2 : index
    %c0_256 = arith.constant 0 : index
    %573 = vector.load %arg22[%c2_255, %c0_256] : memref<16x128xf32, #tpu.memory_space<vmem>>, vector<2x128xf32>
    %c12_257 = arith.constant 12 : index
    %c0_258 = arith.constant 0 : index
    %574 = vector.load %arg22[%c12_257, %c0_258] : memref<16x128xf32, #tpu.memory_space<vmem>>, vector<2x128xf32>
    %575 = arith.select %540, %573, %574 : vector<2x128xi1>, vector<2x128xf32>
    %cst_259 = arith.constant dense<0.000000e+00> : vector<2x128xf32>
    %576 = tpu.matmul %568, %521, %cst_259 {dimension_numbers = #tpu.dot_dimension_numbers<[1], [0], [0], [1], [0, 0, 1, 1], [], []>} : vector<2x32xf32>, vector<32x128xf32>, vector<2x128xf32> -> vector<2x128xf32>
    %577 = arith.addf %576, %575 : vector<2x128xf32>
    %578 = math.tanh %577 : vector<2x128xf32>
    %579 = arith.negf %577 : vector<2x128xf32>
    %580 = math.exp %579 : vector<2x128xf32>
    %cst_260 = arith.constant 1.000000e+00 : f32
    %581 = vector.broadcast %cst_260 : f32 to vector<2x128xf32>
    %582 = arith.addf %581, %580 : vector<2x128xf32>
    %583 = arith.divf %581, %582 : vector<2x128xf32>
    %584 = arith.select %545, %578, %583 : vector<2x128xi1>, vector<2x128xf32>
    %585 = vector.extract_strided_slice %584 {offsets = [0, 0], sizes = [2, 32], strides = [1, 1]} : vector<2x128xf32> to vector<2x32xf32>
    %586 = vector.extract_strided_slice %584 {offsets = [0, 32], sizes = [2, 32], strides = [1, 1]} : vector<2x128xf32> to vector<2x32xf32>
    %587 = vector.extract_strided_slice %584 {offsets = [0, 64], sizes = [2, 32], strides = [1, 1]} : vector<2x128xf32> to vector<2x32xf32>
    %588 = vector.extract_strided_slice %584 {offsets = [0, 96], sizes = [2, 32], strides = [1, 1]} : vector<2x128xf32> to vector<2x32xf32>
    %589 = arith.mulf %586, %566 : vector<2x32xf32>
    %590 = arith.mulf %585, %587 : vector<2x32xf32>
    %591 = arith.addf %589, %590 : vector<2x32xf32>
    %592 = math.tanh %591 : vector<2x32xf32>
    %593 = arith.mulf %588, %592 : vector<2x32xf32>
    %594 = vector.extract_strided_slice %593 {offsets = [0, 0], sizes = [2, 16], strides = [1, 1]} : vector<2x32xf32> to vector<2x16xf32>
    %c2_261 = arith.constant 2 : index
    %c0_262 = arith.constant 0 : index
    %595 = vector.load %arg23[%c2_261, %c0_262] : memref<16x32xf32, #tpu.memory_space<vmem>>, vector<2x16xf32>
    tpu.vector_store %arg23[%c2_261, %c0_262], %594 {strides = array<i32>} : memref<16x32xf32, #tpu.memory_space<vmem>>, vector<2x16xf32>,
    %596 = vector.extract_strided_slice %593 {offsets = [0, 16], sizes = [2, 16], strides = [1, 1]} : vector<2x32xf32> to vector<2x16xf32>
    %c12_263 = arith.constant 12 : index
    %c16_264 = arith.constant 16 : index
    %597 = vector.load %arg23[%c12_263, %c16_264] : memref<16x32xf32, #tpu.memory_space<vmem>>, vector<2x16xf32>
    tpu.vector_store %arg23[%c12_263, %c16_264], %596 {strides = array<i32>} : memref<16x32xf32, #tpu.memory_space<vmem>>, vector<2x16xf32>,
    %c4_265 = arith.constant 4 : index
    %c0_266 = arith.constant 0 : index
    %598 = vector.load %arg22[%c4_265, %c0_266] : memref<16x128xf32, #tpu.memory_space<vmem>>, vector<2x128xf32>
    %c10_267 = arith.constant 10 : index
    %c0_268 = arith.constant 0 : index
    %599 = vector.load %arg22[%c10_267, %c0_268] : memref<16x128xf32, #tpu.memory_space<vmem>>, vector<2x128xf32>
    %600 = arith.select %540, %598, %599 : vector<2x128xi1>, vector<2x128xf32>
    %cst_269 = arith.constant dense<0.000000e+00> : vector<2x128xf32>
    %601 = tpu.matmul %593, %521, %cst_269 {dimension_numbers = #tpu.dot_dimension_numbers<[1], [0], [0], [1], [0, 0, 1, 1], [], []>} : vector<2x32xf32>, vector<32x128xf32>, vector<2x128xf32> -> vector<2x128xf32>
    %602 = arith.addf %601, %600 : vector<2x128xf32>
    %603 = math.tanh %602 : vector<2x128xf32>
    %604 = arith.negf %602 : vector<2x128xf32>
    %605 = math.exp %604 : vector<2x128xf32>
    %cst_270 = arith.constant 1.000000e+00 : f32
    %606 = vector.broadcast %cst_270 : f32 to vector<2x128xf32>
    %607 = arith.addf %606, %605 : vector<2x128xf32>
    %608 = arith.divf %606, %607 : vector<2x128xf32>
    %609 = arith.select %545, %603, %608 : vector<2x128xi1>, vector<2x128xf32>
    %610 = vector.extract_strided_slice %609 {offsets = [0, 0], sizes = [2, 32], strides = [1, 1]} : vector<2x128xf32> to vector<2x32xf32>
    %611 = vector.extract_strided_slice %609 {offsets = [0, 32], sizes = [2, 32], strides = [1, 1]} : vector<2x128xf32> to vector<2x32xf32>
    %612 = vector.extract_strided_slice %609 {offsets = [0, 64], sizes = [2, 32], strides = [1, 1]} : vector<2x128xf32> to vector<2x32xf32>
    %613 = vector.extract_strided_slice %609 {offsets = [0, 96], sizes = [2, 32], strides = [1, 1]} : vector<2x128xf32> to vector<2x32xf32>
    %614 = arith.mulf %611, %591 : vector<2x32xf32>
    %615 = arith.mulf %610, %612 : vector<2x32xf32>
    %616 = arith.addf %614, %615 : vector<2x32xf32>
    %617 = math.tanh %616 : vector<2x32xf32>
    %618 = arith.mulf %613, %617 : vector<2x32xf32>
    %619 = vector.extract_strided_slice %618 {offsets = [0, 0], sizes = [2, 16], strides = [1, 1]} : vector<2x32xf32> to vector<2x16xf32>
    %c4_271 = arith.constant 4 : index
    %c0_272 = arith.constant 0 : index
    %620 = vector.load %arg23[%c4_271, %c0_272] : memref<16x32xf32, #tpu.memory_space<vmem>>, vector<2x16xf32>
    tpu.vector_store %arg23[%c4_271, %c0_272], %619 {strides = array<i32>} : memref<16x32xf32, #tpu.memory_space<vmem>>, vector<2x16xf32>,
    %621 = vector.extract_strided_slice %618 {offsets = [0, 16], sizes = [2, 16], strides = [1, 1]} : vector<2x32xf32> to vector<2x16xf32>
    %c10_273 = arith.constant 10 : index
    %c16_274 = arith.constant 16 : index
    %622 = vector.load %arg23[%c10_273, %c16_274] : memref<16x32xf32, #tpu.memory_space<vmem>>, vector<2x16xf32>
    tpu.vector_store %arg23[%c10_273, %c16_274], %621 {strides = array<i32>} : memref<16x32xf32, #tpu.memory_space<vmem>>, vector<2x16xf32>,
    %c6_275 = arith.constant 6 : index
    %c0_276 = arith.constant 0 : index
    %623 = vector.load %arg22[%c6_275, %c0_276] : memref<16x128xf32, #tpu.memory_space<vmem>>, vector<2x128xf32>
    %c8_277 = arith.constant 8 : index
    %c0_278 = arith.constant 0 : index
    %624 = vector.load %arg22[%c8_277, %c0_278] : memref<16x128xf32, #tpu.memory_space<vmem>>, vector<2x128xf32>
    %625 = arith.select %540, %623, %624 : vector<2x128xi1>, vector<2x128xf32>
    %cst_279 = arith.constant dense<0.000000e+00> : vector<2x128xf32>
    %626 = tpu.matmul %618, %521, %cst_279 {dimension_numbers = #tpu.dot_dimension_numbers<[1], [0], [0], [1], [0, 0, 1, 1], [], []>} : vector<2x32xf32>, vector<32x128xf32>, vector<2x128xf32> -> vector<2x128xf32>
    %627 = arith.addf %626, %625 : vector<2x128xf32>
    %628 = math.tanh %627 : vector<2x128xf32>
    %629 = arith.negf %627 : vector<2x128xf32>
    %630 = math.exp %629 : vector<2x128xf32>
    %cst_280 = arith.constant 1.000000e+00 : f32
    %631 = vector.broadcast %cst_280 : f32 to vector<2x128xf32>
    %632 = arith.addf %631, %630 : vector<2x128xf32>
    %633 = arith.divf %631, %632 : vector<2x128xf32>
    %634 = arith.select %545, %628, %633 : vector<2x128xi1>, vector<2x128xf32>
    %635 = vector.extract_strided_slice %634 {offsets = [0, 0], sizes = [2, 32], strides = [1, 1]} : vector<2x128xf32> to vector<2x32xf32>
    %636 = vector.extract_strided_slice %634 {offsets = [0, 32], sizes = [2, 32], strides = [1, 1]} : vector<2x128xf32> to vector<2x32xf32>
    %637 = vector.extract_strided_slice %634 {offsets = [0, 64], sizes = [2, 32], strides = [1, 1]} : vector<2x128xf32> to vector<2x32xf32>
    %638 = vector.extract_strided_slice %634 {offsets = [0, 96], sizes = [2, 32], strides = [1, 1]} : vector<2x128xf32> to vector<2x32xf32>
    %639 = arith.mulf %636, %616 : vector<2x32xf32>
    %640 = arith.mulf %635, %637 : vector<2x32xf32>
    %641 = arith.addf %639, %640 : vector<2x32xf32>
    %642 = math.tanh %641 : vector<2x32xf32>
    %643 = arith.mulf %638, %642 : vector<2x32xf32>
    %644 = vector.extract_strided_slice %643 {offsets = [0, 0], sizes = [2, 16], strides = [1, 1]} : vector<2x32xf32> to vector<2x16xf32>
    %c6_281 = arith.constant 6 : index
    %c0_282 = arith.constant 0 : index
    %645 = vector.load %arg23[%c6_281, %c0_282] : memref<16x32xf32, #tpu.memory_space<vmem>>, vector<2x16xf32>
    tpu.vector_store %arg23[%c6_281, %c0_282], %644 {strides = array<i32>} : memref<16x32xf32, #tpu.memory_space<vmem>>, vector<2x16xf32>,
    %646 = vector.extract_strided_slice %643 {offsets = [0, 16], sizes = [2, 16], strides = [1, 1]} : vector<2x32xf32> to vector<2x16xf32>
    %c8_283 = arith.constant 8 : index
    %c16_284 = arith.constant 16 : index
    %647 = vector.load %arg23[%c8_283, %c16_284] : memref<16x32xf32, #tpu.memory_space<vmem>>, vector<2x16xf32>
    tpu.vector_store %arg23[%c8_283, %c16_284], %646 {strides = array<i32>} : memref<16x32xf32, #tpu.memory_space<vmem>>, vector<2x16xf32>,
    %c8_285 = arith.constant 8 : index
    %c0_286 = arith.constant 0 : index
    %648 = vector.load %arg22[%c8_285, %c0_286] : memref<16x128xf32, #tpu.memory_space<vmem>>, vector<2x128xf32>
    %c6_287 = arith.constant 6 : index
    %c0_288 = arith.constant 0 : index
    %649 = vector.load %arg22[%c6_287, %c0_288] : memref<16x128xf32, #tpu.memory_space<vmem>>, vector<2x128xf32>
    %650 = arith.select %540, %648, %649 : vector<2x128xi1>, vector<2x128xf32>
    %cst_289 = arith.constant dense<0.000000e+00> : vector<2x128xf32>
    %651 = tpu.matmul %643, %521, %cst_289 {dimension_numbers = #tpu.dot_dimension_numbers<[1], [0], [0], [1], [0, 0, 1, 1], [], []>} : vector<2x32xf32>, vector<32x128xf32>, vector<2x128xf32> -> vector<2x128xf32>
    %652 = arith.addf %651, %650 : vector<2x128xf32>
    %653 = math.tanh %652 : vector<2x128xf32>
    %654 = arith.negf %652 : vector<2x128xf32>
    %655 = math.exp %654 : vector<2x128xf32>
    %cst_290 = arith.constant 1.000000e+00 : f32
    %656 = vector.broadcast %cst_290 : f32 to vector<2x128xf32>
    %657 = arith.addf %656, %655 : vector<2x128xf32>
    %658 = arith.divf %656, %657 : vector<2x128xf32>
    %659 = arith.select %545, %653, %658 : vector<2x128xi1>, vector<2x128xf32>
    %660 = vector.extract_strided_slice %659 {offsets = [0, 0], sizes = [2, 32], strides = [1, 1]} : vector<2x128xf32> to vector<2x32xf32>
    %661 = vector.extract_strided_slice %659 {offsets = [0, 32], sizes = [2, 32], strides = [1, 1]} : vector<2x128xf32> to vector<2x32xf32>
    %662 = vector.extract_strided_slice %659 {offsets = [0, 64], sizes = [2, 32], strides = [1, 1]} : vector<2x128xf32> to vector<2x32xf32>
    %663 = vector.extract_strided_slice %659 {offsets = [0, 96], sizes = [2, 32], strides = [1, 1]} : vector<2x128xf32> to vector<2x32xf32>
    %664 = arith.mulf %661, %641 : vector<2x32xf32>
    %665 = arith.mulf %660, %662 : vector<2x32xf32>
    %666 = arith.addf %664, %665 : vector<2x32xf32>
    %667 = math.tanh %666 : vector<2x32xf32>
    %668 = arith.mulf %663, %667 : vector<2x32xf32>
    %669 = vector.extract_strided_slice %668 {offsets = [0, 0], sizes = [2, 16], strides = [1, 1]} : vector<2x32xf32> to vector<2x16xf32>
    %c8_291 = arith.constant 8 : index
    %c0_292 = arith.constant 0 : index
    %670 = vector.load %arg23[%c8_291, %c0_292] : memref<16x32xf32, #tpu.memory_space<vmem>>, vector<2x16xf32>
    tpu.vector_store %arg23[%c8_291, %c0_292], %669 {strides = array<i32>} : memref<16x32xf32, #tpu.memory_space<vmem>>, vector<2x16xf32>,
    %671 = vector.extract_strided_slice %668 {offsets = [0, 16], sizes = [2, 16], strides = [1, 1]} : vector<2x32xf32> to vector<2x16xf32>
    %c6_293 = arith.constant 6 : index
    %c16_294 = arith.constant 16 : index
    %672 = vector.load %arg23[%c6_293, %c16_294] : memref<16x32xf32, #tpu.memory_space<vmem>>, vector<2x16xf32>
    tpu.vector_store %arg23[%c6_293, %c16_294], %671 {strides = array<i32>} : memref<16x32xf32, #tpu.memory_space<vmem>>, vector<2x16xf32>,
    %c10_295 = arith.constant 10 : index
    %c0_296 = arith.constant 0 : index
    %673 = vector.load %arg22[%c10_295, %c0_296] : memref<16x128xf32, #tpu.memory_space<vmem>>, vector<2x128xf32>
    %c4_297 = arith.constant 4 : index
    %c0_298 = arith.constant 0 : index
    %674 = vector.load %arg22[%c4_297, %c0_298] : memref<16x128xf32, #tpu.memory_space<vmem>>, vector<2x128xf32>
    %675 = arith.select %540, %673, %674 : vector<2x128xi1>, vector<2x128xf32>
    %cst_299 = arith.constant dense<0.000000e+00> : vector<2x128xf32>
    %676 = tpu.matmul %668, %521, %cst_299 {dimension_numbers = #tpu.dot_dimension_numbers<[1], [0], [0], [1], [0, 0, 1, 1], [], []>} : vector<2x32xf32>, vector<32x128xf32>, vector<2x128xf32> -> vector<2x128xf32>
    %677 = arith.addf %676, %675 : vector<2x128xf32>
    %678 = math.tanh %677 : vector<2x128xf32>
    %679 = arith.negf %677 : vector<2x128xf32>
    %680 = math.exp %679 : vector<2x128xf32>
    %cst_300 = arith.constant 1.000000e+00 : f32
    %681 = vector.broadcast %cst_300 : f32 to vector<2x128xf32>
    %682 = arith.addf %681, %680 : vector<2x128xf32>
    %683 = arith.divf %681, %682 : vector<2x128xf32>
    %684 = arith.select %545, %678, %683 : vector<2x128xi1>, vector<2x128xf32>
    %685 = vector.extract_strided_slice %684 {offsets = [0, 0], sizes = [2, 32], strides = [1, 1]} : vector<2x128xf32> to vector<2x32xf32>
    %686 = vector.extract_strided_slice %684 {offsets = [0, 32], sizes = [2, 32], strides = [1, 1]} : vector<2x128xf32> to vector<2x32xf32>
    %687 = vector.extract_strided_slice %684 {offsets = [0, 64], sizes = [2, 32], strides = [1, 1]} : vector<2x128xf32> to vector<2x32xf32>
    %688 = vector.extract_strided_slice %684 {offsets = [0, 96], sizes = [2, 32], strides = [1, 1]} : vector<2x128xf32> to vector<2x32xf32>
    %689 = arith.mulf %686, %666 : vector<2x32xf32>
    %690 = arith.mulf %685, %687 : vector<2x32xf32>
    %691 = arith.addf %689, %690 : vector<2x32xf32>
    %692 = math.tanh %691 : vector<2x32xf32>
    %693 = arith.mulf %688, %692 : vector<2x32xf32>
    %694 = vector.extract_strided_slice %693 {offsets = [0, 0], sizes = [2, 16], strides = [1, 1]} : vector<2x32xf32> to vector<2x16xf32>
    %c10_301 = arith.constant 10 : index
    %c0_302 = arith.constant 0 : index
    %695 = vector.load %arg23[%c10_301, %c0_302] : memref<16x32xf32, #tpu.memory_space<vmem>>, vector<2x16xf32>
    tpu.vector_store %arg23[%c10_301, %c0_302], %694 {strides = array<i32>} : memref<16x32xf32, #tpu.memory_space<vmem>>, vector<2x16xf32>,
    %696 = vector.extract_strided_slice %693 {offsets = [0, 16], sizes = [2, 16], strides = [1, 1]} : vector<2x32xf32> to vector<2x16xf32>
    %c4_303 = arith.constant 4 : index
    %c16_304 = arith.constant 16 : index
    %697 = vector.load %arg23[%c4_303, %c16_304] : memref<16x32xf32, #tpu.memory_space<vmem>>, vector<2x16xf32>
    tpu.vector_store %arg23[%c4_303, %c16_304], %696 {strides = array<i32>} : memref<16x32xf32, #tpu.memory_space<vmem>>, vector<2x16xf32>,
    %c12_305 = arith.constant 12 : index
    %c0_306 = arith.constant 0 : index
    %698 = vector.load %arg22[%c12_305, %c0_306] : memref<16x128xf32, #tpu.memory_space<vmem>>, vector<2x128xf32>
    %c2_307 = arith.constant 2 : index
    %c0_308 = arith.constant 0 : index
    %699 = vector.load %arg22[%c2_307, %c0_308] : memref<16x128xf32, #tpu.memory_space<vmem>>, vector<2x128xf32>
    %700 = arith.select %540, %698, %699 : vector<2x128xi1>, vector<2x128xf32>
    %cst_309 = arith.constant dense<0.000000e+00> : vector<2x128xf32>
    %701 = tpu.matmul %693, %521, %cst_309 {dimension_numbers = #tpu.dot_dimension_numbers<[1], [0], [0], [1], [0, 0, 1, 1], [], []>} : vector<2x32xf32>, vector<32x128xf32>, vector<2x128xf32> -> vector<2x128xf32>
    %702 = arith.addf %701, %700 : vector<2x128xf32>
    %703 = math.tanh %702 : vector<2x128xf32>
    %704 = arith.negf %702 : vector<2x128xf32>
    %705 = math.exp %704 : vector<2x128xf32>
    %cst_310 = arith.constant 1.000000e+00 : f32
    %706 = vector.broadcast %cst_310 : f32 to vector<2x128xf32>
    %707 = arith.addf %706, %705 : vector<2x128xf32>
    %708 = arith.divf %706, %707 : vector<2x128xf32>
    %709 = arith.select %545, %703, %708 : vector<2x128xi1>, vector<2x128xf32>
    %710 = vector.extract_strided_slice %709 {offsets = [0, 0], sizes = [2, 32], strides = [1, 1]} : vector<2x128xf32> to vector<2x32xf32>
    %711 = vector.extract_strided_slice %709 {offsets = [0, 32], sizes = [2, 32], strides = [1, 1]} : vector<2x128xf32> to vector<2x32xf32>
    %712 = vector.extract_strided_slice %709 {offsets = [0, 64], sizes = [2, 32], strides = [1, 1]} : vector<2x128xf32> to vector<2x32xf32>
    %713 = vector.extract_strided_slice %709 {offsets = [0, 96], sizes = [2, 32], strides = [1, 1]} : vector<2x128xf32> to vector<2x32xf32>
    %714 = arith.mulf %711, %691 : vector<2x32xf32>
    %715 = arith.mulf %710, %712 : vector<2x32xf32>
    %716 = arith.addf %714, %715 : vector<2x32xf32>
    %717 = math.tanh %716 : vector<2x32xf32>
    %718 = arith.mulf %713, %717 : vector<2x32xf32>
    %719 = vector.extract_strided_slice %718 {offsets = [0, 0], sizes = [2, 16], strides = [1, 1]} : vector<2x32xf32> to vector<2x16xf32>
    %c12_311 = arith.constant 12 : index
    %c0_312 = arith.constant 0 : index
    %720 = vector.load %arg23[%c12_311, %c0_312] : memref<16x32xf32, #tpu.memory_space<vmem>>, vector<2x16xf32>
    tpu.vector_store %arg23[%c12_311, %c0_312], %719 {strides = array<i32>} : memref<16x32xf32, #tpu.memory_space<vmem>>, vector<2x16xf32>,
    %721 = vector.extract_strided_slice %718 {offsets = [0, 16], sizes = [2, 16], strides = [1, 1]} : vector<2x32xf32> to vector<2x16xf32>
    %c2_313 = arith.constant 2 : index
    %c16_314 = arith.constant 16 : index
    %722 = vector.load %arg23[%c2_313, %c16_314] : memref<16x32xf32, #tpu.memory_space<vmem>>, vector<2x16xf32>
    tpu.vector_store %arg23[%c2_313, %c16_314], %721 {strides = array<i32>} : memref<16x32xf32, #tpu.memory_space<vmem>>, vector<2x16xf32>,
    %c14_315 = arith.constant 14 : index
    %c0_316 = arith.constant 0 : index
    %723 = vector.load %arg22[%c14_315, %c0_316] : memref<16x128xf32, #tpu.memory_space<vmem>>, vector<2x128xf32>
    %c0_317 = arith.constant 0 : index
    %c0_318 = arith.constant 0 : index
    %724 = vector.load %arg22[%c0_317, %c0_318] : memref<16x128xf32, #tpu.memory_space<vmem>>, vector<2x128xf32>
    %725 = arith.select %540, %723, %724 : vector<2x128xi1>, vector<2x128xf32>
    %cst_319 = arith.constant dense<0.000000e+00> : vector<2x128xf32>
    %726 = tpu.matmul %718, %521, %cst_319 {dimension_numbers = #tpu.dot_dimension_numbers<[1], [0], [0], [1], [0, 0, 1, 1], [], []>} : vector<2x32xf32>, vector<32x128xf32>, vector<2x128xf32> -> vector<2x128xf32>
    %727 = arith.addf %726, %725 : vector<2x128xf32>
    %728 = math.tanh %727 : vector<2x128xf32>
    %729 = arith.negf %727 : vector<2x128xf32>
    %730 = math.exp %729 : vector<2x128xf32>
    %cst_320 = arith.constant 1.000000e+00 : f32
    %731 = vector.broadcast %cst_320 : f32 to vector<2x128xf32>
    %732 = arith.addf %731, %730 : vector<2x128xf32>
    %733 = arith.divf %731, %732 : vector<2x128xf32>
    %734 = arith.select %545, %728, %733 : vector<2x128xi1>, vector<2x128xf32>
    %735 = vector.extract_strided_slice %734 {offsets = [0, 0], sizes = [2, 32], strides = [1, 1]} : vector<2x128xf32> to vector<2x32xf32>
    %736 = vector.extract_strided_slice %734 {offsets = [0, 32], sizes = [2, 32], strides = [1, 1]} : vector<2x128xf32> to vector<2x32xf32>
    %737 = vector.extract_strided_slice %734 {offsets = [0, 64], sizes = [2, 32], strides = [1, 1]} : vector<2x128xf32> to vector<2x32xf32>
    %738 = vector.extract_strided_slice %734 {offsets = [0, 96], sizes = [2, 32], strides = [1, 1]} : vector<2x128xf32> to vector<2x32xf32>
    %739 = arith.mulf %736, %716 : vector<2x32xf32>
    %740 = arith.mulf %735, %737 : vector<2x32xf32>
    %741 = arith.addf %739, %740 : vector<2x32xf32>
    %742 = math.tanh %741 : vector<2x32xf32>
    %743 = arith.mulf %738, %742 : vector<2x32xf32>
    %744 = vector.extract_strided_slice %743 {offsets = [0, 0], sizes = [2, 16], strides = [1, 1]} : vector<2x32xf32> to vector<2x16xf32>
    %c14_321 = arith.constant 14 : index
    %c0_322 = arith.constant 0 : index
    %745 = vector.load %arg23[%c14_321, %c0_322] : memref<16x32xf32, #tpu.memory_space<vmem>>, vector<2x16xf32>
    tpu.vector_store %arg23[%c14_321, %c0_322], %744 {strides = array<i32>} : memref<16x32xf32, #tpu.memory_space<vmem>>, vector<2x16xf32>,
    %746 = vector.extract_strided_slice %743 {offsets = [0, 16], sizes = [2, 16], strides = [1, 1]} : vector<2x32xf32> to vector<2x16xf32>
    %c0_323 = arith.constant 0 : index
    %c16_324 = arith.constant 16 : index
    %747 = vector.load %arg23[%c0_323, %c16_324] : memref<16x32xf32, #tpu.memory_space<vmem>>, vector<2x16xf32>
    tpu.vector_store %arg23[%c0_323, %c16_324], %746 {strides = array<i32>} : memref<16x32xf32, #tpu.memory_space<vmem>>, vector<2x16xf32>,
    %c0_325 = arith.constant 0 : index
    %c0_326 = arith.constant 0 : index
    %748 = vector.load %arg23[%c0_325, %c0_326] : memref<16x32xf32, #tpu.memory_space<vmem>>, vector<16x32xf32>
    %cst_327 = arith.constant 0.000000e+00 : f32
    %749 = vector.broadcast %cst_327 : f32 to vector<16x32xf32>
    %750 = arith.maximumf %748, %749 : vector<16x32xf32>
    %751 = tpu.iota {dimensions = array<i32: 0>} : vector<16x32xi32>
    %c0_328 = arith.constant 0 : index
    %752 = memref.load %arg0[%c0_328] : memref<2xi32, #tpu.memory_space<smem>>
    %c2_i32 = arith.constant 2 : i32
    %753 = arith.muli %752, %c2_i32 : i32
    %c0_i32_329 = arith.constant 0 : i32
    %754 = arith.addi %753, %c0_i32_329 : i32
    %755 = vector.broadcast %754 : i32 to vector<16x32xi32>
    %756 = arith.cmpi eq, %751, %755 : vector<16x32xi32>
    %cst_330 = arith.constant 0.000000e+00 : f32
    %757 = vector.broadcast %cst_330 : f32 to vector<16x32xf32>
    %758 = arith.select %756, %750, %757 : vector<16x32xi1>, vector<16x32xf32>
    %cst_331 = arith.constant dense<0.000000e+00> : vector<32xf32>
    %759 = vector.multi_reduction <add>, %758, %cst_331 [0] : vector<16x32xf32> to vector<32xf32>
    %760 = vector.shape_cast %759 : vector<32xf32> to vector<1x32xf32>
    %c1_332 = arith.constant 1 : index
    %761 = memref.load %arg0[%c1_332] : memref<2xi32, #tpu.memory_space<smem>>
    %c2_i32_333 = arith.constant 2 : i32
    %762 = arith.muli %761, %c2_i32_333 : i32
    %c1_i32_334 = arith.constant 1 : i32
    %763 = arith.addi %762, %c1_i32_334 : i32
    %764 = vector.broadcast %763 : i32 to vector<16x32xi32>
    %765 = arith.cmpi eq, %751, %764 : vector<16x32xi32>
    %cst_335 = arith.constant 0.000000e+00 : f32
    %766 = vector.broadcast %cst_335 : f32 to vector<16x32xf32>
    %767 = arith.select %765, %750, %766 : vector<16x32xi1>, vector<16x32xf32>
    %cst_336 = arith.constant dense<0.000000e+00> : vector<32xf32>
    %768 = vector.multi_reduction <add>, %767, %cst_336 [0] : vector<16x32xf32> to vector<32xf32>
    %769 = vector.shape_cast %768 : vector<32xf32> to vector<1x32xf32>
    %770 = tpu.concatenate %760, %769 in 0 : vector<1x32xf32>, vector<1x32xf32> -> vector<2x32xf32>
    %c0_337 = arith.constant 0 : index
    %c0_338 = arith.constant 0 : index
    %771 = vector.load %arg13[%c0_337, %c0_338] : memref<32x32xf32, #tpu.memory_space<vmem>>, vector<32x32xf32>
    %cst_339 = arith.constant dense<0.000000e+00> : vector<2x32xf32>
    %772 = tpu.matmul %770, %771, %cst_339 {dimension_numbers = #tpu.dot_dimension_numbers<[1], [0], [0], [1], [0, 0, 1, 1], [], []>} : vector<2x32xf32>, vector<32x32xf32>, vector<2x32xf32> -> vector<2x32xf32>
    %c0_340 = arith.constant 0 : index
    %c0_341 = arith.constant 0 : index
    %773 = vector.load %arg14[%c0_340, %c0_341] : memref<1x32xf32, #tpu.memory_space<vmem>>, vector<1x32xf32>
    %774 = vector.broadcast %773 : vector<1x32xf32> to vector<2x32xf32>
    %775 = arith.addf %772, %774 : vector<2x32xf32>
    %cst_342 = arith.constant 0.000000e+00 : f32
    %776 = vector.broadcast %cst_342 : f32 to vector<2x32xf32>
    %777 = arith.maximumf %775, %776 : vector<2x32xf32>
    %c0_343 = arith.constant 0 : index
    %c0_344 = arith.constant 0 : index
    %778 = vector.load %arg15[%c0_343, %c0_344] : memref<32x1xf32, #tpu.memory_space<vmem>>, vector<32x1xf32>
    %cst_345 = arith.constant dense<0.000000e+00> : vector<2x1xf32>
    %779 = tpu.matmul %777, %778, %cst_345 {dimension_numbers = #tpu.dot_dimension_numbers<[1], [0], [0], [1], [0, 0, 1, 1], [], []>} : vector<2x32xf32>, vector<32x1xf32>, vector<2x1xf32> -> vector<2x1xf32>
    %c0_346 = arith.constant 0 : index
    %c0_347 = arith.constant 0 : index
    %780 = vector.load %arg16[%c0_346, %c0_347] : memref<1x1xf32, #tpu.memory_space<vmem>>, vector<1x1xf32>
    %781 = vector.broadcast %780 : vector<1x1xf32> to vector<2x1xf32>
    %782 = arith.addf %779, %781 : vector<2x1xf32>
    %c0_348 = arith.constant 0 : index
    %c0_349 = arith.constant 0 : index
    %783 = vector.load %arg17[%c0_348, %c0_349] : memref<2x1xf32, #tpu.memory_space<vmem>>, vector<2x1xf32>
    tpu.vector_store %arg17[%c0_348, %c0_349], %782 {strides = array<i32>} : memref<2x1xf32, #tpu.memory_space<vmem>>, vector<2x1xf32>,
    return
  }
}

</mosaic_0001>

<bundles_post_ra>
// kernel: sskip_forward.1
= control target key start
LH: loop header
LB: loop body
LE: loop exit
PB: predicated region body
PF: predicated region fallthrough
CT: control target
= control target key end

     0   :  { %s5240_s0 = inlined_call_operand.vmem [shape: s32[2], index: 0, kind: input, shape index: {}]   ;;  %s5241_s1 = inlined_call_operand.hbm [shape: f32[2,8,32], index: 1, kind: input, shape index: {}]   ;;  %s5242_s2 = inlined_call_operand.vmem [shape: f32[32,64], index: 2, kind: input, shape index: {}]   ;;  %s5243_s3 = inlined_call_operand.hbm [shape: f32[16,64], index: 3, kind: input, shape index: {}]   ;;  %s5244_s4 = inlined_call_operand.hbm [shape: f32[1,64], index: 4, kind: input, shape index: {}]   ;;  %s5245_s5 = inlined_call_operand.hbm [shape: f32[16,128], index: 5, kind: input, shape index: {}]   ;;  %s5246_s6 = inlined_call_operand.vmem [shape: f32[32,128], index: 6, kind: input, shape index: {}]   ;;  %s5247_s7 = inlined_call_operand.hbm [shape: f32[1,128], index: 7, kind: input, shape index: {}]   ;;  %s5248_s8 = inlined_call_operand.vmem [shape: f32[32,16], index: 8, kind: input, shape index: {}]   ;;  %s5249_s9 = inlined_call_operand.hbm [shape: f32[1,16], index: 9, kind: input, shape index: {}]   ;;  %s5250_s10 = inlined_call_operand.hbm [shape: f32[16,128], index: 10, kind: input, shape index: {}]   ;;  %s5251_s11 = inlined_call_operand.vmem [shape: f32[32,128], index: 11, kind: input, shape index: {}]   ;;  %s5252_s12 = inlined_call_operand.vmem [shape: f32[1,128], index: 12, kind: input, shape index: {}]   ;;  %s5253_s13 = inlined_call_operand.hbm [shape: f32[32,32], index: 13, kind: input, shape index: {}]   ;;  %s5254_s14 = inlined_call_operand.hbm [shape: f32[1,32], index: 14, kind: input, shape index: {}]   ;;  %s5255_s15 = inlined_call_operand.vmem [shape: f32[32,1], index: 15, kind: input, shape index: {}]   ;;  %s5256_s16 = inlined_call_operand.<no memory space> [shape: f32[1,1], index: 16, kind: input, shape index: {}]   ;;  %s5257_s17 = inlined_call_operand.vmem [shape: f32[2,1], index: 17, kind: output, shape index: {}]  }
   0x1   :  { %5258 = sst [smem:[#allocation31_spill]] %s5240_s0  ;;  %v22_v0 = vstv %s5256_s16 }
   0x2   :  { %5259 = sst [smem:[#allocation32_spill]] %s5241_s1  ;;  %23 = vst [vmem:[#allocation8] sm:$0x1] %v22_v0 }
   0x3   :  { %24 = vsyncpa [#allocation11], 0 }
   0x4   :  { %25 = vsyncpa [#allocation10], 0 }
   0x5   :  { %26 = vsyncpa [#allocation14], 0 }
   0x6   :  { %27 = vsyncpa [#allocation17], 0 }
   0x7   :  { %28 = vsyncpa [#allocation20], 0 }
   0x8   :  { %29 = vsyncpa [#allocation23], 0  ;;  %s4444_s26 = smov [#allocation13]   ;;  %s4445_s28 = smov [#allocation16]  }
   0x9   :  { %s59_s27 = sshll.u32 %s4444_s26, 4  ;;  %s81_s29 = sshll.u32 %s4445_s28, 4  ;;  %s60_s27 = int_to_ptr.vmem [resolvable:$true] %s59_s27  ;;  %s82_s29 = int_to_ptr.vmem [resolvable:$true] %s81_s29 }
   0xa   :  { %s4248_s0 = scalar_lea.vmem %s60_s27, 256  ;;  %p4253_p1 = scmp.lt.s32.totalorder %s60_s27, %s60_s27 }
   0xb   :  { %p4249_p0 = scmp.ne.s32.totalorder %s60_s27, %s4248_s0  ;;  %p4254_p2 = scmp.lt.s32.totalorder %s4248_s0, %s4248_s0 }
   0xd   :  { %p4255_p3 = por %p4254_p2, %p4253_p1 }
   0xf   :  { %p4256_p4 = pnand %p4255_p3, %p4249_p0 }
  0x11   :  { %4259 = shalt.err (!%p4256_p4)
}
  0x12   :  { %s4446_s16 = smov 128   ;;  %s4447_s30 = smov 8  }
  0x13   :  { %65 = dma.hbm_to_vmem [thread:$0]  %s5243_s3, 256, %s60_s27, [#allocation14], %s4446_s16, %s4446_s16, %s4447_s30  }
  0x14   :  { %s4268_s1 = scalar_lea.vmem %s82_s29, 256  ;;  %p4273_p6 = scmp.lt.s32.totalorder %s82_s29, %s82_s29 }
  0x15   :  { %p4269_p5 = scmp.ne.s32.totalorder %s82_s29, %s4268_s1  ;;  %p4274_p7 = scmp.lt.s32.totalorder %s4268_s1, %s4268_s1 }
  0x17   :  { %p4275_p8 = por %p4274_p7, %p4273_p6 }
  0x19   :  { %p4276_p9 = pnand %p4275_p8, %p4269_p5 }
  0x1b   :  { %4279 = shalt.err (!%p4276_p9)
}
  0x1c   :  { %87 = dma.hbm_to_vmem [thread:$0]  %s5245_s5, 256, %s82_s29, [#allocation17], %s4446_s16, %s4446_s16, %s4447_s30  }
  0x1d   :  { %s4448_s22 = smov [#allocation19]   ;;  %s4449_s24 = smov [#allocation22]  }
  0x1e   :  { %s108_s23 = sshll.u32 %s4448_s22, 4  ;;  %s133_s25 = sshll.u32 %s4449_s24, 4  ;;  %s109_s23 = int_to_ptr.vmem [resolvable:$true] %s108_s23  ;;  %s134_s25 = int_to_ptr.vmem [resolvable:$true] %s133_s25 }
  0x1f   :  { %s4288_s3 = scalar_lea.vmem %s109_s23, 16  ;;  %s4292_s26 = scalar_lea.vmem %s109_s23, 32 }
  0x20   :  { %p4289_p10 = scmp.ne.s32.totalorder %s109_s23, %s4288_s3  ;;  %p4293_p11 = scmp.lt.s32.totalorder %s109_s23, %s109_s23 }
  0x21   :  { %p4294_p12 = scmp.lt.s32.totalorder %s4292_s26, %s4288_s3 }
  0x23   :  { %p4295_p13 = por %p4294_p12, %p4293_p11 }
  0x25   :  { %p4296_p0 = pnand %p4295_p13, %p4289_p10 }
  0x27   :  { %4299 = shalt.err (!%p4296_p0)
}
  0x28   :  { %111 = dma.hbm_to_vmem [thread:$0]  %s5249_s9, 16, %s109_s23, [#allocation20]  }
  0x29   :  { %s4308_s0 = scalar_lea.vmem %s134_s25, 512  ;;  %p4313_p2 = scmp.lt.s32.totalorder %s134_s25, %s134_s25 }
  0x2a   :  { %p4309_p1 = scmp.ne.s32.totalorder %s134_s25, %s4308_s0  ;;  %p4314_p3 = scmp.lt.s32.totalorder %s4308_s0, %s4308_s0 }
  0x2c   :  { %p4315_p4 = por %p4314_p3, %p4313_p2 }
  0x2e   :  { %p4316_p5 = pnand %p4315_p4, %p4309_p1 }
  0x30   :  { %4319 = shalt.err (!%p4316_p5)
}
  0x31   :  { %139 = dma.hbm_to_vmem [thread:$0]  %s5253_s13, 512, %s134_s25, [#allocation23], %s4446_s16, %s4446_s16, %s4447_s30  }
  0x32   :  { %s5260_s1 = sld [smem:[#allocation31_spill]] }
  0x38   :  { %s36_s20 = sshll.u32 %s5260_s1, 4  ;;  %s37_s20 = int_to_ptr.vmem [resolvable:$true] %s36_s20 }
  0x39   :  { %s4320_s9 = scalar_lea.vmem %s37_s20, 16  ;;  %p4325_p7 = scmp.lt.s32.totalorder %s37_s20, %s37_s20 }
  0x3a   :  { %p4321_p6 = scmp.ne.s32.totalorder %s37_s20, %s4320_s9  ;;  %p4326_p8 = scmp.lt.s32.totalorder %s4320_s9, %s4320_s9 }
  0x3c   :  { %p4327_p9 = por %p4326_p8, %p4325_p7 }
  0x3e   :  { %p4328_p10 = pnand %p4327_p9, %p4321_p6 }
  0x40   :  { %4331 = shalt.err (!%p4328_p10)
}
  0x41   :  { %s4450_s21 = smov [#allocation9]   ;;  %s4451_s22 = smov [#allocation12]  }
  0x42   :  { %39 = dma.vmem_to_smem %s37_s20, 16, %s4450_s21, [#allocation11]  }
  0x43   :  { %s45_s23 = sshll.u32 %s4451_s22, 4  ;;  %s4452_s24 = smov [#allocation15]   ;;  %s46_s23 = int_to_ptr.vmem [resolvable:$true] %s45_s23 }
  0x44   :  { %s72_s3 = sshll.u32 %s4452_s24, 4  ;;  %s4340_s13 = scalar_lea.vmem %s46_s23, 256  ;;  %s73_s3 = int_to_ptr.vmem [resolvable:$true] %s72_s3 }
  0x45   :  { %p4341_p11 = scmp.ne.s32.totalorder %s46_s23, %s4340_s13  ;;  %p4345_p12 = scmp.lt.s32.totalorder %s46_s23, %s46_s23 }
  0x46   :  { %p4346_p13 = scmp.lt.s32.totalorder %s4340_s13, %s4340_s13 }
  0x48   :  { %p4347_p0 = por %p4346_p13, %p4345_p12 }
  0x4a   :  { %p4348_p1 = pnand %p4347_p0, %p4341_p11 }
  0x4c   :  { %4351 = shalt.err (!%p4348_p1)
}
  0x4d   :  { %s5261_s27 = sld [smem:[#allocation32_spill]]  ;;  %s4360_s28 = scalar_lea.vmem %s73_s3, 16 }
  0x4e   :  { %p4361_p2 = scmp.ne.s32.totalorder %s73_s3, %s4360_s28  ;;  %s4364_s0 = scalar_lea.vmem %s73_s3, 32 }
  0x4f   :  { %p4365_p3 = scmp.lt.s32.totalorder %s73_s3, %s73_s3  ;;  %p4366_p4 = scmp.lt.s32.totalorder %s4364_s0, %s4360_s28 }
  0x51   :  { %p4367_p5 = por %p4366_p4, %p4365_p3 }
  0x53   :  { %51 = dma.hbm_to_vmem [thread:$0]  %s5261_s27, 256, %s46_s23, [#allocation10], %s4446_s16, %s4446_s16, %s4447_s30  }
  0x54   :  { %p4368_p6 = pnand %p4367_p5, %p4361_p2 }
  0x56   :  { %4371 = shalt.err (!%p4368_p6)
}
  0x57   :  { %75 = dma.hbm_to_vmem [thread:$0]  %s5244_s4, 16, %s73_s3, [#allocation14]  }
  0x58   :  { %s4453_s18 = smov [#allocation18]   ;;  %s4454_s1 = smov [#allocation21]  }
  0x59   :  { %s96_s19 = sshll.u32 %s4453_s18, 4  ;;  %s117_s20 = sshll.u32 %s4454_s1, 4  ;;  %s97_s19 = int_to_ptr.vmem [resolvable:$true] %s96_s19  ;;  %s118_s20 = int_to_ptr.vmem [resolvable:$true] %s117_s20 }
  0x5a   :  { %s4380_s9 = scalar_lea.vmem %s97_s19, 16  ;;  %s4384_s21 = scalar_lea.vmem %s97_s19, 32 }
  0x5b   :  { %p4381_p7 = scmp.ne.s32.totalorder %s97_s19, %s4380_s9  ;;  %p4385_p8 = scmp.lt.s32.totalorder %s97_s19, %s97_s19 }
  0x5c   :  { %p4386_p9 = scmp.lt.s32.totalorder %s4384_s21, %s4380_s9 }
  0x5e   :  { %p4387_p10 = por %p4386_p9, %p4385_p8 }
  0x60   :  { %p4388_p11 = pnand %p4387_p10, %p4381_p7 }
  0x62   :  { %4391 = shalt.err (!%p4388_p11)
}
  0x63   :  { %99 = dma.hbm_to_vmem [thread:$0]  %s5247_s7, 16, %s97_s19, [#allocation17]  }
  0x64   :  { %s4400_s24 = scalar_lea.vmem %s118_s20, 256  ;;  %p4405_p13 = scmp.lt.s32.totalorder %s118_s20, %s118_s20 }
  0x65   :  { %p4401_p12 = scmp.ne.s32.totalorder %s118_s20, %s4400_s24  ;;  %p4406_p0 = scmp.lt.s32.totalorder %s4400_s24, %s4400_s24 }
  0x67   :  { %p4407_p1 = por %p4406_p0, %p4405_p13 }
  0x69   :  { %p4408_p2 = pnand %p4407_p1, %p4401_p12 }
  0x6b   :  { %4411 = shalt.err (!%p4408_p2)
}
  0x6c   :  { %123 = dma.hbm_to_vmem [thread:$0]  %s5250_s10, 256, %s118_s20, [#allocation20], %s4446_s16, %s4446_s16, %s4447_s30  }
  0x6d   :  { %s4455_s13 = smov [#allocation24]  }
  0x6e   :  { %s146_s25 = sshll.u32 %s4455_s13, 4  ;;  %s147_s25 = int_to_ptr.vmem [resolvable:$true] %s146_s25 }
  0x6f   :  { %s4420_s26 = scalar_lea.vmem %s147_s25, 16  ;;  %s4424_s7 = scalar_lea.vmem %s147_s25, 32 }
  0x70   :  { %p4421_p3 = scmp.ne.s32.totalorder %s147_s25, %s4420_s26  ;;  %p4425_p4 = scmp.lt.s32.totalorder %s147_s25, %s147_s25 }
  0x71   :  { %p4426_p5 = scmp.lt.s32.totalorder %s4424_s7, %s4420_s26 }
  0x73   :  { %p4427_p6 = por %p4426_p5, %p4425_p4 }
  0x75   :  { %p4428_p7 = pnand %p4427_p6, %p4421_p3 }
  0x77   :  { %4431 = shalt.err (!%p4428_p7)
}
  0x78   :  { %149 = dma.hbm_to_vmem [thread:$0]  %s5254_s14, 16, %s147_s25, [#allocation23]  }
  0x79   :  { %4432 = dma.done.wait [#allocation11], 16  }
  0x7a   :  { %4433 = vsyncadd [#allocation11], 4294967280 }
  0x7b   :  { %4434 = dma.done.wait [#allocation10], 256  }
  0x7c   :  { %4435 = vsyncadd [#allocation10], 4294967040 }
  0x7d   :  { %4436 = dma.done.wait [#allocation14], 272  }
  0x7e   :  { %4437 = vsyncadd [#allocation14], 4294967024 }
  0x7f   :  { %4438 = dma.done.wait [#allocation17], 272  }
  0x80   :  { %4439 = vsyncadd [#allocation17], 4294967024 }
  0x81   :  { %4440 = dma.done.wait [#allocation20], 272  }
  0x82   :  { %4441 = vsyncadd [#allocation20], 4294967024 }
  0x83   :  { %4442 = dma.done.wait [#allocation23], 528  }
  0x84   :  { %4443 = vsyncadd [#allocation23], 4294966768 }
  0x85   :  { %184 = sfence }
  0x86   :  { %v188_v1 = vld [vmem:[%s5242_s2 + $0x18] sm:$0xff]  ;;  %v4456_v2 = vmov 0.0   ;;  %v187_v3 = vld [vmem:[%s5242_s2 + $0x10] sm:$0xff]  ;;  %v186_v4 = vld [vmem:[%s5242_s2 + $0x8] sm:$0xff]  ;;  %vm197_vm0 = vcmask 261120   ;;  %vm4457_vm1 = vmmov 0   ;;  %v351_v13 = vlaneseq }
  0x87   :  { %3728 = vmatprep.subr.mxu0 %v4456_v2  ;;  %3739 = vmatprep.subr.mxu1 %v4456_v2  ;;  %v185_v5 = vld [vmem:[%s5242_s2] sm:$0xff]  ;;  %v274_v7 = vld [vmem:[#allocation12 + $0x8] sm:$0xff]  ;;  %v4630_v9 = vld [vmem:[#allocation13] sm:$0xff]  ;;  %vm271_vm2 = vcmask 523264   ;;  %vm374_vm3 = vcmask 1040384   ;;  %s4458_s2 = smov 96  }
  0x88   :  { %3729 = vmatpush3.msra.mxu0 %v188_v1  ;;  %3740 = vmatpush3.msra.mxu1 %v188_v1  ;;  %v190_v6 = vld [vmem:[#allocation12] sm:$0xff]  ;;  %v4625_v8 = vld [vmem:[#allocation13 + $0x8] sm:$0xff]  ;;  %v4653_v18 = vand.u32 127, %v351_v13  ;;  %s4459_s19 = smov 16   ;;  %s4460_s1 = smov 32   ;;  %vm486_vm8 = vcmask 58368  }
  0x89   :  { %3730 = vmatprep.subr.mxu0 %v4456_v2  ;;  %3741 = vmatprep.subr.mxu1 %v4456_v2  ;;  %v3526_v10 = vld [vmem:[#allocation15] ss:$0 sm:$0xff]  ;;  %s4461_s20 = smov 80   ;;  %vm488_vm9 = vcmask 123968   ;;  %vm383_vm10 = vcmask 130048   ;;  %v4801_v36 = vld [vmem:[%s5246_s6 + $0x18] sm:$0xff] }
  0x8a   :  { %3731 = vmatpush3.msra.mxu0 %v187_v3  ;;  %3742 = vmatpush3.msra.mxu1 %v187_v3  ;;  %v357_v21 = vand.u32 15, %v4653_v18  ;;  %vm366_vm5 = vcmp.ge.s32.totalorder %v4653_v18, 32  ;;  %vm367_vm6 = vcmp.lt.s32.totalorder %v4653_v18, 48  ;;  %vm1413_vm12 = vcmp.ge.s32.totalorder %v4653_v18, 64  ;;  %s3584_s21 = sld [smem:[#allocation9 + $0x1]] }
  0x8b   :  { %3732 = vmatprep.subr.mxu0 %v4456_v2  ;;  %3743 = vmatprep.subr.mxu1 %v4456_v2  ;;  %vm4666_vm7 = vmand %vm366_vm5, %vm367_vm6  ;;  %vm1414_vm13 = vcmp.lt.s32.totalorder %v4653_v18, 96  ;;  %vm1520_vm15 = vcmask 123904   ;;  %s3311_s22 = sld [smem:[#allocation9]] }
  0x8c   :  { %3733 = vmatpush3.msra.mxu0 %v186_v4  ;;  %3744 = vmatpush3.msra.mxu1 %v186_v4  ;;  %vm4656_vm4 = vcmp.lt.s32.totalorder %v357_v21, 8  ;;  %vm4861_vm14 = vmand %vm1413_vm12, %vm1414_vm13 }
  0x8d   :  { %3734 = vmatprep.subr.mxu0 %v4456_v2  ;;  %3745 = vmatprep.subr.mxu1 %v4456_v2 }
  0x8e   :  { %3735 = vmatpush3.msra.mxu0 %v185_v5  ;;  %3736 = vmatprep.mubr.msk.f32.mxu0 %vm4457_vm1, %v4456_v2 }
  0x8f   :  { %3746 = vmatpush3.msra.mxu1 %v185_v5  ;;  %3747 = vmatprep.mubr.msk.f32.mxu1 %vm4457_vm1, %v4456_v2 }
  0x90   :  { %3737 = vmatmul.mubr.msk.f32.vlgmr.msra.gmra.mxu0 %vm197_vm0, %v190_v6  ;;  %3748 = vmatmul.mubr.msk.f32.vlgmr.msra.gmra.mxu1 %vm197_vm0, %v274_v7  ;;  %s3585_s23 = sshll.u32 %s3584_s21, 1 }
  0x91   :  { %3750 = vmatprep.subr.mxu0 %v4456_v2  ;;  %3754 = vmatprep.mubr.msk.f32.mxu0 %vm4457_vm1, %v4456_v2  ;;  %s3583_s24 = sshll.u32 %s3311_s22, 1  ;;  %s3329_s4 = sadd.s32 1, %s3585_s23 }
  0x92   :  { %3751 = vmatpush3.msra.mxu0 %v4625_v8  ;;  %3757 = vmatprep.subr.mxu1 %v4456_v2 }
  0x93   :  { %3752 = vmatprep.subr.mxu0 %v4456_v2  ;;  %3758 = vmatpush3.msra.mxu1 %v4625_v8 }
  0x94   :  { %3753 = vmatpush3.msra.mxu0 %v4630_v9  ;;  %3759 = vmatprep.subr.mxu1 %v4456_v2 }
  0x95   :  { %3755 = vmatmul.mubr.f32.vlgmr.msra.gmra.mxu0 %v4456_v2  ;;  %3760 = vmatpush3.msra.mxu1 %v4630_v9 }
  0x96   :  { %3761 = vmatprep.mubr.msk.f32.mxu1 %vm4457_vm1, %v4456_v2  ;;  %3764 = vmatprep.subr.mxu0 %v4456_v2 }
  0x97   :  { %3765 = vmatpush3.msra.mxu0 %v4625_v8  ;;  %3768 = vmatprep.mubr.msk.f32.mxu0 %vm4457_vm1, %v4456_v2 }
  0x98   :  { %3766 = vmatprep.subr.mxu0 %v4456_v2  ;;  %3771 = vmatprep.subr.mxu1 %v4456_v2 }
  0x99   :  { %3767 = vmatpush3.msra.mxu0 %v4630_v9 }
  0x9a   :  { %3778 = vmatprep.subr.mxu0 %v4456_v2 }
 0x150   :  { %v267_v11 = vpop.f32.mrf.mxu0  ;;  %v344_v12 = vpop.f32.mrf.mxu1 }
 0x151   :  { %v268_v14 = vadd.f32 %v3526_v10, %v267_v11  ;;  %v345_v15 = vadd.f32 %v3526_v10, %v344_v12 }
 0x152   :  { %v3738_v16 = vpop.f32.mrf.mxu0  ;;  %v3749_v17 = vpop.f32.mrf.mxu1 }
 0x153   :  { %272 = vst.msk [vmem:[#allocation2] sm:$0xff] %vm271_vm2, %v268_v14  ;;  %348 = vst.msk [vmem:[#allocation2 + $0x8] sm:$0xff] %vm271_vm2, %v345_v15  ;;  %vm1522_vm2 = vcmask 255104  }
 0x155   :  { %v453_v19 = vpop.f32.mrf.mxu0 }
 0x157   :  { %v3756_v20 = vpop.f32.mrf.mxu0 }
 0x15a   :  { %v369_v22 = vld [vmem:[#allocation2] sm:$0x1]  ;;  %v370_v23 = vld [vmem:[#allocation2 + $0x8] sm:$0x1]  ;;  %v376_v25 = vld [vmem:[#allocation2 + $0x7] sm:$0x1] }
 0x15b   :  { %v372_v24 = vrot.slane %v370_v23, 7  ;;  %v377_v26 = vld [vmem:[#allocation2 + $0xf] sm:$0x1]  ;;  %v491_v49 = vld [vmem:[#allocation2 + $0x9] sm:$0x1] }
 0x15c   :  { %v379_v28 = vrot.slane %v377_v26, 7  ;;  %v497_v50 = vld [vmem:[#allocation2 + $0xe] sm:$0x1]  ;;  %v493_v51 = vrot.slane %v491_v49, 7  ;;  %v490_v53 = vld [vmem:[#allocation2 + $0x1] sm:$0x1] }
 0x15d   :  { %v375_v29 = vsel %vm374_vm3, %v369_v22, %v372_v24  ;;  %v499_v52 = vrot.slane %v497_v50, 7  ;;  %v496_v54 = vld [vmem:[#allocation2 + $0x6] sm:$0x1]  ;;  %v607_v16 = vld [vmem:[#allocation2 + $0xa] sm:$0x1] }
 0x15e   :  { %v381_v30 = vsel %vm374_vm3, %v376_v25, %v379_v28  ;;  %v495_v55 = vsel %vm374_vm3, %v490_v53, %v493_v51  ;;  %v613_v17 = vld [vmem:[#allocation2 + $0xd] sm:$0x1]  ;;  %v606_v21 = vld [vmem:[#allocation2 + $0x2] sm:$0x1]  ;;  %v612_v22 = vld [vmem:[#allocation2 + $0x5] sm:$0x1] }
 0x15f   :  { %v382_v31 = vsel %vm4656_vm4, %v375_v29, %v381_v30  ;;  %v501_v56 = vsel %vm374_vm3, %v496_v54, %v499_v52  ;;  %v615_v20 = vrot.slane %v613_v17, 7  ;;  %v722_v50 = vld [vmem:[#allocation2 + $0x3] sm:$0x1]  ;;  %v728_v51 = vld [vmem:[#allocation2 + $0x4] sm:$0x1] }
 0x160   :  { %v454_v32 = vadd.f32 %v453_v19, %v382_v31  ;;  %v502_v57 = vsel %vm4656_vm4, %v495_v55, %v501_v56  ;;  %v609_v19 = vrot.slane %v607_v16, 7  ;;  %v838_v17 = vld [vmem:[#allocation2 + $0x4] sm:$0x1] }
 0x161   :  { %v617_v24 = vsel %vm374_vm3, %v612_v22, %v615_v20 }
 0x162   :  { %v3529_v33 = vmul.f32 -1.442695, %v454_v32  ;;  %v611_v23 = vsel %vm374_vm3, %v606_v21, %v609_v19  ;;  %v844_v19 = vld [vmem:[#allocation2 + $0x3] sm:$0x1] }
 0x163   :  { %v618_v25 = vsel %vm4656_vm4, %v611_v23, %v617_v24 }
 0x164   :  { %4048 = vpow2.f32 %v3529_v33 }
 0x165   :  { %4050 = vtanh.f32 %v454_v32 }
 0x171   :  { %v4049_v34 = vpop.eup %4048 }
 0x172   :  { %v461_v35 = vadd.f32 1.0, %v4049_v34  ;;  %v4051_v37 = vpop.eup %4050 }
 0x174   :  { %4052 = vrcp.f32 %v461_v35 }
 0x181   :  { %v4053_v38 = vpop.eup %4052 }
 0x182   :  { %v464_v39 = vsel %vm4666_vm7, %v4051_v37, %v4053_v38 }
 0x183   :  { %467 = vrot.lane.b32.xlu0 %v464_v39, %s4458_s2  ;;  %v465_v42 = vmul.f32 0.0, %v464_v39 }
 0x1f5   :  { %v468_v40 = vpop.permute.xlu0 %467 }
 0x1f6   :  { %v470_v41 = vmul.f32 %v468_v40, %v464_v39 }
 0x1f8   :  { %472 = vrot.lane.b32.xlu0 %v470_v41, %s4459_s19 }
 0x26a   :  { %v473_v43 = vpop.permute.xlu0 %472 }
 0x26b   :  { %v475_v44 = vadd.f32 %v473_v43, %v465_v42 }
 0x26d   :  { %4054 = vtanh.f32 %v475_v44 }
 0x27a   :  { %v4055_v45 = vpop.eup %4054 }
 0x27b   :  { %478 = vrot.lane.b32.xlu1 %v4055_v45, %s4460_s1 }
 0x2ed   :  { %v479_v46 = vpop.permute.xlu1 %478 }
 0x2ee   :  { %v481_v47 = vmul.f32 %v479_v46, %v464_v39  ;;  %v723_v46 = vld [vmem:[#allocation2 + $0xb] sm:$0x1] }
 0x2f0   :  { %483 = vrot.lane.b32.xlu1 %v481_v47, %s4461_s20  ;;  %v729_v47 = vld [vmem:[#allocation2 + $0xc] sm:$0x1] }
 0x2f1   :  { %v731_v49 = vrot.slane %v729_v47, 7  ;;  %v954_v47 = vld [vmem:[#allocation2 + $0x5] sm:$0x1] }
 0x2f3   :  { %v733_v53 = vsel %vm374_vm3, %v728_v51, %v731_v49 }
 0x362   :  { %v484_v48 = vpop.permute.xlu1 %483 }
 0x363   :  { %487 = vst.msk [vmem:[#allocation3] sm:$0x3] %vm486_vm8, %v484_v48  ;;  %3762 = vmatmul.mubr.msk.f32.vlgmr.msra.gmra.mxu1 %vm383_vm10, %v484_v48 }
 0x364   :  { %489 = vst.msk [vmem:[#allocation3 + $0xe] sm:$0x3] %vm488_vm9, %v484_v48  ;;  %3772 = vmatpush3.msra.mxu1 %v4625_v8  ;;  %3775 = vmatprep.mubr.msk.f32.mxu1 %vm4457_vm1, %v4456_v2  ;;  %v725_v48 = vrot.slane %v723_v46, 7 }
 0x365   :  { %3773 = vmatprep.subr.mxu1 %v4456_v2 }
 0x366   :  { %3774 = vmatpush3.msra.mxu1 %v4630_v9  ;;  %v727_v52 = vsel %vm374_vm3, %v722_v50, %v725_v48  ;;  %v960_v48 = vld [vmem:[#allocation2 + $0x2] sm:$0x1] }
 0x367   :  { %3785 = vmatprep.subr.mxu1 %v4456_v2  ;;  %v734_v54 = vsel %vm4656_vm4, %v727_v52, %v733_v53 }
 0x423   :  { %v571_v58 = vpop.f32.mrf.mxu1 }
 0x424   :  { %v572_v59 = vadd.f32 %v571_v58, %v502_v57 }
 0x425   :  { %v3763_v60 = vpop.f32.mrf.mxu1 }
 0x426   :  { %v3531_v61 = vmul.f32 -1.442695, %v572_v59 }
 0x428   :  { %4056 = vpow2.f32 %v3531_v61 }
 0x429   :  { %4058 = vtanh.f32 %v572_v59 }
 0x435   :  { %v4057_v62 = vpop.eup %4056 }
 0x436   :  { %v579_v63 = vadd.f32 1.0, %v4057_v62  ;;  %v4059_v0 = vpop.eup %4058 }
 0x438   :  { %4060 = vrcp.f32 %v579_v63 }
 0x445   :  { %v4061_v1 = vpop.eup %4060 }
 0x446   :  { %v582_v3 = vsel %vm4666_vm7, %v4059_v0, %v4061_v1 }
 0x447   :  { %585 = vrot.lane.b32.xlu0 %v582_v3, %s4458_s2  ;;  %v583_v6 = vmul.f32 %v582_v3, %v475_v44 }
 0x4b9   :  { %v586_v4 = vpop.permute.xlu0 %585 }
 0x4ba   :  { %v588_v5 = vmul.f32 %v586_v4, %v582_v3 }
 0x4bc   :  { %590 = vrot.lane.b32.xlu1 %v588_v5, %s4459_s19 }
 0x52e   :  { %v591_v7 = vpop.permute.xlu1 %590 }
 0x52f   :  { %v593_v10 = vadd.f32 %v591_v7, %v583_v6 }
 0x531   :  { %4062 = vtanh.f32 %v593_v10 }
 0x53e   :  { %v4063_v11 = vpop.eup %4062 }
 0x53f   :  { %596 = vrot.lane.b32.xlu0 %v4063_v11, %s4460_s1 }
 0x5b1   :  { %v597_v12 = vpop.permute.xlu0 %596 }
 0x5b2   :  { %v599_v14 = vmul.f32 %v597_v12, %v582_v3  ;;  %v839_v12 = vld [vmem:[#allocation2 + $0xc] sm:$0x1] }
 0x5b4   :  { %601 = vrot.lane.b32.xlu1 %v599_v14, %s4461_s20  ;;  %v845_v14 = vld [vmem:[#allocation2 + $0xb] sm:$0x1] }
 0x5b5   :  { %v847_v16 = vrot.slane %v845_v14, 7 }
 0x5b7   :  { %v849_v21 = vsel %vm374_vm3, %v844_v19, %v847_v16 }
 0x626   :  { %v602_v15 = vpop.permute.xlu1 %601 }
 0x627   :  { %604 = vst.msk [vmem:[#allocation3 + $0x2] sm:$0x3] %vm486_vm8, %v602_v15  ;;  %3769 = vmatmul.mubr.msk.f32.vlgmr.msra.gmra.mxu0 %vm383_vm10, %v602_v15 }
 0x628   :  { %605 = vst.msk [vmem:[#allocation3 + $0xc] sm:$0x3] %vm488_vm9, %v602_v15  ;;  %3779 = vmatpush3.msra.mxu0 %v4625_v8  ;;  %3782 = vmatprep.mubr.msk.f32.mxu0 %vm4457_vm1, %v4456_v2  ;;  %v841_v15 = vrot.slane %v839_v12, 7  ;;  %v1076_v12 = vld [vmem:[#allocation2 + $0x1] sm:$0x1] }
 0x629   :  { %3780 = vmatprep.subr.mxu0 %v4456_v2 }
 0x62a   :  { %3781 = vmatpush3.msra.mxu0 %v4630_v9  ;;  %v843_v20 = vsel %vm374_vm3, %v838_v17, %v841_v15 }
 0x62b   :  { %3792 = vmatprep.subr.mxu0 %v4456_v2  ;;  %v850_v22 = vsel %vm4656_vm4, %v843_v20, %v849_v21 }
 0x6e7   :  { %v687_v26 = vpop.f32.mrf.mxu0 }
 0x6e8   :  { %v688_v28 = vadd.f32 %v687_v26, %v618_v25 }
 0x6e9   :  { %v3770_v29 = vpop.f32.mrf.mxu0 }
 0x6ea   :  { %v3533_v30 = vmul.f32 -1.442695, %v688_v28 }
 0x6ec   :  { %4064 = vpow2.f32 %v3533_v30 }
 0x6ed   :  { %4066 = vtanh.f32 %v688_v28 }
 0x6f9   :  { %v4065_v31 = vpop.eup %4064 }
 0x6fa   :  { %v695_v32 = vadd.f32 1.0, %v4065_v31  ;;  %v4067_v33 = vpop.eup %4066 }
 0x6fc   :  { %4068 = vrcp.f32 %v695_v32 }
 0x709   :  { %v4069_v34 = vpop.eup %4068 }
 0x70a   :  { %v698_v35 = vsel %vm4666_vm7, %v4067_v33, %v4069_v34 }
 0x70b   :  { %701 = vrot.lane.b32.xlu0 %v698_v35, %s4458_s2  ;;  %v699_v39 = vmul.f32 %v698_v35, %v593_v10 }
 0x77d   :  { %v702_v37 = vpop.permute.xlu0 %701 }
 0x77e   :  { %v704_v38 = vmul.f32 %v702_v37, %v698_v35 }
 0x780   :  { %706 = vrot.lane.b32.xlu1 %v704_v38, %s4459_s19 }
 0x7f2   :  { %v707_v40 = vpop.permute.xlu1 %706 }
 0x7f3   :  { %v709_v41 = vadd.f32 %v707_v40, %v699_v39 }
 0x7f5   :  { %4070 = vtanh.f32 %v709_v41 }
 0x802   :  { %v4071_v42 = vpop.eup %4070 }
 0x803   :  { %712 = vrot.lane.b32.xlu0 %v4071_v42, %s4460_s1 }
 0x875   :  { %v713_v43 = vpop.permute.xlu0 %712 }
 0x876   :  { %v715_v44 = vmul.f32 %v713_v43, %v698_v35  ;;  %v955_v43 = vld [vmem:[#allocation2 + $0xd] sm:$0x1] }
 0x878   :  { %717 = vrot.lane.b32.xlu1 %v715_v44, %s4461_s20  ;;  %v961_v44 = vld [vmem:[#allocation2 + $0xa] sm:$0x1] }
 0x879   :  { %v963_v46 = vrot.slane %v961_v44, 7 }
 0x87b   :  { %v965_v50 = vsel %vm374_vm3, %v960_v48, %v963_v46 }
 0x8ea   :  { %v718_v45 = vpop.permute.xlu1 %717 }
 0x8eb   :  { %720 = vst.msk [vmem:[#allocation3 + $0x4] sm:$0x3] %vm486_vm8, %v718_v45  ;;  %3776 = vmatmul.mubr.msk.f32.vlgmr.msra.gmra.mxu1 %vm383_vm10, %v718_v45 }
 0x8ec   :  { %721 = vst.msk [vmem:[#allocation3 + $0xa] sm:$0x3] %vm488_vm9, %v718_v45  ;;  %3786 = vmatpush3.msra.mxu1 %v4625_v8  ;;  %3789 = vmatprep.mubr.msk.f32.mxu1 %vm4457_vm1, %v4456_v2  ;;  %v957_v45 = vrot.slane %v955_v43, 7  ;;  %v1192_v43 = vld [vmem:[#allocation2] sm:$0x1] }
 0x8ed   :  { %3787 = vmatprep.subr.mxu1 %v4456_v2 }
 0x8ee   :  { %3788 = vmatpush3.msra.mxu1 %v4630_v9  ;;  %v959_v49 = vsel %vm374_vm3, %v954_v47, %v957_v45 }
 0x8ef   :  { %3799 = vmatprep.subr.mxu1 %v4456_v2 }
 0x9ab   :  { %v803_v55 = vpop.f32.mrf.mxu1 }
 0x9ac   :  { %v804_v56 = vadd.f32 %v803_v55, %v734_v54 }
 0x9ad   :  { %v3777_v57 = vpop.f32.mrf.mxu1 }
 0x9ae   :  { %v3535_v58 = vmul.f32 -1.442695, %v804_v56 }
 0x9b0   :  { %4072 = vpow2.f32 %v3535_v58 }
 0x9b1   :  { %4074 = vtanh.f32 %v804_v56 }
 0x9bd   :  { %v4073_v59 = vpop.eup %4072 }
 0x9be   :  { %v811_v60 = vadd.f32 1.0, %v4073_v59  ;;  %v4075_v61 = vpop.eup %4074 }
 0x9c0   :  { %4076 = vrcp.f32 %v811_v60 }
 0x9cd   :  { %v4077_v62 = vpop.eup %4076 }
 0x9ce   :  { %v814_v63 = vsel %vm4666_vm7, %v4075_v61, %v4077_v62 }
 0x9cf   :  { %817 = vrot.lane.b32.xlu0 %v814_v63, %s4458_s2  ;;  %v815_v3 = vmul.f32 %v814_v63, %v709_v41 }
 0xa41   :  { %v818_v0 = vpop.permute.xlu0 %817 }
 0xa42   :  { %v820_v1 = vmul.f32 %v818_v0, %v814_v63 }
 0xa44   :  { %822 = vrot.lane.b32.xlu1 %v820_v1, %s4459_s19 }
 0xab6   :  { %v823_v4 = vpop.permute.xlu1 %822 }
 0xab7   :  { %v825_v5 = vadd.f32 %v823_v4, %v815_v3 }
 0xab9   :  { %4078 = vtanh.f32 %v825_v5 }
 0xac6   :  { %v4079_v6 = vpop.eup %4078 }
 0xac7   :  { %828 = vrot.lane.b32.xlu0 %v4079_v6, %s4460_s1  ;;  %v1077_v6 = vld [vmem:[#allocation2 + $0x9] sm:$0x1] }
 0xb39   :  { %v829_v7 = vpop.permute.xlu0 %828 }
 0xb3a   :  { %v831_v10 = vmul.f32 %v829_v7, %v814_v63 }
 0xb3c   :  { %833 = vrot.lane.b32.xlu1 %v831_v10, %s4461_s20  ;;  %v1079_v10 = vrot.slane %v1077_v6, 7 }
 0xb3e   :  { %v1081_v15 = vsel %vm374_vm3, %v1076_v12, %v1079_v10  ;;  %v3544_v10 = vld [vmem:[#allocation18] ss:$0 sm:$0xff] }
 0xbae   :  { %v834_v11 = vpop.permute.xlu1 %833 }
 0xbaf   :  { %836 = vst.msk [vmem:[#allocation3 + $0x6] sm:$0x3] %vm486_vm8, %v834_v11  ;;  %3783 = vmatmul.mubr.msk.f32.vlgmr.msra.gmra.mxu0 %vm383_vm10, %v834_v11 }
 0xbb0   :  { %837 = vst.msk [vmem:[#allocation3 + $0x8] sm:$0x3] %vm488_vm9, %v834_v11  ;;  %3793 = vmatpush3.msra.mxu0 %v4625_v8  ;;  %3796 = vmatprep.mubr.msk.f32.mxu0 %vm4457_vm1, %v4456_v2  ;;  %v1070_v11 = vld [vmem:[#allocation2 + $0x6] sm:$0x1] }
 0xbb1   :  { %3794 = vmatprep.subr.mxu0 %v4456_v2 }
 0xbb2   :  { %3795 = vmatpush3.msra.mxu0 %v4630_v9 }
 0xc6f   :  { %v919_v23 = vpop.f32.mrf.mxu0 }
 0xc70   :  { %v920_v24 = vadd.f32 %v919_v23, %v850_v22 }
 0xc71   :  { %v3784_v25 = vpop.f32.mrf.mxu0 }
 0xc72   :  { %v3537_v26 = vmul.f32 -1.442695, %v920_v24 }
 0xc74   :  { %4080 = vpow2.f32 %v3537_v26 }
 0xc75   :  { %4082 = vtanh.f32 %v920_v24 }
 0xc81   :  { %v4081_v28 = vpop.eup %4080 }
 0xc82   :  { %v927_v29 = vadd.f32 1.0, %v4081_v28  ;;  %v4083_v30 = vpop.eup %4082 }
 0xc84   :  { %4084 = vrcp.f32 %v927_v29 }
 0xc91   :  { %v4085_v31 = vpop.eup %4084 }
 0xc92   :  { %v930_v32 = vsel %vm4666_vm7, %v4083_v30, %v4085_v31 }
 0xc93   :  { %933 = vrot.lane.b32.xlu0 %v930_v32, %s4458_s2  ;;  %v931_v35 = vmul.f32 %v930_v32, %v825_v5  ;;  %v1071_v5 = vld [vmem:[#allocation2 + $0xe] sm:$0x1] }
 0xc94   :  { %v1073_v7 = vrot.slane %v1071_v5, 7 }
 0xc96   :  { %v1075_v14 = vsel %vm374_vm3, %v1070_v11, %v1073_v7 }
 0xc97   :  { %v1082_v16 = vsel %vm4656_vm4, %v1075_v14, %v1081_v15 }
 0xd05   :  { %v934_v33 = vpop.permute.xlu0 %933 }
 0xd06   :  { %v936_v34 = vmul.f32 %v934_v33, %v930_v32 }
 0xd08   :  { %938 = vrot.lane.b32.xlu1 %v936_v34, %s4459_s19 }
 0xd7a   :  { %v939_v37 = vpop.permute.xlu1 %938 }
 0xd7b   :  { %v941_v38 = vadd.f32 %v939_v37, %v931_v35 }
 0xd7d   :  { %4086 = vtanh.f32 %v941_v38 }
 0xd8a   :  { %v4087_v39 = vpop.eup %4086 }
 0xd8b   :  { %944 = vrot.lane.b32.xlu0 %v4087_v39, %s4460_s1  ;;  %v1193_v39 = vld [vmem:[#allocation2 + $0x8] sm:$0x1] }
 0xdfd   :  { %v945_v40 = vpop.permute.xlu0 %944 }
 0xdfe   :  { %v947_v41 = vmul.f32 %v945_v40, %v930_v32 }
 0xe00   :  { %949 = vrot.lane.b32.xlu1 %v947_v41, %s4461_s20  ;;  %v1195_v41 = vrot.slane %v1193_v39, 7 }
 0xe02   :  { %v1197_v45 = vsel %vm374_vm3, %v1192_v43, %v1195_v41 }
 0xe72   :  { %v950_v42 = vpop.permute.xlu1 %949 }
 0xe73   :  { %952 = vst.msk [vmem:[#allocation3 + $0x8] sm:$0x3] %vm486_vm8, %v950_v42  ;;  %3790 = vmatmul.mubr.msk.f32.vlgmr.msra.gmra.mxu1 %vm383_vm10, %v950_v42 }
 0xe74   :  { %953 = vst.msk [vmem:[#allocation3 + $0x6] sm:$0x3] %vm488_vm9, %v950_v42  ;;  %3800 = vmatpush3.msra.mxu1 %v4625_v8  ;;  %3803 = vmatprep.mubr.msk.f32.mxu1 %vm4457_vm1, %v4456_v2  ;;  %v966_v8 = vsel %vm4656_vm4, %v959_v49, %v965_v50  ;;  %v1186_v42 = vld [vmem:[#allocation2 + $0x7] sm:$0x1] }
 0xe75   :  { %3801 = vmatprep.subr.mxu1 %v4456_v2 }
 0xe76   :  { %3802 = vmatpush3.msra.mxu1 %v4630_v9 }
 0xe77   :  { %3813 = vmatprep.subr.mxu1 %v4456_v2 }
 0xf33   :  { %v1035_v51 = vpop.f32.mrf.mxu1 }
 0xf34   :  { %v1036_v52 = vadd.f32 %v1035_v51, %v966_v8 }
 0xf35   :  { %v3791_v53 = vpop.f32.mrf.mxu1 }
 0xf36   :  { %v3539_v54 = vmul.f32 -1.442695, %v1036_v52 }
 0xf38   :  { %4088 = vpow2.f32 %v3539_v54 }
 0xf39   :  { %4090 = vtanh.f32 %v1036_v52 }
 0xf45   :  { %v4089_v9 = vpop.eup %4088 }
 0xf46   :  { %v1043_v55 = vadd.f32 1.0, %v4089_v9  ;;  %v4091_v56 = vpop.eup %4090 }
 0xf48   :  { %4092 = vrcp.f32 %v1043_v55 }
 0xf55   :  { %v4093_v57 = vpop.eup %4092 }
 0xf56   :  { %v1046_v58 = vsel %vm4666_vm7, %v4091_v56, %v4093_v57 }
 0xf57   :  { %1049 = vrot.lane.b32.xlu0 %v1046_v58, %s4458_s2  ;;  %v1047_v61 = vmul.f32 %v1046_v58, %v941_v38  ;;  %v1187_v38 = vld [vmem:[#allocation2 + $0xf] sm:$0x1] }
 0xf58   :  { %v1189_v40 = vrot.slane %v1187_v38, 7 }
 0xf5a   :  { %v1191_v44 = vsel %vm374_vm3, %v1186_v42, %v1189_v40 }
 0xf5b   :  { %v1198_v46 = vsel %vm4656_vm4, %v1191_v44, %v1197_v45 }
 0xfc9   :  { %v1050_v59 = vpop.permute.xlu0 %1049 }
 0xfca   :  { %v1052_v60 = vmul.f32 %v1050_v59, %v1046_v58  ;;  %v1305_v59 = vld [vmem:[#allocation16 + $0x8] sm:$0xff] }
 0xfcb   :  { %3806 = vmatprep.subr.mxu0 %v1305_v59 }
 0xfcc   :  { %1054 = vrot.lane.b32.xlu1 %v1052_v60, %s4459_s19  ;;  %v1304_v60 = vld [vmem:[#allocation16] sm:$0xff] }
0x103e   :  { %v1055_v62 = vpop.permute.xlu1 %1054 }
0x103f   :  { %v1057_v63 = vadd.f32 %v1055_v62, %v1047_v61  ;;  %v4806_v61 = vld [vmem:[%s5246_s6 + $0x10] sm:$0xff] }
0x1041   :  { %4094 = vtanh.f32 %v1057_v63 }
0x104e   :  { %v4095_v0 = vpop.eup %4094 }
0x104f   :  { %1060 = vrot.lane.b32.xlu0 %v4095_v0, %s4460_s1  ;;  %v4813_v0 = vld [vmem:[%s5246_s6 + $0x8] sm:$0xff] }
0x10c1   :  { %v1061_v1 = vpop.permute.xlu0 %1060 }
0x10c2   :  { %v1063_v3 = vmul.f32 %v1061_v1, %v1046_v58  ;;  %v4821_v1 = vld [vmem:[%s5246_s6] sm:$0xff]  ;;  %s4462_s6 = smov 64  }
0x10c4   :  { %1065 = vrot.lane.b32.xlu1 %v1063_v3, %s4461_s20 }
0x1136   :  { %v1066_v4 = vpop.permute.xlu1 %1065 }
0x1137   :  { %1068 = vst.msk [vmem:[#allocation3 + $0xa] sm:$0x3] %vm486_vm8, %v1066_v4  ;;  %3797 = vmatmul.mubr.msk.f32.vlgmr.msra.gmra.mxu0 %vm383_vm10, %v1066_v4 }
0x1138   :  { %1069 = vst.msk [vmem:[#allocation3 + $0x4] sm:$0x3] %vm488_vm9, %v1066_v4  ;;  %3807 = vmatpush3.msra.mxu0 %v1305_v59 }
0x1139   :  { %3808 = vmatprep.subr.mxu0 %v1304_v60 }
0x113a   :  { %3809 = vmatpush3.msra.mxu0 %v1304_v60 }
0x113b   :  { %3824 = vmatprep.subr.mxu0 %v4456_v2 }
0x11f7   :  { %v1151_v17 = vpop.f32.mrf.mxu0 }
0x11f8   :  { %v1152_v19 = vadd.f32 %v1151_v17, %v1082_v16  ;;  %v1404_v16 = vand.u32 31, %v4653_v18 }
0x11f9   :  { %v3798_v20 = vpop.f32.mrf.mxu0 }
0x11fa   :  { %v3541_v21 = vmul.f32 -1.442695, %v1152_v19  ;;  %vm4853_vm11 = vcmp.lt.s32.totalorder %v1404_v16, 16 }
0x11fc   :  { %4096 = vpow2.f32 %v3541_v21 }
0x11fd   :  { %4098 = vtanh.f32 %v1152_v19 }
0x1209   :  { %v4097_v22 = vpop.eup %4096 }
0x120a   :  { %v1159_v23 = vadd.f32 1.0, %v4097_v22  ;;  %v4099_v24 = vpop.eup %4098 }
0x120c   :  { %4100 = vrcp.f32 %v1159_v23 }
0x1219   :  { %v4101_v25 = vpop.eup %4100 }
0x121a   :  { %v1162_v26 = vsel %vm4666_vm7, %v4099_v24, %v4101_v25 }
0x121b   :  { %1165 = vrot.lane.b32.xlu0 %v1162_v26, %s4458_s2  ;;  %v1163_v30 = vmul.f32 %v1162_v26, %v1057_v63 }
0x128d   :  { %v1166_v28 = vpop.permute.xlu0 %1165 }
0x128e   :  { %v1168_v29 = vmul.f32 %v1166_v28, %v1162_v26 }
0x1290   :  { %1170 = vrot.lane.b32.xlu1 %v1168_v29, %s4459_s19 }
0x1302   :  { %v1171_v31 = vpop.permute.xlu1 %1170 }
0x1303   :  { %v1173_v32 = vadd.f32 %v1171_v31, %v1163_v30 }
0x1305   :  { %4102 = vtanh.f32 %v1173_v32 }
0x1312   :  { %v4103_v33 = vpop.eup %4102 }
0x1313   :  { %1176 = vrot.lane.b32.xlu0 %v4103_v33, %s4460_s1 }
0x1385   :  { %v1177_v34 = vpop.permute.xlu0 %1176 }
0x1386   :  { %v1179_v35 = vmul.f32 %v1177_v34, %v1162_v26  ;;  %v3346_v26 = vld [vmem:[#allocation22 + $0x8] sm:$0xff] }
0x1388   :  { %1181 = vrot.lane.b32.xlu1 %v1179_v35, %s4461_s20 }
0x13fa   :  { %v1182_v37 = vpop.permute.xlu1 %1181 }
0x13fb   :  { %1184 = vst.msk [vmem:[#allocation3 + $0xc] sm:$0x3] %vm486_vm8, %v1182_v37  ;;  %3804 = vmatmul.mubr.msk.f32.vlgmr.msra.gmra.mxu1 %vm383_vm10, %v1182_v37 }
0x13fc   :  { %1185 = vst.msk [vmem:[#allocation3 + $0x2] sm:$0x3] %vm488_vm9, %v1182_v37  ;;  %3821 = vmatprep.mubr.msk.f32.mxu1 %vm4457_vm1, %v4456_v2  ;;  %3814 = vmatpush3.msra.mxu1 %v4801_v36 }
0x13fd   :  { %3815 = vmatprep.subr.mxu1 %v4456_v2 }
0x13fe   :  { %3816 = vmatpush3.msra.mxu1 %v4806_v61 }
0x13ff   :  { %3817 = vmatprep.subr.mxu1 %v4456_v2 }
0x1400   :  { %3818 = vmatpush3.msra.mxu1 %v4813_v0 }
0x1401   :  { %3819 = vmatprep.subr.mxu1 %v4456_v2 }
0x1402   :  { %3820 = vmatpush3.msra.mxu1 %v4821_v1 }
0x1403   :  { %3822 = vmatmul.mubr.f32.vlgmr.msra.gmra.mxu1 %v4456_v2  ;;  %3835 = vmatprep.subr.mxu1 %v4456_v2 }
0x1404   :  { %3836 = vmatpush3.msra.mxu1 %v4801_v36  ;;  %3843 = vmatprep.mubr.msk.f32.mxu1 %vm4457_vm1, %v4456_v2 }
0x1405   :  { %3837 = vmatprep.subr.mxu1 %v4456_v2 }
0x1406   :  { %3838 = vmatpush3.msra.mxu1 %v4806_v61 }
0x1407   :  { %3839 = vmatprep.subr.mxu1 %v4456_v2 }
0x1408   :  { %3840 = vmatpush3.msra.mxu1 %v4813_v0 }
0x1409   :  { %3841 = vmatprep.subr.mxu1 %v4456_v2 }
0x140a   :  { %3842 = vmatpush3.msra.mxu1 %v4821_v1 }
0x140b   :  { %3857 = vmatprep.subr.mxu1 %v4456_v2 }
0x14bb   :  { %v1267_v47 = vpop.f32.mrf.mxu1 }
0x14bc   :  { %v1268_v48 = vadd.f32 %v1267_v47, %v1198_v46 }
0x14bd   :  { %v3805_v49 = vpop.f32.mrf.mxu1 }
0x14be   :  { %v3543_v50 = vmul.f32 -1.442695, %v1268_v48 }
0x14c0   :  { %4104 = vpow2.f32 %v3543_v50 }
0x14c1   :  { %4106 = vtanh.f32 %v1268_v48 }
0x14c3   :  { %v1487_v6 = vpop.f32.mrf.mxu1 }
0x14c5   :  { %v3823_v7 = vpop.f32.mrf.mxu1 }
0x14cd   :  { %v4105_v8 = vpop.eup %4104 }
0x14ce   :  { %v1275_v51 = vadd.f32 1.0, %v4105_v8  ;;  %v4107_v52 = vpop.eup %4106 }
0x14d0   :  { %4108 = vrcp.f32 %v1275_v51 }
0x14dd   :  { %v4109_v53 = vpop.eup %4108 }
0x14de   :  { %v1278_v54 = vsel %vm4666_vm7, %v4107_v52, %v4109_v53 }
0x14df   :  { %1281 = vrot.lane.b32.xlu0 %v1278_v54, %s4458_s2  ;;  %v1279_v27 = vmul.f32 %v1278_v54, %v1173_v32 }
0x1551   :  { %v1282_v9 = vpop.permute.xlu0 %1281 }
0x1552   :  { %v1284_v55 = vmul.f32 %v1282_v9, %v1278_v54 }
0x1554   :  { %1286 = vrot.lane.b32.xlu1 %v1284_v55, %s4459_s19 }
0x15c6   :  { %v1287_v56 = vpop.permute.xlu1 %1286 }
0x15c7   :  { %v1289_v57 = vadd.f32 %v1287_v56, %v1279_v27 }
0x15c9   :  { %4110 = vtanh.f32 %v1289_v57 }
0x15d6   :  { %v4111_v58 = vpop.eup %4110 }
0x15d7   :  { %1292 = vrot.lane.b32.xlu0 %v4111_v58, %s4460_s1 }
0x1649   :  { %v1293_v62 = vpop.permute.xlu0 %1292 }
0x164a   :  { %v1295_v63 = vmul.f32 %v1293_v62, %v1278_v54 }
0x164c   :  { %1297 = vrot.lane.b32.xlu1 %v1295_v63, %s4461_s20 }
0x16be   :  { %v1298_v3 = vpop.permute.xlu1 %1297 }
0x16bf   :  { %1300 = vst.msk [vmem:[#allocation3 + $0xe] sm:$0x3] %vm486_vm8, %v1298_v3 }
0x16c0   :  { %1301 = vst.msk [vmem:[#allocation3] sm:$0x3] %vm488_vm9, %v1298_v3 }
0x16c6   :  { %v1303_v5 = vld [vmem:[#allocation3 + $0x8] sm:$0xff] }
0x16c7   :  { %v1302_v4 = vld [vmem:[#allocation3] sm:$0xff] }
0x16c8   :  { %3810 = vmatprep.mubr.msk.f32.mxu0 %vm383_vm10, %v1302_v4 }
0x16c9   :  { %3811 = vmatmul.mubr.msk.f32.vlgmr.msra.gmra.mxu0 %vm383_vm10, %v1303_v5 }
0x16ca   :  { %3825 = vmatpush3.msra.mxu0 %v4801_v36  ;;  %3832 = vmatprep.mubr.msk.f32.mxu0 %vm4457_vm1, %v4456_v2 }
0x16cb   :  { %3826 = vmatprep.subr.mxu0 %v4456_v2 }
0x16cc   :  { %3827 = vmatpush3.msra.mxu0 %v4806_v61 }
0x16cd   :  { %3828 = vmatprep.subr.mxu0 %v4456_v2 }
0x16ce   :  { %3829 = vmatpush3.msra.mxu0 %v4813_v0 }
0x16cf   :  { %3830 = vmatprep.subr.mxu0 %v4456_v2 }
0x16d0   :  { %3831 = vmatpush3.msra.mxu0 %v4821_v1 }
0x16d1   :  { %3846 = vmatprep.subr.mxu0 %v4456_v2 }
0x1789   :  { %v3812_v11 = vpop.f32.mrf.mxu0 }
0x178a   :  { %v1391_v12 = vadd.f32 %v3812_v11, %v3544_v10 }
0x178b   :  { %v1385_v14 = vpop.f32.mrf.mxu0 }
0x178c   :  { %1395 = vst [vmem:[#allocation4 + $0x8] sm:$0xff] %v1391_v12  ;;  %v1386_v15 = vadd.f32 %v3544_v10, %v1385_v14 }
0x178e   :  { %1394 = vst [vmem:[#allocation4] sm:$0xff] %v1386_v15 }
0x1793   :  { %v1417_v20 = vld [vmem:[#allocation4 + $0xe] sm:$0x3]  ;;  %v1525_v41 = vld [vmem:[#allocation4 + $0xc] sm:$0x3]  ;;  %v1631_v59 = vld [vmem:[#allocation4 + $0xa] sm:$0x3] }
0x1795   :  { %v1416_v19 = vld [vmem:[#allocation4] sm:$0x3]  ;;  %v1524_v40 = vld [vmem:[#allocation4 + $0x2] sm:$0x3]  ;;  %v1630_v58 = vld [vmem:[#allocation4 + $0x4] sm:$0x3] }
0x1796   :  { %v1418_v21 = vsel %vm4853_vm11, %v1416_v19, %v1417_v20  ;;  %v1526_v42 = vsel %vm4853_vm11, %v1524_v40, %v1525_v41  ;;  %v1632_v60 = vsel %vm4853_vm11, %v1630_v58, %v1631_v59 }
0x1797   :  { %v1488_v22 = vadd.f32 %v1487_v6, %v1418_v21 }
0x1799   :  { %v3547_v23 = vmul.f32 -1.442695, %v1488_v22 }
0x179b   :  { %4112 = vpow2.f32 %v3547_v23 }
0x179c   :  { %4114 = vtanh.f32 %v1488_v22 }
0x17a8   :  { %v4113_v24 = vpop.eup %4112 }
0x17a9   :  { %v1495_v25 = vadd.f32 1.0, %v4113_v24  ;;  %v4115_v28 = vpop.eup %4114  ;;  %v1736_v24 = vld [vmem:[#allocation4 + $0x6] sm:$0x3] }
0x17ab   :  { %4116 = vrcp.f32 %v1495_v25  ;;  %v1737_v25 = vld [vmem:[#allocation4 + $0x8] sm:$0x3] }
0x17b8   :  { %v4117_v29 = vpop.eup %4116 }
0x17b9   :  { %v1498_v30 = vsel %vm4861_vm14, %v4115_v28, %v4117_v29  ;;  %v1738_v28 = vsel %vm4853_vm11, %v1736_v24, %v1737_v25 }
0x17ba   :  { %1501 = vrot.lane.b32.xlu0 %v1498_v30, %s4462_s6  ;;  %v1499_v33 = vmul.f32 0.0, %v1498_v30 }
0x182c   :  { %v1502_v31 = vpop.permute.xlu0 %1501 }
0x182d   :  { %v1504_v32 = vmul.f32 %v1502_v31, %v1498_v30 }
0x182f   :  { %1506 = vrot.lane.b32.xlu1 %v1504_v32, %s4460_s1 }
0x18a1   :  { %v1507_v34 = vpop.permute.xlu1 %1506 }
0x18a2   :  { %v1509_v35 = vadd.f32 %v1507_v34, %v1499_v33 }
0x18a4   :  { %4118 = vtanh.f32 %v1509_v35 }
0x18b1   :  { %v4119_v18 = vpop.eup %4118 }
0x18b2   :  { %1512 = vrot.lane.b32.xlu0 %v4119_v18, %s4462_s6 }
0x1924   :  { %v1513_v37 = vpop.permute.xlu0 %1512 }
0x1925   :  { %v1515_v38 = vmul.f32 %v1513_v37, %v1498_v30 }
0x1927   :  { %1517 = vrot.lane.b32.xlu1 %v1515_v38, %s4460_s1 }
0x1999   :  { %v1518_v39 = vpop.permute.xlu1 %1517 }
0x199a   :  { %1521 = vst.msk [vmem:[#allocation5] sm:$0x3] %vm1520_vm15, %v1518_v39  ;;  %3833 = vmatmul.mubr.msk.f32.vlgmr.msra.gmra.mxu0 %vm197_vm0, %v1518_v39 }
0x199b   :  { %1523 = vst.msk [vmem:[#allocation5 + $0xe] sm:$0x3] %vm1522_vm2, %v1518_v39  ;;  %3847 = vmatpush3.msra.mxu0 %v4801_v36  ;;  %3854 = vmatprep.mubr.msk.f32.mxu0 %vm4457_vm1, %v4456_v2 }
0x199c   :  { %3848 = vmatprep.subr.mxu0 %v4456_v2 }
0x199d   :  { %3849 = vmatpush3.msra.mxu0 %v4806_v61 }
0x199e   :  { %3850 = vmatprep.subr.mxu0 %v4456_v2 }
0x199f   :  { %3851 = vmatpush3.msra.mxu0 %v4813_v0 }
0x19a0   :  { %3852 = vmatprep.subr.mxu0 %v4456_v2 }
0x19a1   :  { %3853 = vmatpush3.msra.mxu0 %v4821_v1 }
0x19a2   :  { %3868 = vmatprep.subr.mxu0 %v4456_v2 }
0x1a5a   :  { %v1595_v43 = vpop.f32.mrf.mxu0 }
0x1a5b   :  { %v1596_v44 = vadd.f32 %v1595_v43, %v1526_v42 }
0x1a5c   :  { %v3834_v45 = vpop.f32.mrf.mxu0 }
0x1a5d   :  { %v3549_v46 = vmul.f32 -1.442695, %v1596_v44 }
0x1a5f   :  { %4120 = vpow2.f32 %v3549_v46 }
0x1a60   :  { %4122 = vtanh.f32 %v1596_v44 }
0x1a6c   :  { %v4121_v47 = vpop.eup %4120 }
0x1a6d   :  { %v1603_v48 = vadd.f32 1.0, %v4121_v47  ;;  %v4123_v49 = vpop.eup %4122  ;;  %v1843_v47 = vld [vmem:[#allocation4 + $0x6] sm:$0x3] }
0x1a6f   :  { %4124 = vrcp.f32 %v1603_v48  ;;  %v1842_v48 = vld [vmem:[#allocation4 + $0x8] sm:$0x3] }
0x1a7c   :  { %v4125_v50 = vpop.eup %4124 }
0x1a7d   :  { %v1606_v8 = vsel %vm4861_vm14, %v4123_v49, %v4125_v50  ;;  %v1844_v49 = vsel %vm4853_vm11, %v1842_v48, %v1843_v47 }
0x1a7e   :  { %1609 = vrot.lane.b32.xlu0 %v1606_v8, %s4462_s6  ;;  %v1607_v53 = vmul.f32 %v1606_v8, %v1509_v35 }
0x1af0   :  { %v1610_v51 = vpop.permute.xlu0 %1609 }
0x1af1   :  { %v1612_v52 = vmul.f32 %v1610_v51, %v1606_v8 }
0x1af3   :  { %1614 = vrot.lane.b32.xlu1 %v1612_v52, %s4460_s1 }
0x1b65   :  { %v1615_v54 = vpop.permute.xlu1 %1614 }
0x1b66   :  { %v1617_v9 = vadd.f32 %v1615_v54, %v1607_v53 }
0x1b68   :  { %4126 = vtanh.f32 %v1617_v9 }
0x1b75   :  { %v4127_v55 = vpop.eup %4126 }
0x1b76   :  { %1620 = vrot.lane.b32.xlu0 %v4127_v55, %s4462_s6 }
0x1be8   :  { %v1621_v27 = vpop.permute.xlu0 %1620 }
0x1be9   :  { %v1623_v56 = vmul.f32 %v1621_v27, %v1606_v8 }
0x1beb   :  { %1625 = vrot.lane.b32.xlu1 %v1623_v56, %s4460_s1 }
0x1c5d   :  { %v1626_v57 = vpop.permute.xlu1 %1625 }
0x1c5e   :  { %1628 = vst.msk [vmem:[#allocation5 + $0x2] sm:$0x3] %vm1520_vm15, %v1626_v57  ;;  %3844 = vmatmul.mubr.msk.f32.vlgmr.msra.gmra.mxu1 %vm197_vm0, %v1626_v57 }
0x1c5f   :  { %1629 = vst.msk [vmem:[#allocation5 + $0xc] sm:$0x3] %vm1522_vm2, %v1626_v57  ;;  %3858 = vmatpush3.msra.mxu1 %v4801_v36  ;;  %3865 = vmatprep.mubr.msk.f32.mxu1 %vm4457_vm1, %v4456_v2 }
0x1c60   :  { %3859 = vmatprep.subr.mxu1 %v4456_v2 }
0x1c61   :  { %3860 = vmatpush3.msra.mxu1 %v4806_v61 }
0x1c62   :  { %3861 = vmatprep.subr.mxu1 %v4456_v2 }
0x1c63   :  { %3862 = vmatpush3.msra.mxu1 %v4813_v0 }
0x1c64   :  { %3863 = vmatprep.subr.mxu1 %v4456_v2 }
0x1c65   :  { %3864 = vmatpush3.msra.mxu1 %v4821_v1 }
0x1c66   :  { %3879 = vmatprep.subr.mxu1 %v4456_v2 }
0x1d1e   :  { %v1701_v62 = vpop.f32.mrf.mxu1 }
0x1d1f   :  { %v1702_v63 = vadd.f32 %v1701_v62, %v1632_v60 }
0x1d20   :  { %v3845_v3 = vpop.f32.mrf.mxu1 }
0x1d21   :  { %v3551_v4 = vmul.f32 -1.442695, %v1702_v63 }
0x1d23   :  { %4128 = vpow2.f32 %v3551_v4 }
0x1d24   :  { %4130 = vtanh.f32 %v1702_v63 }
0x1d30   :  { %v4129_v5 = vpop.eup %4128 }
0x1d31   :  { %v1709_v6 = vadd.f32 1.0, %v4129_v5  ;;  %v4131_v7 = vpop.eup %4130  ;;  %v1949_v5 = vld [vmem:[#allocation4 + $0x4] sm:$0x3] }
0x1d33   :  { %4132 = vrcp.f32 %v1709_v6  ;;  %v1948_v6 = vld [vmem:[#allocation4 + $0xa] sm:$0x3] }
0x1d40   :  { %v4133_v10 = vpop.eup %4132 }
0x1d41   :  { %v1712_v11 = vsel %vm4861_vm14, %v4131_v7, %v4133_v10 }
0x1d42   :  { %1715 = vrot.lane.b32.xlu0 %v1712_v11, %s4462_s6  ;;  %v1713_v15 = vmul.f32 %v1712_v11, %v1617_v9 }
0x1db4   :  { %v1716_v12 = vpop.permute.xlu0 %1715 }
0x1db5   :  { %v1718_v14 = vmul.f32 %v1716_v12, %v1712_v11 }
0x1db7   :  { %1720 = vrot.lane.b32.xlu1 %v1718_v14, %s4460_s1 }
0x1e29   :  { %v1721_v16 = vpop.permute.xlu1 %1720 }
0x1e2a   :  { %v1723_v19 = vadd.f32 %v1721_v16, %v1713_v15 }
0x1e2c   :  { %4134 = vtanh.f32 %v1723_v19 }
0x1e39   :  { %v4135_v20 = vpop.eup %4134 }
0x1e3a   :  { %1726 = vrot.lane.b32.xlu0 %v4135_v20, %s4462_s6 }
0x1eac   :  { %v1727_v21 = vpop.permute.xlu0 %1726 }
0x1ead   :  { %v1729_v22 = vmul.f32 %v1727_v21, %v1712_v11 }
0x1eaf   :  { %1731 = vrot.lane.b32.xlu1 %v1729_v22, %s4460_s1 }
0x1f21   :  { %v1732_v23 = vpop.permute.xlu1 %1731 }
0x1f22   :  { %1734 = vst.msk [vmem:[#allocation5 + $0x4] sm:$0x3] %vm1520_vm15, %v1732_v23  ;;  %3855 = vmatmul.mubr.msk.f32.vlgmr.msra.gmra.mxu0 %vm197_vm0, %v1732_v23 }
0x1f23   :  { %1735 = vst.msk [vmem:[#allocation5 + $0xa] sm:$0x3] %vm1522_vm2, %v1732_v23  ;;  %3869 = vmatpush3.msra.mxu0 %v4801_v36  ;;  %3876 = vmatprep.mubr.msk.f32.mxu0 %vm4457_vm1, %v4456_v2 }
0x1f24   :  { %3870 = vmatprep.subr.mxu0 %v4456_v2 }
0x1f25   :  { %3871 = vmatpush3.msra.mxu0 %v4806_v61 }
0x1f26   :  { %3872 = vmatprep.subr.mxu0 %v4456_v2 }
0x1f27   :  { %3873 = vmatpush3.msra.mxu0 %v4813_v0 }
0x1f28   :  { %3874 = vmatprep.subr.mxu0 %v4456_v2 }
0x1f29   :  { %3875 = vmatpush3.msra.mxu0 %v4821_v1 }
0x1f2a   :  { %3890 = vmatprep.subr.mxu0 %v4456_v2 }
0x1fe2   :  { %v1807_v29 = vpop.f32.mrf.mxu0 }
0x1fe3   :  { %v1808_v30 = vadd.f32 %v1807_v29, %v1738_v28  ;;  %v2055_v29 = vld [vmem:[#allocation4 + $0x2] sm:$0x3] }
0x1fe4   :  { %v3856_v31 = vpop.f32.mrf.mxu0 }
0x1fe5   :  { %v3553_v32 = vmul.f32 -1.442695, %v1808_v30 }
0x1fe7   :  { %4136 = vpow2.f32 %v3553_v32 }
0x1fe8   :  { %4138 = vtanh.f32 %v1808_v30  ;;  %v2054_v30 = vld [vmem:[#allocation4 + $0xc] sm:$0x3] }
0x1fe9   :  { %v2056_v31 = vsel %vm4853_vm11, %v2054_v30, %v2055_v29  ;;  %v3565_v30 = vld [vmem:[%s5252_s12] ss:$0 sm:$0xff] }
0x1ff4   :  { %v4137_v33 = vpop.eup %4136 }
0x1ff5   :  { %v1815_v34 = vadd.f32 1.0, %v4137_v33  ;;  %v4139_v35 = vpop.eup %4138 }
0x1ff7   :  { %4140 = vrcp.f32 %v1815_v34 }
0x2004   :  { %v4141_v18 = vpop.eup %4140 }
0x2005   :  { %v1818_v37 = vsel %vm4861_vm14, %v4139_v35, %v4141_v18 }
0x2006   :  { %1821 = vrot.lane.b32.xlu0 %v1818_v37, %s4462_s6  ;;  %v1819_v40 = vmul.f32 %v1818_v37, %v1723_v19 }
0x2078   :  { %v1822_v38 = vpop.permute.xlu0 %1821 }
0x2079   :  { %v1824_v39 = vmul.f32 %v1822_v38, %v1818_v37 }
0x207b   :  { %1826 = vrot.lane.b32.xlu1 %v1824_v39, %s4460_s1 }
0x20ed   :  { %v1827_v41 = vpop.permute.xlu1 %1826 }
0x20ee   :  { %v1829_v42 = vadd.f32 %v1827_v41, %v1819_v40 }
0x20f0   :  { %4142 = vtanh.f32 %v1829_v42 }
0x20fd   :  { %v4143_v43 = vpop.eup %4142 }
0x20fe   :  { %1832 = vrot.lane.b32.xlu0 %v4143_v43, %s4462_s6 }
0x2170   :  { %v1833_v44 = vpop.permute.xlu0 %1832 }
0x2171   :  { %v1835_v45 = vmul.f32 %v1833_v44, %v1818_v37 }
0x2173   :  { %1837 = vrot.lane.b32.xlu1 %v1835_v45, %s4460_s1 }
0x21e5   :  { %v1838_v46 = vpop.permute.xlu1 %1837 }
0x21e6   :  { %1840 = vst.msk [vmem:[#allocation5 + $0x6] sm:$0x3] %vm1520_vm15, %v1838_v46  ;;  %3866 = vmatmul.mubr.msk.f32.vlgmr.msra.gmra.mxu1 %vm197_vm0, %v1838_v46 }
0x21e7   :  { %1841 = vst.msk [vmem:[#allocation5 + $0x8] sm:$0x3] %vm1522_vm2, %v1838_v46  ;;  %3880 = vmatpush3.msra.mxu1 %v4801_v36  ;;  %3887 = vmatprep.mubr.msk.f32.mxu1 %vm4457_vm1, %v4456_v2 }
0x21e8   :  { %3881 = vmatprep.subr.mxu1 %v4456_v2 }
0x21e9   :  { %3882 = vmatpush3.msra.mxu1 %v4806_v61 }
0x21ea   :  { %3883 = vmatprep.subr.mxu1 %v4456_v2 }
0x21eb   :  { %3884 = vmatpush3.msra.mxu1 %v4813_v0 }
0x21ec   :  { %3885 = vmatprep.subr.mxu1 %v4456_v2 }
0x21ed   :  { %3886 = vmatpush3.msra.mxu1 %v4821_v1 }
0x22a6   :  { %v1913_v50 = vpop.f32.mrf.mxu1 }
0x22a7   :  { %v1914_v8 = vadd.f32 %v1913_v50, %v1844_v49  ;;  %v2161_v50 = vld [vmem:[#allocation4] sm:$0x3] }
0x22a8   :  { %v3867_v51 = vpop.f32.mrf.mxu1 }
0x22a9   :  { %v3555_v52 = vmul.f32 -1.442695, %v1914_v8 }
0x22ab   :  { %4144 = vpow2.f32 %v3555_v52 }
0x22ac   :  { %4146 = vtanh.f32 %v1914_v8  ;;  %v2160_v8 = vld [vmem:[#allocation4 + $0xe] sm:$0x3] }
0x22ad   :  { %v2162_v51 = vsel %vm4853_vm11, %v2160_v8, %v2161_v50 }
0x22b8   :  { %v4145_v53 = vpop.eup %4144 }
0x22b9   :  { %v1921_v54 = vadd.f32 1.0, %v4145_v53  ;;  %v4147_v9 = vpop.eup %4146 }
0x22bb   :  { %4148 = vrcp.f32 %v1921_v54 }
0x22c8   :  { %v4149_v55 = vpop.eup %4148 }
0x22c9   :  { %v1924_v27 = vsel %vm4861_vm14, %v4147_v9, %v4149_v55 }
0x22ca   :  { %1927 = vrot.lane.b32.xlu0 %v1924_v27, %s4462_s6  ;;  %v1925_v58 = vmul.f32 %v1924_v27, %v1829_v42 }
0x233c   :  { %v1928_v56 = vpop.permute.xlu0 %1927 }
0x233d   :  { %v1930_v57 = vmul.f32 %v1928_v56, %v1924_v27 }
0x233f   :  { %1932 = vrot.lane.b32.xlu1 %v1930_v57, %s4460_s1 }
0x23b1   :  { %v1933_v59 = vpop.permute.xlu1 %1932 }
0x23b2   :  { %v1935_v60 = vadd.f32 %v1933_v59, %v1925_v58 }
0x23b4   :  { %4150 = vtanh.f32 %v1935_v60 }
0x23c1   :  { %v4151_v62 = vpop.eup %4150 }
0x23c2   :  { %1938 = vrot.lane.b32.xlu0 %v4151_v62, %s4462_s6 }
0x2434   :  { %v1939_v63 = vpop.permute.xlu0 %1938 }
0x2435   :  { %v1941_v3 = vmul.f32 %v1939_v63, %v1924_v27 }
0x2437   :  { %1943 = vrot.lane.b32.xlu1 %v1941_v3, %s4460_s1 }
0x24a9   :  { %v1944_v4 = vpop.permute.xlu1 %1943 }
0x24aa   :  { %1946 = vst.msk [vmem:[#allocation5 + $0x8] sm:$0x3] %vm1520_vm15, %v1944_v4  ;;  %3877 = vmatmul.mubr.msk.f32.vlgmr.msra.gmra.mxu0 %vm197_vm0, %v1944_v4 }
0x24ab   :  { %1947 = vst.msk [vmem:[#allocation5 + $0x6] sm:$0x3] %vm1522_vm2, %v1944_v4  ;;  %3891 = vmatpush3.msra.mxu0 %v4801_v36  ;;  %3898 = vmatprep.mubr.msk.f32.mxu0 %vm4457_vm1, %v4456_v2  ;;  %v1950_v36 = vsel %vm4853_vm11, %v1948_v6, %v1949_v5  ;;  %v2271_v5 = vld [vmem:[%s5248_s8 + $0x18] sm:$0xff]  ;;  %v2270_v6 = vld [vmem:[%s5248_s8 + $0x10] sm:$0xff] }
0x24ac   :  { %3892 = vmatprep.subr.mxu0 %v4456_v2  ;;  %3901 = vmatprep.subr.mxu1 %v2271_v5 }
0x24ad   :  { %3893 = vmatpush3.msra.mxu0 %v4806_v61 }
0x24ae   :  { %3894 = vmatprep.subr.mxu0 %v4456_v2 }
0x24af   :  { %3895 = vmatpush3.msra.mxu0 %v4813_v0 }
0x24b0   :  { %3896 = vmatprep.subr.mxu0 %v4456_v2 }
0x24b1   :  { %3897 = vmatpush3.msra.mxu0 %v4821_v1 }
0x256a   :  { %v2019_v7 = vpop.f32.mrf.mxu0 }
0x256b   :  { %v2020_v10 = vadd.f32 %v2019_v7, %v1950_v36  ;;  %v2269_v36 = vld [vmem:[%s5248_s8 + $0x8] sm:$0xff]  ;;  %v2268_v7 = vld [vmem:[%s5248_s8] sm:$0xff] }
0x256c   :  { %v3878_v11 = vpop.f32.mrf.mxu0 }
0x256d   :  { %v3557_v12 = vmul.f32 -1.442695, %v2020_v10 }
0x256f   :  { %4152 = vpow2.f32 %v3557_v12 }
0x2570   :  { %4154 = vtanh.f32 %v2020_v10 }
0x257c   :  { %v4153_v14 = vpop.eup %4152 }
0x257d   :  { %v2027_v61 = vadd.f32 1.0, %v4153_v14  ;;  %v4155_v15 = vpop.eup %4154 }
0x257f   :  { %4156 = vrcp.f32 %v2027_v61 }
0x258c   :  { %v4157_v0 = vpop.eup %4156 }
0x258d   :  { %v2030_v16 = vsel %vm4861_vm14, %v4155_v15, %v4157_v0  ;;  %v2363_v15 = vld [vmem:[#allocation21 + $0x8] sm:$0xff]  ;;  %v2362_v0 = vld [vmem:[#allocation21] sm:$0xff] }
0x258e   :  { %2033 = vrot.lane.b32.xlu0 %v2030_v16, %s4462_s6  ;;  %v2031_v20 = vmul.f32 %v2030_v16, %v1935_v60  ;;  %3912 = vmatprep.subr.mxu0 %v2363_v15 }
0x2600   :  { %v2034_v1 = vpop.permute.xlu0 %2033 }
0x2601   :  { %v2036_v19 = vmul.f32 %v2034_v1, %v2030_v16  ;;  %v5025_v1 = vld [vmem:[%s5251_s11 + $0x10] sm:$0xff] }
0x2603   :  { %2038 = vrot.lane.b32.xlu1 %v2036_v19, %s4460_s1  ;;  %v5032_v19 = vld [vmem:[%s5251_s11 + $0x8] sm:$0xff] }
0x2675   :  { %v2039_v21 = vpop.permute.xlu1 %2038 }
0x2676   :  { %v2041_v22 = vadd.f32 %v2039_v21, %v2031_v20  ;;  %v5039_v20 = vld [vmem:[%s5251_s11] sm:$0xff]  ;;  %v3562_v21 = vld [vmem:[#allocation19] ss:$0 sm:$0xff] }
0x2678   :  { %4158 = vtanh.f32 %v2041_v22 }
0x2685   :  { %v4159_v23 = vpop.eup %4158 }
0x2686   :  { %2044 = vrot.lane.b32.xlu0 %v4159_v23, %s4462_s6 }
0x26f8   :  { %v2045_v24 = vpop.permute.xlu0 %2044 }
0x26f9   :  { %v2047_v25 = vmul.f32 %v2045_v24, %v2030_v16  ;;  %v5018_v16 = vld [vmem:[%s5251_s11 + $0x18] sm:$0xff] }
0x26fb   :  { %2049 = vrot.lane.b32.xlu1 %v2047_v25, %s4460_s1 }
0x276d   :  { %v2050_v28 = vpop.permute.xlu1 %2049 }
0x276e   :  { %2052 = vst.msk [vmem:[#allocation5 + $0xa] sm:$0x3] %vm1520_vm15, %v2050_v28  ;;  %3888 = vmatmul.mubr.msk.f32.vlgmr.msra.gmra.mxu1 %vm197_vm0, %v2050_v28 }
0x276f   :  { %2053 = vst.msk [vmem:[#allocation5 + $0x4] sm:$0x3] %vm1522_vm2, %v2050_v28  ;;  %3902 = vmatpush3.msra.mxu1 %v2271_v5 }
0x2770   :  { %3903 = vmatprep.subr.mxu1 %v2270_v6 }
0x2771   :  { %3904 = vmatpush3.msra.mxu1 %v2270_v6 }
0x2772   :  { %3905 = vmatprep.subr.mxu1 %v2269_v36 }
0x2773   :  { %3906 = vmatpush3.msra.mxu1 %v2269_v36 }
0x2774   :  { %3907 = vmatprep.subr.mxu1 %v2268_v7 }
0x2775   :  { %3908 = vmatpush3.msra.mxu1 %v2268_v7 }
0x2776   :  { %3930 = vmatprep.subr.mxu1 %v4456_v2 }
0x282e   :  { %v2125_v32 = vpop.f32.mrf.mxu1 }
0x282f   :  { %v2126_v33 = vadd.f32 %v2125_v32, %v2056_v31 }
0x2830   :  { %v3889_v34 = vpop.f32.mrf.mxu1 }
0x2831   :  { %v3559_v35 = vmul.f32 -1.442695, %v2126_v33 }
0x2833   :  { %4160 = vpow2.f32 %v3559_v35 }
0x2834   :  { %4162 = vtanh.f32 %v2126_v33 }
0x2840   :  { %v4161_v18 = vpop.eup %4160 }
0x2841   :  { %v2133_v37 = vadd.f32 1.0, %v4161_v18  ;;  %v4163_v38 = vpop.eup %4162 }
0x2843   :  { %4164 = vrcp.f32 %v2133_v37 }
0x2850   :  { %v4165_v39 = vpop.eup %4164 }
0x2851   :  { %v2136_v40 = vsel %vm4861_vm14, %v4163_v38, %v4165_v39 }
0x2852   :  { %2139 = vrot.lane.b32.xlu0 %v2136_v40, %s4462_s6  ;;  %v2137_v43 = vmul.f32 %v2136_v40, %v2041_v22 }
0x28c4   :  { %v2140_v41 = vpop.permute.xlu0 %2139 }
0x28c5   :  { %v2142_v42 = vmul.f32 %v2140_v41, %v2136_v40 }
0x28c7   :  { %2144 = vrot.lane.b32.xlu1 %v2142_v42, %s4460_s1 }
0x2939   :  { %v2145_v44 = vpop.permute.xlu1 %2144 }
0x293a   :  { %v2147_v45 = vadd.f32 %v2145_v44, %v2137_v43 }
0x293c   :  { %4166 = vtanh.f32 %v2147_v45 }
0x2949   :  { %v4167_v46 = vpop.eup %4166 }
0x294a   :  { %2150 = vrot.lane.b32.xlu0 %v4167_v46, %s4462_s6 }
0x29bc   :  { %v2151_v47 = vpop.permute.xlu0 %2150 }
0x29bd   :  { %v2153_v48 = vmul.f32 %v2151_v47, %v2136_v40 }
0x29bf   :  { %2155 = vrot.lane.b32.xlu1 %v2153_v48, %s4460_s1 }
0x2a31   :  { %v2156_v49 = vpop.permute.xlu1 %2155 }
0x2a32   :  { %2158 = vst.msk [vmem:[#allocation5 + $0xc] sm:$0x3] %vm1520_vm15, %v2156_v49  ;;  %3899 = vmatmul.mubr.msk.f32.vlgmr.msra.gmra.mxu0 %vm197_vm0, %v2156_v49 }
0x2a33   :  { %2159 = vst.msk [vmem:[#allocation5 + $0x2] sm:$0x3] %vm1522_vm2, %v2156_v49  ;;  %3913 = vmatpush3.msra.mxu0 %v2363_v15 }
0x2a34   :  { %3914 = vmatprep.subr.mxu0 %v2362_v0 }
0x2a35   :  { %3915 = vmatpush3.msra.mxu0 %v2362_v0 }
0x2a36   :  { %3919 = vmatprep.subr.mxu0 %v4456_v2 }
0x2af2   :  { %v2231_v52 = vpop.f32.mrf.mxu0 }
0x2af3   :  { %v2232_v53 = vadd.f32 %v2231_v52, %v2162_v51 }
0x2af4   :  { %v3900_v54 = vpop.f32.mrf.mxu0 }
0x2af5   :  { %v3561_v9 = vmul.f32 -1.442695, %v2232_v53 }
0x2af7   :  { %4168 = vpow2.f32 %v3561_v9 }
0x2af8   :  { %4170 = vtanh.f32 %v2232_v53 }
0x2b04   :  { %v4169_v55 = vpop.eup %4168 }
0x2b05   :  { %v2239_v27 = vadd.f32 1.0, %v4169_v55  ;;  %v4171_v56 = vpop.eup %4170 }
0x2b07   :  { %4172 = vrcp.f32 %v2239_v27 }
0x2b14   :  { %v4173_v57 = vpop.eup %4172 }
0x2b15   :  { %v2242_v58 = vsel %vm4861_vm14, %v4171_v56, %v4173_v57 }
0x2b16   :  { %2245 = vrot.lane.b32.xlu0 %v2242_v58, %s4462_s6  ;;  %v2243_v62 = vmul.f32 %v2242_v58, %v2147_v45 }
0x2b88   :  { %v2246_v59 = vpop.permute.xlu0 %2245 }
0x2b89   :  { %v2248_v60 = vmul.f32 %v2246_v59, %v2242_v58 }
0x2b8b   :  { %2250 = vrot.lane.b32.xlu1 %v2248_v60, %s4460_s1 }
0x2bfd   :  { %v2251_v63 = vpop.permute.xlu1 %2250 }
0x2bfe   :  { %v2253_v3 = vadd.f32 %v2251_v63, %v2243_v62 }
0x2c00   :  { %4174 = vtanh.f32 %v2253_v3 }
0x2c0d   :  { %v4175_v4 = vpop.eup %4174 }
0x2c0e   :  { %2256 = vrot.lane.b32.xlu0 %v4175_v4, %s4462_s6 }
0x2c80   :  { %v2257_v10 = vpop.permute.xlu0 %2256 }
0x2c81   :  { %v2259_v11 = vmul.f32 %v2257_v10, %v2242_v58 }
0x2c83   :  { %2261 = vrot.lane.b32.xlu1 %v2259_v11, %s4460_s1 }
0x2cf5   :  { %v2262_v12 = vpop.permute.xlu1 %2261 }
0x2cf6   :  { %2264 = vst.msk [vmem:[#allocation5 + $0xe] sm:$0x3] %vm1520_vm15, %v2262_v12 }
0x2cf7   :  { %2265 = vst.msk [vmem:[#allocation5] sm:$0x3] %vm1522_vm2, %v2262_v12 }
0x2cfd   :  { %v2267_v61 = vld [vmem:[#allocation5 + $0x8] sm:$0xff] }
0x2cfe   :  { %v2266_v14 = vld [vmem:[#allocation5] sm:$0xff] }
0x2cff   :  { %3909 = vmatprep.mubr.msk.f32.mxu1 %vm197_vm0, %v2266_v14 }
0x2d00   :  { %3910 = vmatmul.mubr.msk.f32.vlgmr.msra.gmra.mxu1 %vm197_vm0, %v2267_v61 }
0x2d01   :  { %3938 = vmatprep.mubr.msk.f32.mxu1 %vm4457_vm1, %v4456_v2  ;;  %3931 = vmatpush3.msra.mxu1 %v5018_v16 }
0x2d02   :  { %3932 = vmatprep.subr.mxu1 %v4456_v2 }
0x2d03   :  { %3933 = vmatpush3.msra.mxu1 %v5025_v1 }
0x2d04   :  { %3934 = vmatprep.subr.mxu1 %v4456_v2 }
0x2d05   :  { %3935 = vmatpush3.msra.mxu1 %v5032_v19 }
0x2d06   :  { %3936 = vmatprep.subr.mxu1 %v4456_v2 }
0x2d07   :  { %3937 = vmatpush3.msra.mxu1 %v5039_v20 }
0x2d08   :  { %3952 = vmatprep.subr.mxu1 %v4456_v2 }
0x2dc0   :  { %v3911_v22 = vpop.f32.mrf.mxu1 }
0x2dc1   :  { %v2357_v23 = vadd.f32 %v3911_v22, %v3562_v21 }
0x2dc2   :  { %v2351_v24 = vpop.f32.mrf.mxu1 }
0x2dc3   :  { %v2352_v25 = vadd.f32 %v3562_v21, %v2351_v24  ;;  %v2361_v29 = vmax.f32 %v2357_v23, 0.0 }
0x2dc5   :  { %v2360_v28 = vmax.f32 %v2352_v25, 0.0 }
0x2dc7   :  { %3916 = vmatprep.mubr.msk.f32.mxu0 %vm383_vm10, %v2360_v28 }
0x2dc8   :  { %3917 = vmatmul.mubr.msk.f32.vlgmr.msra.gmra.mxu0 %vm383_vm10, %v2361_v29 }
0x2dc9   :  { %3920 = vmatpush3.msra.mxu0 %v5018_v16  ;;  %3927 = vmatprep.mubr.msk.f32.mxu0 %vm4457_vm1, %v4456_v2 }
0x2dca   :  { %3921 = vmatprep.subr.mxu0 %v4456_v2 }
0x2dcb   :  { %3922 = vmatpush3.msra.mxu0 %v5025_v1 }
0x2dcc   :  { %3923 = vmatprep.subr.mxu0 %v4456_v2 }
0x2dcd   :  { %3924 = vmatpush3.msra.mxu0 %v5032_v19 }
0x2dce   :  { %3925 = vmatprep.subr.mxu0 %v4456_v2 }
0x2dcf   :  { %3926 = vmatpush3.msra.mxu0 %v5039_v20 }
0x2dd0   :  { %3928 = vmatmul.mubr.f32.vlgmr.msra.gmra.mxu0 %v4456_v2  ;;  %3941 = vmatprep.subr.mxu0 %v4456_v2 }
0x2dd1   :  { %3942 = vmatpush3.msra.mxu0 %v5018_v16  ;;  %3949 = vmatprep.mubr.msk.f32.mxu0 %vm4457_vm1, %v4456_v2 }
0x2dd2   :  { %3943 = vmatprep.subr.mxu0 %v4456_v2 }
0x2dd3   :  { %3944 = vmatpush3.msra.mxu0 %v5025_v1 }
0x2dd4   :  { %3945 = vmatprep.subr.mxu0 %v4456_v2 }
0x2dd5   :  { %3946 = vmatpush3.msra.mxu0 %v5032_v19 }
0x2dd6   :  { %3947 = vmatprep.subr.mxu0 %v4456_v2 }
0x2dd7   :  { %3948 = vmatpush3.msra.mxu0 %v5039_v20 }
0x2dd8   :  { %3963 = vmatprep.subr.mxu0 %v4456_v2 }
0x2e88   :  { %v3918_v31 = vpop.f32.mrf.mxu0 }
0x2e89   :  { %v2449_v32 = vadd.f32 %v3918_v31, %v3565_v30 }
0x2e8a   :  { %v2443_v33 = vpop.f32.mrf.mxu0 }
0x2e8b   :  { %2453 = vst [vmem:[#allocation6 + $0x8] sm:$0xff] %v2449_v32  ;;  %v2444_v34 = vadd.f32 %v3565_v30, %v2443_v33 }
0x2e8d   :  { %2452 = vst [vmem:[#allocation6] sm:$0xff] %v2444_v34 }
0x2e90   :  { %v2527_v35 = vpop.f32.mrf.mxu0 }
0x2e92   :  { %v3929_v18 = vpop.f32.mrf.mxu0  ;;  %v2459_v38 = vld [vmem:[#allocation6 + $0xe] sm:$0x3]  ;;  %v2563_v55 = vld [vmem:[#allocation6 + $0xc] sm:$0x3]  ;;  %v2669_v0 = vld [vmem:[#allocation6 + $0xa] sm:$0x3] }
0x2e94   :  { %v2458_v37 = vld [vmem:[#allocation6] sm:$0x3]  ;;  %v2562_v9 = vld [vmem:[#allocation6 + $0x2] sm:$0x3]  ;;  %v2668_v15 = vld [vmem:[#allocation6 + $0x4] sm:$0x3] }
0x2e95   :  { %v2460_v39 = vsel %vm4853_vm11, %v2458_v37, %v2459_v38  ;;  %v2564_v27 = vsel %vm4853_vm11, %v2562_v9, %v2563_v55  ;;  %v2670_v21 = vsel %vm4853_vm11, %v2668_v15, %v2669_v0 }
0x2e96   :  { %v2528_v40 = vadd.f32 %v2527_v35, %v2460_v39 }
0x2e98   :  { %v3568_v41 = vmul.f32 -1.442695, %v2528_v40 }
0x2e9a   :  { %4176 = vpow2.f32 %v3568_v41 }
0x2e9b   :  { %4178 = vtanh.f32 %v2528_v40 }
0x2ea7   :  { %v4177_v42 = vpop.eup %4176 }
0x2ea8   :  { %v2535_v43 = vadd.f32 1.0, %v4177_v42  ;;  %v4179_v44 = vpop.eup %4178  ;;  %v2774_v42 = vld [vmem:[#allocation6 + $0x6] sm:$0x3] }
0x2eaa   :  { %4180 = vrcp.f32 %v2535_v43  ;;  %v2775_v43 = vld [vmem:[#allocation6 + $0x8] sm:$0x3] }
0x2eb7   :  { %v4181_v45 = vpop.eup %4180 }
0x2eb8   :  { %v2538_v46 = vsel %vm4861_vm14, %v4179_v44, %v4181_v45  ;;  %v2776_v44 = vsel %vm4853_vm11, %v2774_v42, %v2775_v43 }
0x2eb9   :  { %2541 = vrot.lane.b32.xlu0 %v2538_v46, %s4462_s6  ;;  %v2539_v49 = vmul.f32 0.0, %v2538_v46 }
0x2f2b   :  { %v2542_v47 = vpop.permute.xlu0 %2541 }
0x2f2c   :  { %v2544_v48 = vmul.f32 %v2542_v47, %v2538_v46 }
0x2f2e   :  { %2546 = vrot.lane.b32.xlu1 %v2544_v48, %s4460_s1 }
0x2fa0   :  { %v2547_v50 = vpop.permute.xlu1 %2546 }
0x2fa1   :  { %v2549_v8 = vadd.f32 %v2547_v50, %v2539_v49 }
0x2fa3   :  { %4182 = vtanh.f32 %v2549_v8 }
0x2fb0   :  { %v4183_v51 = vpop.eup %4182 }
0x2fb1   :  { %2552 = vrot.lane.b32.xlu0 %v4183_v51, %s4462_s6 }
0x3023   :  { %v2553_v52 = vpop.permute.xlu0 %2552 }
0x3024   :  { %v2555_v53 = vmul.f32 %v2553_v52, %v2538_v46 }
0x3026   :  { %2557 = vrot.lane.b32.xlu1 %v2555_v53, %s4460_s1 }
0x3098   :  { %v2558_v54 = vpop.permute.xlu1 %2557 }
0x3099   :  { %2560 = vst.msk [vmem:[#allocation7] sm:$0x3] %vm1520_vm15, %v2558_v54  ;;  %3939 = vmatmul.mubr.msk.f32.vlgmr.msra.gmra.mxu1 %vm197_vm0, %v2558_v54 }
0x309a   :  { %2561 = vst.msk [vmem:[#allocation7 + $0xe] sm:$0x3] %vm1522_vm2, %v2558_v54  ;;  %3953 = vmatpush3.msra.mxu1 %v5018_v16  ;;  %3960 = vmatprep.mubr.msk.f32.mxu1 %vm4457_vm1, %v4456_v2 }
0x309b   :  { %3954 = vmatprep.subr.mxu1 %v4456_v2 }
0x309c   :  { %3955 = vmatpush3.msra.mxu1 %v5025_v1 }
0x309d   :  { %3956 = vmatprep.subr.mxu1 %v4456_v2 }
0x309e   :  { %3957 = vmatpush3.msra.mxu1 %v5032_v19 }
0x309f   :  { %3958 = vmatprep.subr.mxu1 %v4456_v2 }
0x30a0   :  { %3959 = vmatpush3.msra.mxu1 %v5039_v20 }
0x30a1   :  { %3974 = vmatprep.subr.mxu1 %v4456_v2 }
0x3159   :  { %v2633_v56 = vpop.f32.mrf.mxu1 }
0x315a   :  { %v2634_v57 = vadd.f32 %v2633_v56, %v2564_v27 }
0x315b   :  { %v3940_v58 = vpop.f32.mrf.mxu1 }
0x315c   :  { %v3570_v59 = vmul.f32 -1.442695, %v2634_v57 }
0x315e   :  { %4184 = vpow2.f32 %v3570_v59 }
0x315f   :  { %4186 = vtanh.f32 %v2634_v57 }
0x316b   :  { %v4185_v60 = vpop.eup %4184 }
0x316c   :  { %v2641_v62 = vadd.f32 1.0, %v4185_v60  ;;  %v4187_v63 = vpop.eup %4186  ;;  %v2881_v60 = vld [vmem:[#allocation6 + $0x6] sm:$0x3] }
0x316e   :  { %4188 = vrcp.f32 %v2641_v62  ;;  %v2880_v62 = vld [vmem:[#allocation6 + $0x8] sm:$0x3] }
0x317b   :  { %v4189_v3 = vpop.eup %4188 }
0x317c   :  { %v2644_v4 = vsel %vm4861_vm14, %v4187_v63, %v4189_v3  ;;  %v2882_v63 = vsel %vm4853_vm11, %v2880_v62, %v2881_v60 }
0x317d   :  { %2647 = vrot.lane.b32.xlu0 %v2644_v4, %s4462_s6  ;;  %v2645_v36 = vmul.f32 %v2644_v4, %v2549_v8 }
0x31ef   :  { %v2648_v5 = vpop.permute.xlu0 %2647 }
0x31f0   :  { %v2650_v6 = vmul.f32 %v2648_v5, %v2644_v4 }
0x31f2   :  { %2652 = vrot.lane.b32.xlu1 %v2650_v6, %s4460_s1 }
0x3264   :  { %v2653_v7 = vpop.permute.xlu1 %2652 }
0x3265   :  { %v2655_v10 = vadd.f32 %v2653_v7, %v2645_v36 }
0x3267   :  { %4190 = vtanh.f32 %v2655_v10 }
0x3274   :  { %v4191_v11 = vpop.eup %4190 }
0x3275   :  { %2658 = vrot.lane.b32.xlu0 %v4191_v11, %s4462_s6 }
0x32e7   :  { %v2659_v12 = vpop.permute.xlu0 %2658 }
0x32e8   :  { %v2661_v14 = vmul.f32 %v2659_v12, %v2644_v4 }
0x32ea   :  { %2663 = vrot.lane.b32.xlu1 %v2661_v14, %s4460_s1 }
0x335c   :  { %v2664_v61 = vpop.permute.xlu1 %2663 }
0x335d   :  { %2666 = vst.msk [vmem:[#allocation7 + $0x2] sm:$0x3] %vm1520_vm15, %v2664_v61  ;;  %3950 = vmatmul.mubr.msk.f32.vlgmr.msra.gmra.mxu0 %vm197_vm0, %v2664_v61 }
0x335e   :  { %2667 = vst.msk [vmem:[#allocation7 + $0xc] sm:$0x3] %vm1522_vm2, %v2664_v61  ;;  %3964 = vmatpush3.msra.mxu0 %v5018_v16  ;;  %3971 = vmatprep.mubr.msk.f32.mxu0 %vm4457_vm1, %v4456_v2 }
0x335f   :  { %3965 = vmatprep.subr.mxu0 %v4456_v2 }
0x3360   :  { %3966 = vmatpush3.msra.mxu0 %v5025_v1 }
0x3361   :  { %3967 = vmatprep.subr.mxu0 %v4456_v2 }
0x3362   :  { %3968 = vmatpush3.msra.mxu0 %v5032_v19 }
0x3363   :  { %3969 = vmatprep.subr.mxu0 %v4456_v2 }
0x3364   :  { %3970 = vmatpush3.msra.mxu0 %v5039_v20 }
0x3365   :  { %3985 = vmatprep.subr.mxu0 %v4456_v2 }
0x341d   :  { %v2739_v22 = vpop.f32.mrf.mxu0 }
0x341e   :  { %v2740_v23 = vadd.f32 %v2739_v22, %v2670_v21 }
0x341f   :  { %v3951_v24 = vpop.f32.mrf.mxu0 }
0x3420   :  { %v3572_v25 = vmul.f32 -1.442695, %v2740_v23 }
0x3422   :  { %4192 = vpow2.f32 %v3572_v25 }
0x3423   :  { %4194 = vtanh.f32 %v2740_v23 }
0x342f   :  { %v4193_v28 = vpop.eup %4192 }
0x3430   :  { %v2747_v29 = vadd.f32 1.0, %v4193_v28  ;;  %v4195_v30 = vpop.eup %4194  ;;  %v2987_v28 = vld [vmem:[#allocation6 + $0x4] sm:$0x3] }
0x3432   :  { %4196 = vrcp.f32 %v2747_v29  ;;  %v2986_v29 = vld [vmem:[#allocation6 + $0xa] sm:$0x3] }
0x343f   :  { %v4197_v31 = vpop.eup %4196 }
0x3440   :  { %v2750_v32 = vsel %vm4861_vm14, %v4195_v30, %v4197_v31 }
0x3441   :  { %2753 = vrot.lane.b32.xlu0 %v2750_v32, %s4462_s6  ;;  %v2751_v35 = vmul.f32 %v2750_v32, %v2655_v10 }
0x34b3   :  { %v2754_v33 = vpop.permute.xlu0 %2753 }
0x34b4   :  { %v2756_v34 = vmul.f32 %v2754_v33, %v2750_v32 }
0x34b6   :  { %2758 = vrot.lane.b32.xlu1 %v2756_v34, %s4460_s1 }
0x3528   :  { %v2759_v18 = vpop.permute.xlu1 %2758 }
0x3529   :  { %v2761_v37 = vadd.f32 %v2759_v18, %v2751_v35 }
0x352b   :  { %4198 = vtanh.f32 %v2761_v37 }
0x3538   :  { %v4199_v38 = vpop.eup %4198 }
0x3539   :  { %2764 = vrot.lane.b32.xlu0 %v4199_v38, %s4462_s6 }
0x35ab   :  { %v2765_v39 = vpop.permute.xlu0 %2764 }
0x35ac   :  { %v2767_v40 = vmul.f32 %v2765_v39, %v2750_v32 }
0x35ae   :  { %2769 = vrot.lane.b32.xlu1 %v2767_v40, %s4460_s1 }
0x3620   :  { %v2770_v41 = vpop.permute.xlu1 %2769 }
0x3621   :  { %2772 = vst.msk [vmem:[#allocation7 + $0x4] sm:$0x3] %vm1520_vm15, %v2770_v41  ;;  %3961 = vmatmul.mubr.msk.f32.vlgmr.msra.gmra.mxu1 %vm197_vm0, %v2770_v41 }
0x3622   :  { %2773 = vst.msk [vmem:[#allocation7 + $0xa] sm:$0x3] %vm1522_vm2, %v2770_v41  ;;  %3975 = vmatpush3.msra.mxu1 %v5018_v16  ;;  %3982 = vmatprep.mubr.msk.f32.mxu1 %vm4457_vm1, %v4456_v2 }
0x3623   :  { %3976 = vmatprep.subr.mxu1 %v4456_v2 }
0x3624   :  { %3977 = vmatpush3.msra.mxu1 %v5025_v1 }
0x3625   :  { %3978 = vmatprep.subr.mxu1 %v4456_v2 }
0x3626   :  { %3979 = vmatpush3.msra.mxu1 %v5032_v19 }
0x3627   :  { %3980 = vmatprep.subr.mxu1 %v4456_v2 }
0x3628   :  { %3981 = vmatpush3.msra.mxu1 %v5039_v20 }
0x3629   :  { %3996 = vmatprep.subr.mxu1 %v4456_v2 }
0x36e1   :  { %v2845_v45 = vpop.f32.mrf.mxu1 }
0x36e2   :  { %v2846_v46 = vadd.f32 %v2845_v45, %v2776_v44  ;;  %v3093_v45 = vld [vmem:[#allocation6 + $0x2] sm:$0x3] }
0x36e3   :  { %v3962_v47 = vpop.f32.mrf.mxu1 }
0x36e4   :  { %v3574_v48 = vmul.f32 -1.442695, %v2846_v46 }
0x36e6   :  { %4200 = vpow2.f32 %v3574_v48 }
0x36e7   :  { %4202 = vtanh.f32 %v2846_v46  ;;  %v3092_v46 = vld [vmem:[#allocation6 + $0xc] sm:$0x3] }
0x36e8   :  { %v3094_v47 = vsel %vm4853_vm11, %v3092_v46, %v3093_v45 }
0x36f3   :  { %v4201_v49 = vpop.eup %4200 }
0x36f4   :  { %v2853_v50 = vadd.f32 1.0, %v4201_v49  ;;  %v4203_v8 = vpop.eup %4202 }
0x36f6   :  { %4204 = vrcp.f32 %v2853_v50 }
0x3703   :  { %v4205_v51 = vpop.eup %4204 }
0x3704   :  { %v2856_v52 = vsel %vm4861_vm14, %v4203_v8, %v4205_v51 }
0x3705   :  { %2859 = vrot.lane.b32.xlu0 %v2856_v52, %s4462_s6  ;;  %v2857_v9 = vmul.f32 %v2856_v52, %v2761_v37 }
0x3777   :  { %v2860_v53 = vpop.permute.xlu0 %2859 }
0x3778   :  { %v2862_v54 = vmul.f32 %v2860_v53, %v2856_v52 }
0x377a   :  { %2864 = vrot.lane.b32.xlu1 %v2862_v54, %s4460_s1 }
0x37ec   :  { %v2865_v55 = vpop.permute.xlu1 %2864 }
0x37ed   :  { %v2867_v27 = vadd.f32 %v2865_v55, %v2857_v9 }
0x37ef   :  { %4206 = vtanh.f32 %v2867_v27 }
0x37fc   :  { %v4207_v56 = vpop.eup %4206 }
0x37fd   :  { %2870 = vrot.lane.b32.xlu0 %v4207_v56, %s4462_s6 }
0x386f   :  { %v2871_v57 = vpop.permute.xlu0 %2870 }
0x3870   :  { %v2873_v58 = vmul.f32 %v2871_v57, %v2856_v52 }
0x3872   :  { %2875 = vrot.lane.b32.xlu1 %v2873_v58, %s4460_s1 }
0x38e4   :  { %v2876_v59 = vpop.permute.xlu1 %2875 }
0x38e5   :  { %2878 = vst.msk [vmem:[#allocation7 + $0x6] sm:$0x3] %vm1520_vm15, %v2876_v59  ;;  %3972 = vmatmul.mubr.msk.f32.vlgmr.msra.gmra.mxu0 %vm197_vm0, %v2876_v59 }
0x38e6   :  { %2879 = vst.msk [vmem:[#allocation7 + $0x8] sm:$0x3] %vm1522_vm2, %v2876_v59  ;;  %3986 = vmatpush3.msra.mxu0 %v5018_v16  ;;  %3993 = vmatprep.mubr.msk.f32.mxu0 %vm4457_vm1, %v4456_v2 }
0x38e7   :  { %3987 = vmatprep.subr.mxu0 %v4456_v2 }
0x38e8   :  { %3988 = vmatpush3.msra.mxu0 %v5025_v1 }
0x38e9   :  { %3989 = vmatprep.subr.mxu0 %v4456_v2 }
0x38ea   :  { %3990 = vmatpush3.msra.mxu0 %v5032_v19 }
0x38eb   :  { %3991 = vmatprep.subr.mxu0 %v4456_v2 }
0x38ec   :  { %3992 = vmatpush3.msra.mxu0 %v5039_v20 }
0x38ed   :  { %4007 = vmatprep.subr.mxu0 %v4456_v2 }
0x39a5   :  { %v2951_v3 = vpop.f32.mrf.mxu0 }
0x39a6   :  { %v2952_v4 = vadd.f32 %v2951_v3, %v2882_v63  ;;  %v3199_v3 = vld [vmem:[#allocation6] sm:$0x3] }
0x39a7   :  { %v3973_v5 = vpop.f32.mrf.mxu0 }
0x39a8   :  { %v3576_v6 = vmul.f32 -1.442695, %v2952_v4 }
0x39aa   :  { %4208 = vpow2.f32 %v3576_v6 }
0x39ab   :  { %4210 = vtanh.f32 %v2952_v4  ;;  %v3198_v4 = vld [vmem:[#allocation6 + $0xe] sm:$0x3] }
0x39ac   :  { %v3200_v5 = vsel %vm4853_vm11, %v3198_v4, %v3199_v3 }
0x39b7   :  { %v4209_v36 = vpop.eup %4208 }
0x39b8   :  { %v2959_v7 = vadd.f32 1.0, %v4209_v36  ;;  %v4211_v10 = vpop.eup %4210 }
0x39ba   :  { %4212 = vrcp.f32 %v2959_v7 }
0x39c7   :  { %v4213_v11 = vpop.eup %4212 }
0x39c8   :  { %v2962_v12 = vsel %vm4861_vm14, %v4211_v10, %v4213_v11 }
0x39c9   :  { %2965 = vrot.lane.b32.xlu0 %v2962_v12, %s4462_s6  ;;  %v2963_v15 = vmul.f32 %v2962_v12, %v2867_v27 }
0x3a3b   :  { %v2966_v14 = vpop.permute.xlu0 %2965 }
0x3a3c   :  { %v2968_v61 = vmul.f32 %v2966_v14, %v2962_v12 }
0x3a3e   :  { %2970 = vrot.lane.b32.xlu1 %v2968_v61, %s4460_s1 }
0x3ab0   :  { %v2971_v0 = vpop.permute.xlu1 %2970 }
0x3ab1   :  { %v2973_v21 = vadd.f32 %v2971_v0, %v2963_v15 }
0x3ab3   :  { %4214 = vtanh.f32 %v2973_v21 }
0x3ac0   :  { %v4215_v22 = vpop.eup %4214 }
0x3ac1   :  { %2976 = vrot.lane.b32.xlu0 %v4215_v22, %s4462_s6 }
0x3b33   :  { %v2977_v23 = vpop.permute.xlu0 %2976 }
0x3b34   :  { %v2979_v24 = vmul.f32 %v2977_v23, %v2962_v12 }
0x3b36   :  { %2981 = vrot.lane.b32.xlu1 %v2979_v24, %s4460_s1 }
0x3ba8   :  { %v2982_v25 = vpop.permute.xlu1 %2981 }
0x3ba9   :  { %2984 = vst.msk [vmem:[#allocation7 + $0x8] sm:$0x3] %vm1520_vm15, %v2982_v25  ;;  %3983 = vmatmul.mubr.msk.f32.vlgmr.msra.gmra.mxu1 %vm197_vm0, %v2982_v25 }
0x3baa   :  { %2985 = vst.msk [vmem:[#allocation7 + $0x6] sm:$0x3] %vm1522_vm2, %v2982_v25  ;;  %3997 = vmatpush3.msra.mxu1 %v5018_v16  ;;  %4004 = vmatprep.mubr.msk.f32.mxu1 %vm4457_vm1, %v4456_v2  ;;  %v2988_v16 = vsel %vm4853_vm11, %v2986_v29, %v2987_v28  ;;  %v3348_v25 = vld [vmem:[#allocation22 + $0x18] sm:$0xff]  ;;  %v3347_v28 = vld [vmem:[#allocation22 + $0x10] sm:$0xff]  ;;  %v3345_v29 = vld [vmem:[#allocation22] sm:$0xff] }
0x3bab   :  { %3998 = vmatprep.subr.mxu1 %v4456_v2 }
0x3bac   :  { %3999 = vmatpush3.msra.mxu1 %v5025_v1 }
0x3bad   :  { %4000 = vmatprep.subr.mxu1 %v4456_v2 }
0x3bae   :  { %4001 = vmatpush3.msra.mxu1 %v5032_v19 }
0x3baf   :  { %4002 = vmatprep.subr.mxu1 %v4456_v2 }
0x3bb0   :  { %4003 = vmatpush3.msra.mxu1 %v5039_v20 }
0x3bb1   :  { %4018 = vmatprep.subr.mxu1 %v4456_v2 }
0x3c69   :  { %v3057_v30 = vpop.f32.mrf.mxu1 }
0x3c6a   :  { %v3058_v31 = vadd.f32 %v3057_v30, %v2988_v16 }
0x3c6b   :  { %v3984_v32 = vpop.f32.mrf.mxu1 }
0x3c6c   :  { %v3578_v33 = vmul.f32 -1.442695, %v3058_v31 }
0x3c6e   :  { %4216 = vpow2.f32 %v3578_v33  ;;  %v3309_v33 = vshrl.u32 %v351_v13, 7 }
0x3c6f   :  { %4218 = vtanh.f32 %v3058_v31  ;;  %v3433_v31 = vld [vmem:[%s5255_s15 + $0x18] sm:$0xff] }
0x3c7b   :  { %v4217_v1 = vpop.eup %4216 }
0x3c7c   :  { %v3065_v34 = vadd.f32 1.0, %v4217_v1  ;;  %v4219_v19 = vpop.eup %4218  ;;  %v3310_v1 = vadd.s32 8, %v3309_v33 }
0x3c7e   :  { %4220 = vrcp.f32 %v3065_v34  ;;  %v3313_v34 = vstv %s3583_s24 }
0x3c7f   :  { %vm3315_vm4 = vcmp.eq.s32.totalorder %v3310_v1, %v3313_v34 }
0x3c8b   :  { %v4221_v35 = vpop.eup %4220 }
0x3c8c   :  { %v3068_v20 = vsel %vm4861_vm14, %v4219_v19, %v4221_v35  ;;  %v3330_v19 = vstv %s3329_s4 }
0x3c8d   :  { %3071 = vrot.lane.b32.xlu0 %v3068_v20, %s4462_s6  ;;  %v3069_v38 = vmul.f32 %v3068_v20, %v2973_v21  ;;  %vm3331_vm5 = vcmp.eq.s32.totalorder %v3309_v33, %v3330_v19  ;;  %vm3332_vm6 = vcmp.eq.s32.totalorder %v3310_v1, %v3330_v19 }
0x3cff   :  { %v3072_v18 = vpop.permute.xlu0 %3071 }
0x3d00   :  { %v3074_v37 = vmul.f32 %v3072_v18, %v3068_v20 }
0x3d02   :  { %3076 = vrot.lane.b32.xlu1 %v3074_v37, %s4460_s1 }
0x3d74   :  { %v3077_v39 = vpop.permute.xlu1 %3076 }
0x3d75   :  { %v3079_v40 = vadd.f32 %v3077_v39, %v3069_v38 }
0x3d77   :  { %4222 = vtanh.f32 %v3079_v40 }
0x3d84   :  { %v4223_v41 = vpop.eup %4222 }
0x3d85   :  { %3082 = vrot.lane.b32.xlu0 %v4223_v41, %s4462_s6 }
0x3df7   :  { %v3083_v42 = vpop.permute.xlu0 %3082 }
0x3df8   :  { %v3085_v43 = vmul.f32 %v3083_v42, %v3068_v20 }
0x3dfa   :  { %3087 = vrot.lane.b32.xlu1 %v3085_v43, %s4460_s1 }
0x3e6c   :  { %v3088_v44 = vpop.permute.xlu1 %3087 }
0x3e6d   :  { %3090 = vst.msk [vmem:[#allocation7 + $0xa] sm:$0x3] %vm1520_vm15, %v3088_v44  ;;  %3994 = vmatmul.mubr.msk.f32.vlgmr.msra.gmra.mxu0 %vm197_vm0, %v3088_v44 }
0x3e6e   :  { %3091 = vst.msk [vmem:[#allocation7 + $0x4] sm:$0x3] %vm1522_vm2, %v3088_v44  ;;  %4015 = vmatprep.mubr.msk.f32.mxu0 %vm4457_vm1, %v4456_v2  ;;  %4008 = vmatpush3.msra.mxu0 %v3348_v25 }
0x3e6f   :  { %4009 = vmatprep.subr.mxu0 %v4456_v2 }
0x3e70   :  { %4010 = vmatpush3.msra.mxu0 %v3347_v28 }
0x3e71   :  { %4011 = vmatprep.subr.mxu0 %v4456_v2 }
0x3e72   :  { %4012 = vmatpush3.msra.mxu0 %v3346_v26 }
0x3e73   :  { %4013 = vmatprep.subr.mxu0 %v4456_v2 }
0x3e74   :  { %4014 = vmatpush3.msra.mxu0 %v3345_v29 }
0x3f2d   :  { %v3163_v48 = vpop.f32.mrf.mxu0 }
0x3f2e   :  { %v3164_v49 = vadd.f32 %v3163_v48, %v3094_v47 }
0x3f2f   :  { %v3995_v50 = vpop.f32.mrf.mxu0 }
0x3f30   :  { %v3580_v8 = vmul.f32 -1.442695, %v3164_v49 }
0x3f32   :  { %4224 = vpow2.f32 %v3580_v8 }
0x3f33   :  { %4226 = vtanh.f32 %v3164_v49 }
0x3f3f   :  { %v4225_v51 = vpop.eup %4224 }
0x3f40   :  { %v3171_v52 = vadd.f32 1.0, %v4225_v51  ;;  %v4227_v53 = vpop.eup %4226 }
0x3f42   :  { %4228 = vrcp.f32 %v3171_v52 }
0x3f4f   :  { %v4229_v54 = vpop.eup %4228 }
0x3f50   :  { %v3174_v9 = vsel %vm4861_vm14, %v4227_v53, %v4229_v54 }
0x3f51   :  { %3177 = vrot.lane.b32.xlu0 %v3174_v9, %s4462_s6  ;;  %v3175_v56 = vmul.f32 %v3174_v9, %v3079_v40 }
0x3fc3   :  { %v3178_v55 = vpop.permute.xlu0 %3177 }
0x3fc4   :  { %v3180_v27 = vmul.f32 %v3178_v55, %v3174_v9 }
0x3fc6   :  { %3182 = vrot.lane.b32.xlu1 %v3180_v27, %s4460_s1 }
0x4038   :  { %v3183_v57 = vpop.permute.xlu1 %3182 }
0x4039   :  { %v3185_v58 = vadd.f32 %v3183_v57, %v3175_v56  ;;  %v3432_v57 = vld [vmem:[%s5255_s15 + $0x10] sm:$0xff] }
0x403b   :  { %4230 = vtanh.f32 %v3185_v58 }
0x4048   :  { %v4231_v59 = vpop.eup %4230 }
0x4049   :  { %3188 = vrot.lane.b32.xlu0 %v4231_v59, %s4462_s6  ;;  %v3430_v59 = vld [vmem:[%s5255_s15] sm:$0xff] }
0x40bb   :  { %v3189_v60 = vpop.permute.xlu0 %3188 }
0x40bc   :  { %v3191_v62 = vmul.f32 %v3189_v60, %v3174_v9  ;;  %v3586_v60 = vld [vmem:[#allocation24] ss:$0 sm:$0xff] }
0x40be   :  { %3193 = vrot.lane.b32.xlu1 %v3191_v62, %s4460_s1 }
0x4130   :  { %v3194_v63 = vpop.permute.xlu1 %3193 }
0x4131   :  { %3196 = vst.msk [vmem:[#allocation7 + $0xc] sm:$0x3] %vm1520_vm15, %v3194_v63  ;;  %4005 = vmatmul.mubr.msk.f32.vlgmr.msra.gmra.mxu1 %vm197_vm0, %v3194_v63 }
0x4132   :  { %3197 = vst.msk [vmem:[#allocation7 + $0x2] sm:$0x3] %vm1522_vm2, %v3194_v63  ;;  %4026 = vmatprep.mubr.msk.f32.mxu1 %vm4457_vm1, %v4456_v2  ;;  %4019 = vmatpush3.msra.mxu1 %v3433_v31  ;;  %vm3314_vm1 = vcmp.eq.s32.totalorder %v3309_v33, %v3313_v34 }
0x4133   :  { %4020 = vmatprep.subr.mxu1 %v4456_v2 }
0x4134   :  { %4021 = vmatpush3.msra.mxu1 %v3432_v57 }
0x4135   :  { %4022 = vmatprep.subr.mxu1 %v4456_v2 }
0x41f1   :  { %v3269_v6 = vpop.f32.mrf.mxu1 }
0x41f2   :  { %v3270_v36 = vadd.f32 %v3269_v6, %v3200_v5  ;;  %v3588_v5 = vld [vmem:[#allocation8] ss:$0 sm:$0xff] }
0x41f3   :  { %v4006_v7 = vpop.f32.mrf.mxu1 }
0x41f4   :  { %v3582_v10 = vmul.f32 -1.442695, %v3270_v36 }
0x41f6   :  { %4232 = vpow2.f32 %v3582_v10 }
0x41f7   :  { %4234 = vtanh.f32 %v3270_v36 }
0x4203   :  { %v4233_v11 = vpop.eup %4232 }
0x4204   :  { %v3277_v12 = vadd.f32 1.0, %v4233_v11  ;;  %v4235_v14 = vpop.eup %4234 }
0x4206   :  { %4236 = vrcp.f32 %v3277_v12 }
0x4213   :  { %v4237_v61 = vpop.eup %4236 }
0x4214   :  { %v3280_v15 = vsel %vm4861_vm14, %v4235_v14, %v4237_v61 }
0x4215   :  { %3283 = vrot.lane.b32.xlu0 %v3280_v15, %s4462_s6  ;;  %v3281_v17 = vmul.f32 %v3280_v15, %v3185_v58  ;;  %v3431_v58 = vld [vmem:[%s5255_s15 + $0x8] sm:$0xff] }
0x4216   :  { %4023 = vmatpush3.msra.mxu1 %v3431_v58 }
0x4217   :  { %4024 = vmatprep.subr.mxu1 %v4456_v2 }
0x4218   :  { %4025 = vmatpush3.msra.mxu1 %v3430_v59 }
0x4287   :  { %v3284_v0 = vpop.permute.xlu0 %3283 }
0x4288   :  { %v3286_v21 = vmul.f32 %v3284_v0, %v3280_v15 }
0x428a   :  { %3288 = vrot.lane.b32.xlu1 %v3286_v21, %s4460_s1 }
0x42fc   :  { %v3289_v22 = vpop.permute.xlu1 %3288 }
0x42fd   :  { %v3291_v23 = vadd.f32 %v3289_v22, %v3281_v17 }
0x42ff   :  { %4238 = vtanh.f32 %v3291_v23 }
0x430c   :  { %v4239_v24 = vpop.eup %4238 }
0x430d   :  { %3294 = vrot.lane.b32.xlu0 %v4239_v24, %s4462_s6 }
0x437f   :  { %v3295_v16 = vpop.permute.xlu0 %3294 }
0x4380   :  { %v3297_v30 = vmul.f32 %v3295_v16, %v3280_v15 }
0x4382   :  { %3299 = vrot.lane.b32.xlu1 %v3297_v30, %s4460_s1 }
0x43f4   :  { %v3300_v32 = vpop.permute.xlu1 %3299 }
0x43f5   :  { %3302 = vst.msk [vmem:[#allocation7 + $0xe] sm:$0x3] %vm1520_vm15, %v3300_v32 }
0x43f6   :  { %3303 = vst.msk [vmem:[#allocation7] sm:$0x3] %vm1522_vm2, %v3300_v32 }
0x43fc   :  { %v3305_v20 = vld [vmem:[#allocation7 + $0x8] sm:$0xff] }
0x43fd   :  { %v3304_v35 = vld [vmem:[#allocation7] sm:$0xff]  ;;  %v3307_v37 = vmax.f32 %v3305_v20, 0.0 }
0x43fe   :  { %v3306_v18 = vmax.f32 %v3304_v35, 0.0 }
0x43ff   :  { %v3317_v39 = vsel %vm3315_vm4, %v3307_v37, 0.0  ;;  %v3334_v40 = vsel %vm3332_vm6, %v3307_v37, 0.0 }
0x4400   :  { %v3316_v38 = vsel %vm3314_vm1, %v3306_v18, 0.0  ;;  %v3333_v13 = vsel %vm3331_vm5, %v3306_v18, 0.0  ;;  %v3319_v42 = vsel %vm197_vm0, %v3317_v39, 0.0  ;;  %v3336_v44 = vsel %vm197_vm0, %v3334_v40, 0.0 }
0x4401   :  { %v3318_v41 = vsel %vm197_vm0, %v3316_v38, 0.0  ;;  %v3335_v43 = vsel %vm197_vm0, %v3333_v13, 0.0 }
0x4402   :  { %v3320_v45 = vadd.f32 %v3319_v42, %v3318_v41  ;;  %v3337_v46 = vadd.f32 %v3336_v44, %v3335_v43 }
0x4404   :  { %v3321_v47 = vrot.slane %v3320_v45, 4  ;;  %v3338_v48 = vrot.slane %v3337_v46, 4 }
0x4406   :  { %v3322_v49 = vadd.f32 %v3321_v47, %v3320_v45  ;;  %v3339_v50 = vadd.f32 %v3338_v48, %v3337_v46 }
0x4408   :  { %v3323_v8 = vrot.slane %v3322_v49, 2  ;;  %v3340_v51 = vrot.slane %v3339_v50, 2 }
0x440a   :  { %v3324_v52 = vadd.f32 %v3323_v8, %v3322_v49  ;;  %v3341_v53 = vadd.f32 %v3340_v51, %v3339_v50 }
0x440c   :  { %v3325_v54 = vrot.slane %v3324_v52, 1  ;;  %v3342_v9 = vrot.slane %v3341_v53, 1 }
0x440e   :  { %v3326_v55 = vadd.f32 %v3325_v54, %v3324_v52  ;;  %v3343_v27 = vadd.f32 %v3342_v9, %v3341_v53 }
0x4410   :  { %v3344_v56 = vsel %vm374_vm3, %v3326_v55, %v3343_v27  ;;  %vm3514_vm3 = vcmask 1024  }
0x4411   :  { %4016 = vmatmul.mubr.msk.f32.vlgmr.msra.gmra.mxu0 %vm197_vm0, %v3344_v56 }
0x44d1   :  { %v3425_v62 = vpop.f32.mrf.mxu0 }
0x44d2   :  { %v3426_v63 = vadd.f32 %v3586_v60, %v3425_v62 }
0x44d3   :  { %v4017_v3 = vpop.f32.mrf.mxu0 }
0x44d4   :  { %v3429_v4 = vmax.f32 %v3426_v63, 0.0 }
0x44d6   :  { %4027 = vmatmul.mubr.msk.f32.vlgmr.msra.gmra.mxu1 %vm197_vm0, %v3429_v4 }
0x4596   :  { %v3510_v6 = vpop.f32.mrf.mxu1 }
0x4597   :  { %v3511_v36 = vadd.f32 %v3588_v5, %v3510_v6 }
0x4598   :  { %v4028_v7 = vpop.f32.mrf.mxu1 }
0x4599   :  { %3515 = vst.msk [vmem:[%s5257_s17] sm:$0x3] %vm3514_vm3, %v3511_v36 }
0x459a   :  { %3520 = vsyncpa [#allocation10], 1 }
0x459b   :  { %3521 = vsyncpa [#allocation14], 1 }
0x459c   :  { %3522 = vsyncpa [#allocation17], 1 }
0x459d   :  { %3523 = vsyncpa [#allocation20], 1 }
0x459e   :  { %3524 = vsyncpa [#allocation23], 1 }
0x459f   :  { %3525 = vsyncpa [#allocation11], 1 }

</bundles_post_ra>
